<compile_context>
chip_gen: v6e
topology: v6e:2x2x1
jax: 0.10.0
libtpu: 0.0.40
codegen_flags: <defaults>
</compile_context>

<pallas_src>
import jax
import jax.numpy as jnp
from jax.experimental import pallas as pl
from jax.experimental.pallas import tpu as pltpu


# ---------------- Pallas kernels ----------------

def _conv_pool_kernel(c00_ref, c01_ref, c10_ref, c11_ref, w_ref, b_ref, o_ref):
    """Fused conv-as-matmul + bias + ReLU + 2x2 max-pool epilogue.

    The four c*_refs hold im2col patch rows for the four corners of each 2x2
    pooling window (same pooled-pixel order), so pooling is a VPU maximum chain
    over four lane-dense [tm, Npad] tiles while they are still in VMEM.
    """
    w = w_ref[...]
    b = b_ref[...]

    def branch(c_ref):
        acc = jnp.dot(c_ref[...], w, preferred_element_type=jnp.float32)
        return jnp.maximum(acc + b, 0.0)          # bias + ReLU fused

    m = jnp.maximum(jnp.maximum(branch(c00_ref), branch(c01_ref)),
                    jnp.maximum(branch(c10_ref), branch(c11_ref)))
    o_ref[...] = m.astype(o_ref.dtype)


def _mlp_kernel(x_ref, w1_ref, b1_ref, w2_ref, b2_ref, o_ref):
    """Fused fc1 + ReLU + fc2; both (padded) weight tiles resident in VMEM."""
    h = jnp.dot(x_ref[...], w1_ref[...], preferred_element_type=jnp.float32)
    h = jnp.maximum(h + b1_ref[...], 0.0).astype(jnp.bfloat16)
    o = jnp.dot(h, w2_ref[...], preferred_element_type=jnp.float32)
    o_ref[...] = (o + b2_ref[...]).astype(o_ref.dtype)


_COMPILER_PARAMS = pltpu.CompilerParams(
    dimension_semantics=("parallel",),            # independent M tiles -> megacore on v7x
    vmem_limit_bytes=32 * 1024 * 1024,
)


def _pick_tm(m):
    # Largest tile that keeps double-buffered blocks far under scoped VMEM.
    return m if m <= 512 else 512


# ---------------- pallas_call wrappers ----------------

def conv_relu_pool(corners, w_pad, b_pad):
    """corners: 4x [M, Kpad] bf16; w_pad: [Kpad, Npad] bf16; b_pad: [1, Npad] f32."""
    M, Kp = corners[0].shape
    Np = w_pad.shape[1]
    tm = _pick_tm(M)
    patch_spec = pl.BlockSpec((tm, Kp), lambda i: (i, 0))
    return pl.pallas_call(
        _conv_pool_kernel,
        out_shape=jax.ShapeDtypeStruct((M, Np), jnp.bfloat16),
        grid=(pl.cdiv(M, tm),),
        in_specs=[patch_spec, patch_spec, patch_spec, patch_spec,
                  pl.BlockSpec((Kp, Np), lambda i: (0, 0)),
                  pl.BlockSpec((1, Np), lambda i: (0, 0))],
        out_specs=pl.BlockSpec((tm, Np), lambda i: (i, 0)),
        compiler_params=_COMPILER_PARAMS,
    )(*corners, w_pad, b_pad)


def mlp(x, w1, b1, w2, b2):
    M, K = x.shape
    N1 = w1.shape[1]
    N2 = w2.shape[1]
    tm = _pick_tm(M)
    return pl.pallas_call(
        _mlp_kernel,
        out_shape=jax.ShapeDtypeStruct((M, N2), jnp.float32),
        grid=(pl.cdiv(M, tm),),
        in_specs=[pl.BlockSpec((tm, K), lambda i: (i, 0)),
                  pl.BlockSpec((K, N1), lambda i: (0, 0)),
                  pl.BlockSpec((1, N1), lambda i: (0, 0)),
                  pl.BlockSpec((N1, N2), lambda i: (0, 0)),
                  pl.BlockSpec((1, N2), lambda i: (0, 0))],
        out_specs=pl.BlockSpec((tm, N2), lambda i: (i, 0)),
        compiler_params=_COMPILER_PARAMS,
    )(x, w1, b1, w2, b2)


# ---------------- XLA-side glue ----------------

def _corner_patches(x, kh, kw):
    """x: [B,H,W,C] (bf16). Returns four corner im2col matrices, each
    [B*Ho2*Wo2, kh*kw*C] (row order (b, ho2, wo2); K order (kh, kw, c)),
    plus the pooled spatial dims (Ho2, Wo2)."""
    B, H, W, C = x.shape
    Ho, Wo = H - kh + 1, W - kw + 1
    Ho2, Wo2 = Ho // 2, Wo // 2
    mats = []
    for di in range(2):
        for dj in range(2):
            cols = []
            for i in range(kh):
                for j in range(kw):
                    s0, s1 = di + i, dj + j
                    sl = x[:, s0:s0 + 2 * (Ho2 - 1) + 1:2,
                              s1:s1 + 2 * (Wo2 - 1) + 1:2, :]   # [B, Ho2, Wo2, C]
                    cols.append(sl)
            p = jnp.stack(cols, axis=3)                          # [B, Ho2, Wo2, kh*kw, C]
            mats.append(p.reshape(B * Ho2 * Wo2, kh * kw * C))
    return mats, (Ho2, Wo2)


def _pad_k(mats, kpad):
    K = mats[0].shape[1]
    if K == kpad:
        return mats
    return [jnp.pad(m, ((0, 0), (0, kpad - K))) for m in mats]


# ---------------- params / forward ----------------

def init_params(key):
    """Deterministic uniform(-1/sqrt(fan_in), 1/sqrt(fan_in)) init, then padded
    to lane-dense (N multiple of 128) / 8-aligned-K bf16 operands."""
    ks = jax.random.split(key, 8)

    def u(k, shape, fan_in):
        bound = 1.0 / jnp.sqrt(jnp.float32(fan_in))
        return jax.random.uniform(k, shape, jnp.float32, -bound, bound)

    def pad_w(w, kpad, npad):
        K, N = w.shape
        return jnp.pad(w, ((0, kpad - K), (0, npad - N))).astype(jnp.bfloat16)

    def pad_b(b, npad):
        return jnp.pad(b, (0, npad - b.shape[0])).reshape(1, npad)

    w1 = u(ks[0], (25 * 1, 20), 25)          # conv1, rows ordered (kh, kw, cin)
    b1 = u(ks[1], (20,), 25)
    w2 = u(ks[2], (25 * 20, 50), 500)        # conv2, rows ordered (kh, kw, cin)
    b2 = u(ks[3], (50,), 500)
    wf1 = u(ks[4], (4 * 4 * 50, 500), 800)   # fc1, rows ordered (h, w, c) -> no transpose needed
    bf1 = u(ks[5], (500,), 800)
    wf2 = u(ks[6], (500, 10), 500)
    bf2 = u(ks[7], (10,), 500)

    return {
        "w1": pad_w(w1, 32, 128),   "b1": pad_b(b1, 128),
        "w2": pad_w(w2, 512, 128),  "b2": pad_b(b2, 128),
        "wf1": pad_w(wf1, 800, 512), "bf1": pad_b(bf1, 512),
        "wf2": pad_w(wf2, 512, 128), "bf2": pad_b(bf2, 128),
    }


def net_forward(params, x_nchw):
    B = x_nchw.shape[0]
    x = jnp.transpose(x_nchw, (0, 2, 3, 1)).astype(jnp.bfloat16)   # NCHW -> NHWC, bf16

    # conv1 + ReLU + maxpool2x2 : [B,28,28,1] -> [B,12,12,20] (channels padded to 128)
    corners, (ph, pw) = _corner_patches(x, 5, 5)                   # 4 x [B*144, 25]
    corners = _pad_k(corners, 32)
    y = conv_relu_pool(corners, params["w1"], params["b1"])        # [B*144, 128] bf16
    y = y.reshape(B, ph, pw, 128)[..., :20]

    # conv2 + ReLU + maxpool2x2 : [B,12,12,20] -> [B,4,4,50] (channels padded to 128)
    corners, (ph, pw) = _corner_patches(y, 5, 5)                   # 4 x [B*16, 500]
    corners = _pad_k(corners, 512)
    y = conv_relu_pool(corners, params["w2"], params["b2"])        # [B*16, 128] bf16
    y = y.reshape(B, ph, pw, 128)[..., :50]                        # [B,4,4,50]

    # flatten in (h, w, c) order; wf1 rows were laid out to match -> no HBM transpose
    feat = y.reshape(B, 4 * 4 * 50)

    out = mlp(feat, params["wf1"], params["bf1"], params["wf2"], params["bf2"])  # [B,128] f32
    return out[:, :10]


if __name__ == "__main__":
    key = jax.random.PRNGKey(0)
    pk, xk = jax.random.split(key)
    params = init_params(pk)
    # 28x28 single-channel input is required for the 4*4*50 flatten (MNIST-style).
    x = jax.random.normal(xk, (2, 1, 28, 28), jnp.float32)
    out = jax.jit(net_forward)(params, x)
    out = jax.block_until_ready(out)
    assert out.shape == (2, 10) and out.dtype == jnp.float32
    assert bool(jnp.all(jnp.isfinite(out)))
    print("KERNEL_OK")
</pallas_src>

<mosaic_0001>
module attributes {stable_mosaic.version = 11 : i64} {
  func.func @_conv_pool_kernel(%arg0: i32, %arg1: memref<288x32xbf16, #tpu.memory_space<vmem>>, %arg2: memref<288x32xbf16, #tpu.memory_space<vmem>>, %arg3: memref<288x32xbf16, #tpu.memory_space<vmem>>, %arg4: memref<288x32xbf16, #tpu.memory_space<vmem>>, %arg5: memref<32x128xbf16, #tpu.memory_space<vmem>>, %arg6: memref<1x128xf32, #tpu.memory_space<vmem>>, %arg7: memref<288x128xbf16, #tpu.memory_space<vmem>>) attributes {dimension_semantics = [#tpu.dimension_semantics<parallel>], iteration_bounds = array<i64: 1>, scalar_prefetch = 0 : i64, scratch_operands = 0 : i64, tpu.core_type = #tpu.core_type<tc>, window_params = [{transform_indices = @transform_0, window_bounds = array<i64: 288, 32>}, {transform_indices = @transform_1, window_bounds = array<i64: 288, 32>}, {transform_indices = @transform_2, window_bounds = array<i64: 288, 32>}, {transform_indices = @transform_3, window_bounds = array<i64: 288, 32>}, {pipeline_mode = #tpu.pipeline_mode<synchronous>, transform_indices = @transform_4, window_bounds = array<i64: 32, 128>}, {pipeline_mode = #tpu.pipeline_mode<synchronous>, transform_indices = @transform_5, window_bounds = array<i64: 1, 128>}, {transform_indices = @transform_6, window_bounds = array<i64: 288, 128>}]} {
    %c0 = arith.constant 0 : index
    %c0_0 = arith.constant 0 : index
    %0 = vector.load %arg5[%c0, %c0_0] : memref<32x128xbf16, #tpu.memory_space<vmem>>, vector<32x128xbf16>
    %c0_1 = arith.constant 0 : index
    %c0_2 = arith.constant 0 : index
    %1 = vector.load %arg6[%c0_1, %c0_2] : memref<1x128xf32, #tpu.memory_space<vmem>>, vector<1x128xf32>
    %c0_3 = arith.constant 0 : index
    %c0_4 = arith.constant 0 : index
    %2 = vector.load %arg1[%c0_3, %c0_4] : memref<288x32xbf16, #tpu.memory_space<vmem>>, vector<288x32xbf16>
    %cst = arith.constant dense<0.000000e+00> : vector<288x128xf32>
    %3 = tpu.matmul %2, %0, %cst {dimension_numbers = #tpu.dot_dimension_numbers<[1], [0], [0], [1], [0, 0, 1, 1], [], []>} : vector<288x32xbf16>, vector<32x128xbf16>, vector<288x128xf32> -> vector<288x128xf32>
    %4 = vector.broadcast %1 : vector<1x128xf32> to vector<288x128xf32>
    %5 = arith.addf %3, %4 : vector<288x128xf32>
    %cst_5 = arith.constant 0.000000e+00 : f32
    %6 = vector.broadcast %cst_5 : f32 to vector<288x128xf32>
    %7 = arith.maximumf %5, %6 : vector<288x128xf32>
    %c0_6 = arith.constant 0 : index
    %c0_7 = arith.constant 0 : index
    %8 = vector.load %arg2[%c0_6, %c0_7] : memref<288x32xbf16, #tpu.memory_space<vmem>>, vector<288x32xbf16>
    %cst_8 = arith.constant dense<0.000000e+00> : vector<288x128xf32>
    %9 = tpu.matmul %8, %0, %cst_8 {dimension_numbers = #tpu.dot_dimension_numbers<[1], [0], [0], [1], [0, 0, 1, 1], [], []>} : vector<288x32xbf16>, vector<32x128xbf16>, vector<288x128xf32> -> vector<288x128xf32>
    %10 = vector.broadcast %1 : vector<1x128xf32> to vector<288x128xf32>
    %11 = arith.addf %9, %10 : vector<288x128xf32>
    %cst_9 = arith.constant 0.000000e+00 : f32
    %12 = vector.broadcast %cst_9 : f32 to vector<288x128xf32>
    %13 = arith.maximumf %11, %12 : vector<288x128xf32>
    %14 = arith.maximumf %7, %13 : vector<288x128xf32>
    %c0_10 = arith.constant 0 : index
    %c0_11 = arith.constant 0 : index
    %15 = vector.load %arg3[%c0_10, %c0_11] : memref<288x32xbf16, #tpu.memory_space<vmem>>, vector<288x32xbf16>
    %cst_12 = arith.constant dense<0.000000e+00> : vector<288x128xf32>
    %16 = tpu.matmul %15, %0, %cst_12 {dimension_numbers = #tpu.dot_dimension_numbers<[1], [0], [0], [1], [0, 0, 1, 1], [], []>} : vector<288x32xbf16>, vector<32x128xbf16>, vector<288x128xf32> -> vector<288x128xf32>
    %17 = vector.broadcast %1 : vector<1x128xf32> to vector<288x128xf32>
    %18 = arith.addf %16, %17 : vector<288x128xf32>
    %cst_13 = arith.constant 0.000000e+00 : f32
    %19 = vector.broadcast %cst_13 : f32 to vector<288x128xf32>
    %20 = arith.maximumf %18, %19 : vector<288x128xf32>
    %c0_14 = arith.constant 0 : index
    %c0_15 = arith.constant 0 : index
    %21 = vector.load %arg4[%c0_14, %c0_15] : memref<288x32xbf16, #tpu.memory_space<vmem>>, vector<288x32xbf16>
    %cst_16 = arith.constant dense<0.000000e+00> : vector<288x128xf32>
    %22 = tpu.matmul %21, %0, %cst_16 {dimension_numbers = #tpu.dot_dimension_numbers<[1], [0], [0], [1], [0, 0, 1, 1], [], []>} : vector<288x32xbf16>, vector<32x128xbf16>, vector<288x128xf32> -> vector<288x128xf32>
    %23 = vector.broadcast %1 : vector<1x128xf32> to vector<288x128xf32>
    %24 = arith.addf %22, %23 : vector<288x128xf32>
    %cst_17 = arith.constant 0.000000e+00 : f32
    %25 = vector.broadcast %cst_17 : f32 to vector<288x128xf32>
    %26 = arith.maximumf %24, %25 : vector<288x128xf32>
    %27 = arith.maximumf %20, %26 : vector<288x128xf32>
    %28 = arith.maximumf %14, %27 : vector<288x128xf32>
    %29 = arith.truncf %28 : vector<288x128xf32> to vector<288x128xbf16>
    %c0_18 = arith.constant 0 : index
    %c0_19 = arith.constant 0 : index
    %30 = vector.load %arg7[%c0_18, %c0_19] : memref<288x128xbf16, #tpu.memory_space<vmem>>, vector<288x128xbf16>
    tpu.vector_store %arg7[%c0_18, %c0_19], %29 {strides = array<i32>} : memref<288x128xbf16, #tpu.memory_space<vmem>>, vector<288x128xbf16>,
    return
  }
  func.func @transform_0(%arg0: i32) -> (i32, i32) {
    %c0_i32 = arith.constant 0 : i32
    %c0_i32_0 = arith.constant 0 : i32
    return %arg0, %c0_i32 : i32, i32
  }
  func.func @transform_1(%arg0: i32) -> (i32, i32) {
    %c0_i32 = arith.constant 0 : i32
    %c0_i32_0 = arith.constant 0 : i32
    return %arg0, %c0_i32 : i32, i32
  }
  func.func @transform_2(%arg0: i32) -> (i32, i32) {
    %c0_i32 = arith.constant 0 : i32
    %c0_i32_0 = arith.constant 0 : i32
    return %arg0, %c0_i32 : i32, i32
  }
  func.func @transform_3(%arg0: i32) -> (i32, i32) {
    %c0_i32 = arith.constant 0 : i32
    %c0_i32_0 = arith.constant 0 : i32
    return %arg0, %c0_i32 : i32, i32
  }
  func.func @transform_4(%arg0: i32) -> (i32, i32) {
    %c0_i32 = arith.constant 0 : i32
    %c0_i32_0 = arith.constant 0 : i32
    %c0_i32_1 = arith.constant 0 : i32
    return %c0_i32, %c0_i32_0 : i32, i32
  }
  func.func @transform_5(%arg0: i32) -> (i32, i32) {
    %c0_i32 = arith.constant 0 : i32
    %c0_i32_0 = arith.constant 0 : i32
    %c0_i32_1 = arith.constant 0 : i32
    return %c0_i32, %c0_i32_0 : i32, i32
  }
  func.func @transform_6(%arg0: i32) -> (i32, i32) {
    %c0_i32 = arith.constant 0 : i32
    %c0_i32_0 = arith.constant 0 : i32
    return %arg0, %c0_i32 : i32, i32
  }
}

module attributes {stable_mosaic.version = 11 : i64} {
  func.func @_mlp_kernel(%arg0: i32, %arg1: memref<2x800xbf16, #tpu.memory_space<vmem>>, %arg2: memref<800x512xbf16, #tpu.memory_space<vmem>>, %arg3: memref<1x512xf32, #tpu.memory_space<vmem>>, %arg4: memref<512x128xbf16, #tpu.memory_space<vmem>>, %arg5: memref<1x128xf32, #tpu.memory_space<vmem>>, %arg6: memref<2x128xf32, #tpu.memory_space<vmem>>) attributes {dimension_semantics = [#tpu.dimension_semantics<parallel>], iteration_bounds = array<i64: 1>, scalar_prefetch = 0 : i64, scratch_operands = 0 : i64, tpu.core_type = #tpu.core_type<tc>, window_params = [{transform_indices = @transform_0, window_bounds = array<i64: 2, 800>}, {pipeline_mode = #tpu.pipeline_mode<synchronous>, transform_indices = @transform_1, window_bounds = array<i64: 800, 512>}, {pipeline_mode = #tpu.pipeline_mode<synchronous>, transform_indices = @transform_2, window_bounds = array<i64: 1, 512>}, {pipeline_mode = #tpu.pipeline_mode<synchronous>, transform_indices = @transform_3, window_bounds = array<i64: 512, 128>}, {pipeline_mode = #tpu.pipeline_mode<synchronous>, transform_indices = @transform_4, window_bounds = array<i64: 1, 128>}, {transform_indices = @transform_5, window_bounds = array<i64: 2, 128>}]} {
    %c0 = arith.constant 0 : index
    %c0_0 = arith.constant 0 : index
    %0 = vector.load %arg1[%c0, %c0_0] : memref<2x800xbf16, #tpu.memory_space<vmem>>, vector<2x800xbf16>
    %c0_1 = arith.constant 0 : index
    %c0_2 = arith.constant 0 : index
    %1 = vector.load %arg2[%c0_1, %c0_2] : memref<800x512xbf16, #tpu.memory_space<vmem>>, vector<800x512xbf16>
    %cst = arith.constant dense<0.000000e+00> : vector<2x512xf32>
    %2 = tpu.matmul %0, %1, %cst {dimension_numbers = #tpu.dot_dimension_numbers<[1], [0], [0], [1], [0, 0, 1, 1], [], []>} : vector<2x800xbf16>, vector<800x512xbf16>, vector<2x512xf32> -> vector<2x512xf32>
    %c0_3 = arith.constant 0 : index
    %c0_4 = arith.constant 0 : index
    %3 = vector.load %arg3[%c0_3, %c0_4] : memref<1x512xf32, #tpu.memory_space<vmem>>, vector<1x512xf32>
    %4 = vector.broadcast %3 : vector<1x512xf32> to vector<2x512xf32>
    %5 = arith.addf %2, %4 : vector<2x512xf32>
    %cst_5 = arith.constant 0.000000e+00 : f32
    %6 = vector.broadcast %cst_5 : f32 to vector<2x512xf32>
    %7 = arith.maximumf %5, %6 : vector<2x512xf32>
    %8 = arith.truncf %7 : vector<2x512xf32> to vector<2x512xbf16>
    %c0_6 = arith.constant 0 : index
    %c0_7 = arith.constant 0 : index
    %9 = vector.load %arg4[%c0_6, %c0_7] : memref<512x128xbf16, #tpu.memory_space<vmem>>, vector<512x128xbf16>
    %cst_8 = arith.constant dense<0.000000e+00> : vector<2x128xf32>
    %10 = tpu.matmul %8, %9, %cst_8 {dimension_numbers = #tpu.dot_dimension_numbers<[1], [0], [0], [1], [0, 0, 1, 1], [], []>} : vector<2x512xbf16>, vector<512x128xbf16>, vector<2x128xf32> -> vector<2x128xf32>
    %c0_9 = arith.constant 0 : index
    %c0_10 = arith.constant 0 : index
    %11 = vector.load %arg5[%c0_9, %c0_10] : memref<1x128xf32, #tpu.memory_space<vmem>>, vector<1x128xf32>
    %12 = vector.broadcast %11 : vector<1x128xf32> to vector<2x128xf32>
    %13 = arith.addf %10, %12 : vector<2x128xf32>
    %c0_11 = arith.constant 0 : index
    %c0_12 = arith.constant 0 : index
    %14 = vector.load %arg6[%c0_11, %c0_12] : memref<2x128xf32, #tpu.memory_space<vmem>>, vector<2x128xf32>
    tpu.vector_store %arg6[%c0_11, %c0_12], %13 {strides = array<i32>} : memref<2x128xf32, #tpu.memory_space<vmem>>, vector<2x128xf32>,
    return
  }
  func.func @transform_0(%arg0: i32) -> (i32, i32) {
    %c0_i32 = arith.constant 0 : i32
    %c0_i32_0 = arith.constant 0 : i32
    return %arg0, %c0_i32 : i32, i32
  }
  func.func @transform_1(%arg0: i32) -> (i32, i32) {
    %c0_i32 = arith.constant 0 : i32
    %c0_i32_0 = arith.constant 0 : i32
    %c0_i32_1 = arith.constant 0 : i32
    return %c0_i32, %c0_i32_0 : i32, i32
  }
  func.func @transform_2(%arg0: i32) -> (i32, i32) {
    %c0_i32 = arith.constant 0 : i32
    %c0_i32_0 = arith.constant 0 : i32
    %c0_i32_1 = arith.constant 0 : i32
    return %c0_i32, %c0_i32_0 : i32, i32
  }
  func.func @transform_3(%arg0: i32) -> (i32, i32) {
    %c0_i32 = arith.constant 0 : i32
    %c0_i32_0 = arith.constant 0 : i32
    %c0_i32_1 = arith.constant 0 : i32
    return %c0_i32, %c0_i32_0 : i32, i32
  }
  func.func @transform_4(%arg0: i32) -> (i32, i32) {
    %c0_i32 = arith.constant 0 : i32
    %c0_i32_0 = arith.constant 0 : i32
    %c0_i32_1 = arith.constant 0 : i32
    return %c0_i32, %c0_i32_0 : i32, i32
  }
  func.func @transform_5(%arg0: i32) -> (i32, i32) {
    %c0_i32 = arith.constant 0 : i32
    %c0_i32_0 = arith.constant 0 : i32
    return %arg0, %c0_i32 : i32, i32
  }
}

module attributes {stable_mosaic.version = 11 : i64} {
  func.func @_conv_pool_kernel(%arg0: i32, %arg1: memref<32x512xbf16, #tpu.memory_space<vmem>>, %arg2: memref<32x512xbf16, #tpu.memory_space<vmem>>, %arg3: memref<32x512xbf16, #tpu.memory_space<vmem>>, %arg4: memref<32x512xbf16, #tpu.memory_space<vmem>>, %arg5: memref<512x128xbf16, #tpu.memory_space<vmem>>, %arg6: memref<1x128xf32, #tpu.memory_space<vmem>>, %arg7: memref<32x128xbf16, #tpu.memory_space<vmem>>) attributes {dimension_semantics = [#tpu.dimension_semantics<parallel>], iteration_bounds = array<i64: 1>, scalar_prefetch = 0 : i64, scratch_operands = 0 : i64, tpu.core_type = #tpu.core_type<tc>, window_params = [{transform_indices = @transform_0, window_bounds = array<i64: 32, 512>}, {transform_indices = @transform_1, window_bounds = array<i64: 32, 512>}, {transform_indices = @transform_2, window_bounds = array<i64: 32, 512>}, {transform_indices = @transform_3, window_bounds = array<i64: 32, 512>}, {pipeline_mode = #tpu.pipeline_mode<synchronous>, transform_indices = @transform_4, window_bounds = array<i64: 512, 128>}, {pipeline_mode = #tpu.pipeline_mode<synchronous>, transform_indices = @transform_5, window_bounds = array<i64: 1, 128>}, {transform_indices = @transform_6, window_bounds = array<i64: 32, 128>}]} {
    %c0 = arith.constant 0 : index
    %c0_0 = arith.constant 0 : index
    %0 = vector.load %arg5[%c0, %c0_0] : memref<512x128xbf16, #tpu.memory_space<vmem>>, vector<512x128xbf16>
    %c0_1 = arith.constant 0 : index
    %c0_2 = arith.constant 0 : index
    %1 = vector.load %arg6[%c0_1, %c0_2] : memref<1x128xf32, #tpu.memory_space<vmem>>, vector<1x128xf32>
    %c0_3 = arith.constant 0 : index
    %c0_4 = arith.constant 0 : index
    %2 = vector.load %arg1[%c0_3, %c0_4] : memref<32x512xbf16, #tpu.memory_space<vmem>>, vector<32x512xbf16>
    %cst = arith.constant dense<0.000000e+00> : vector<32x128xf32>
    %3 = tpu.matmul %2, %0, %cst {dimension_numbers = #tpu.dot_dimension_numbers<[1], [0], [0], [1], [0, 0, 1, 1], [], []>} : vector<32x512xbf16>, vector<512x128xbf16>, vector<32x128xf32> -> vector<32x128xf32>
    %4 = vector.broadcast %1 : vector<1x128xf32> to vector<32x128xf32>
    %5 = arith.addf %3, %4 : vector<32x128xf32>
    %cst_5 = arith.constant 0.000000e+00 : f32
    %6 = vector.broadcast %cst_5 : f32 to vector<32x128xf32>
    %7 = arith.maximumf %5, %6 : vector<32x128xf32>
    %c0_6 = arith.constant 0 : index
    %c0_7 = arith.constant 0 : index
    %8 = vector.load %arg2[%c0_6, %c0_7] : memref<32x512xbf16, #tpu.memory_space<vmem>>, vector<32x512xbf16>
    %cst_8 = arith.constant dense<0.000000e+00> : vector<32x128xf32>
    %9 = tpu.matmul %8, %0, %cst_8 {dimension_numbers = #tpu.dot_dimension_numbers<[1], [0], [0], [1], [0, 0, 1, 1], [], []>} : vector<32x512xbf16>, vector<512x128xbf16>, vector<32x128xf32> -> vector<32x128xf32>
    %10 = vector.broadcast %1 : vector<1x128xf32> to vector<32x128xf32>
    %11 = arith.addf %9, %10 : vector<32x128xf32>
    %cst_9 = arith.constant 0.000000e+00 : f32
    %12 = vector.broadcast %cst_9 : f32 to vector<32x128xf32>
    %13 = arith.maximumf %11, %12 : vector<32x128xf32>
    %14 = arith.maximumf %7, %13 : vector<32x128xf32>
    %c0_10 = arith.constant 0 : index
    %c0_11 = arith.constant 0 : index
    %15 = vector.load %arg3[%c0_10, %c0_11] : memref<32x512xbf16, #tpu.memory_space<vmem>>, vector<32x512xbf16>
    %cst_12 = arith.constant dense<0.000000e+00> : vector<32x128xf32>
    %16 = tpu.matmul %15, %0, %cst_12 {dimension_numbers = #tpu.dot_dimension_numbers<[1], [0], [0], [1], [0, 0, 1, 1], [], []>} : vector<32x512xbf16>, vector<512x128xbf16>, vector<32x128xf32> -> vector<32x128xf32>
    %17 = vector.broadcast %1 : vector<1x128xf32> to vector<32x128xf32>
    %18 = arith.addf %16, %17 : vector<32x128xf32>
    %cst_13 = arith.constant 0.000000e+00 : f32
    %19 = vector.broadcast %cst_13 : f32 to vector<32x128xf32>
    %20 = arith.maximumf %18, %19 : vector<32x128xf32>
    %c0_14 = arith.constant 0 : index
    %c0_15 = arith.constant 0 : index
    %21 = vector.load %arg4[%c0_14, %c0_15] : memref<32x512xbf16, #tpu.memory_space<vmem>>, vector<32x512xbf16>
    %cst_16 = arith.constant dense<0.000000e+00> : vector<32x128xf32>
    %22 = tpu.matmul %21, %0, %cst_16 {dimension_numbers = #tpu.dot_dimension_numbers<[1], [0], [0], [1], [0, 0, 1, 1], [], []>} : vector<32x512xbf16>, vector<512x128xbf16>, vector<32x128xf32> -> vector<32x128xf32>
    %23 = vector.broadcast %1 : vector<1x128xf32> to vector<32x128xf32>
    %24 = arith.addf %22, %23 : vector<32x128xf32>
    %cst_17 = arith.constant 0.000000e+00 : f32
    %25 = vector.broadcast %cst_17 : f32 to vector<32x128xf32>
    %26 = arith.maximumf %24, %25 : vector<32x128xf32>
    %27 = arith.maximumf %20, %26 : vector<32x128xf32>
    %28 = arith.maximumf %14, %27 : vector<32x128xf32>
    %29 = arith.truncf %28 : vector<32x128xf32> to vector<32x128xbf16>
    %c0_18 = arith.constant 0 : index
    %c0_19 = arith.constant 0 : index
    %30 = vector.load %arg7[%c0_18, %c0_19] : memref<32x128xbf16, #tpu.memory_space<vmem>>, vector<32x128xbf16>
    tpu.vector_store %arg7[%c0_18, %c0_19], %29 {strides = array<i32>} : memref<32x128xbf16, #tpu.memory_space<vmem>>, vector<32x128xbf16>,
    return
  }
  func.func @transform_0(%arg0: i32) -> (i32, i32) {
    %c0_i32 = arith.constant 0 : i32
    %c0_i32_0 = arith.constant 0 : i32
    return %arg0, %c0_i32 : i32, i32
  }
  func.func @transform_1(%arg0: i32) -> (i32, i32) {
    %c0_i32 = arith.constant 0 : i32
    %c0_i32_0 = arith.constant 0 : i32
    return %arg0, %c0_i32 : i32, i32
  }
  func.func @transform_2(%arg0: i32) -> (i32, i32) {
    %c0_i32 = arith.constant 0 : i32
    %c0_i32_0 = arith.constant 0 : i32
    return %arg0, %c0_i32 : i32, i32
  }
  func.func @transform_3(%arg0: i32) -> (i32, i32) {
    %c0_i32 = arith.constant 0 : i32
    %c0_i32_0 = arith.constant 0 : i32
    return %arg0, %c0_i32 : i32, i32
  }
  func.func @transform_4(%arg0: i32) -> (i32, i32) {
    %c0_i32 = arith.constant 0 : i32
    %c0_i32_0 = arith.constant 0 : i32
    %c0_i32_1 = arith.constant 0 : i32
    return %c0_i32, %c0_i32_0 : i32, i32
  }
  func.func @transform_5(%arg0: i32) -> (i32, i32) {
    %c0_i32 = arith.constant 0 : i32
    %c0_i32_0 = arith.constant 0 : i32
    %c0_i32_1 = arith.constant 0 : i32
    return %c0_i32, %c0_i32_0 : i32, i32
  }
  func.func @transform_6(%arg0: i32) -> (i32, i32) {
    %c0_i32 = arith.constant 0 : i32
    %c0_i32_0 = arith.constant 0 : i32
    return %arg0, %c0_i32 : i32, i32
  }
}

</mosaic_0001>

<bundles_post_ra>
// kernel: net_forward.3
= control target key start
LH: loop header
LB: loop body
LE: loop exit
PB: predicated region body
PF: predicated region fallthrough
CT: control target
= control target key end

     0   :  { %vm173_vm0 = vcmask 261120   ;;  %s3184_s4 = inlined_call_operand.vmem [shape: bf16[32,128], index: 4, kind: input, shape index: {}]   ;;  %s3185_s0 = inlined_call_operand.vmem [shape: bf16[288,32], index: 0, kind: input, shape index: {}]   ;;  %s3186_s1 = inlined_call_operand.vmem [shape: bf16[288,32], index: 1, kind: input, shape index: {}]   ;;  %s3187_s2 = inlined_call_operand.vmem [shape: bf16[288,32], index: 2, kind: input, shape index: {}]   ;;  %s3188_s3 = inlined_call_operand.vmem [shape: bf16[288,32], index: 3, kind: input, shape index: {}]   ;;  %s3189_s5 = inlined_call_operand.vmem [shape: f32[1,128], index: 5, kind: input, shape index: {}]   ;;  %s3190_s6 = inlined_call_operand.vmem [shape: bf16[288,128], index: 6, kind: output, shape index: {}]  }
   0x1   :  { %v2478_v0 = vld [vmem:[%s3184_s4 + $0x8] sm:$0xff]   ;;  %v2479_v1 = vld [vmem:[%s3184_s4] sm:$0xff]   ;;  %v2484_v6 = vld [vmem:[%s3185_s0 + $0x10] sm:$0xff]  }
   0x2   :  { %2318 = vmatprep.subr.bf16.mxu0 %v2478_v0  ;;  %2358 = vmatprep.subr.bf16.mxu1 %v2478_v0  ;;  %v2480_v2 = vld [vmem:[%s3185_s0] sm:$0xff]   ;;  %v2482_v4 = vld [vmem:[%s3185_s0 + $0x8] sm:$0xff]   ;;  %v2485_v7 = vld [vmem:[%s3186_s1 + $0x10] sm:$0xff]  }
   0x3   :  { %2319 = vmatpush3.bf16.msra.mxu0 %v2478_v0  ;;  %2359 = vmatpush3.bf16.msra.mxu1 %v2478_v0  ;;  %v2481_v3 = vld [vmem:[%s3186_s1] sm:$0xff]   ;;  %v2483_v5 = vld [vmem:[%s3186_s1 + $0x8] sm:$0xff]   ;;  %v2486_v8 = vld [vmem:[%s3185_s0 + $0x18] sm:$0xff]  }
   0x4   :  { %2320 = vmatprep.subr.bf16.mxu0 %v2479_v1  ;;  %2360 = vmatprep.subr.bf16.mxu1 %v2479_v1  ;;  %v2487_v9 = vld [vmem:[%s3186_s1 + $0x18] sm:$0xff]   ;;  %v2488_v10 = vld [vmem:[%s3185_s0 + $0x20] sm:$0xff]   ;;  %v2490_v12 = vld [vmem:[%s3185_s0 + $0x28] sm:$0xff]  }
   0x5   :  { %2322 = vmatprep.mubr.msk.bf16.mxu0 %vm173_vm0, %v2480_v2  ;;  %2362 = vmatprep.mubr.msk.bf16.mxu1 %vm173_vm0, %v2481_v3  ;;  %v2489_v11 = vld [vmem:[%s3186_s1 + $0x20] sm:$0xff]   ;;  %v2491_v13 = vld [vmem:[%s3186_s1 + $0x28] sm:$0xff]   ;;  %v2492_v14 = vld [vmem:[%s3185_s0 + $0x30] sm:$0xff]  }
   0x6   :  { %v2493_v15 = vld [vmem:[%s3186_s1 + $0x30] sm:$0xff]   ;;  %v2494_v16 = vld [vmem:[%s3185_s0 + $0x38] sm:$0xff]   ;;  %v2496_v18 = vld [vmem:[%s3185_s0 + $0x40] sm:$0xff]  }
   0x7   :  { %2321 = vmatpush3.bf16.msra.mxu0 %v2479_v1  ;;  %2361 = vmatpush3.bf16.msra.mxu1 %v2479_v1  ;;  %v2495_v17 = vld [vmem:[%s3186_s1 + $0x38] sm:$0xff]   ;;  %v2497_v19 = vld [vmem:[%s3186_s1 + $0x40] sm:$0xff]   ;;  %v2498_v20 = vld [vmem:[%s3185_s0 + $0x48] sm:$0xff]  }
   0x8   :  { %2398 = vmatprep.subr.bf16.mxu0 %v2478_v0  ;;  %2438 = vmatprep.subr.bf16.mxu1 %v2478_v0  ;;  %v2499_v21 = vld [vmem:[%s3186_s1 + $0x48] sm:$0xff]   ;;  %v2500_v22 = vld [vmem:[%s3185_s0 + $0x50] sm:$0xff]   ;;  %v2502_v24 = vld [vmem:[%s3185_s0 + $0x58] sm:$0xff]  }
   0x9   :  { %v2501_v23 = vld [vmem:[%s3186_s1 + $0x50] sm:$0xff]   ;;  %v2503_v25 = vld [vmem:[%s3186_s1 + $0x58] sm:$0xff]   ;;  %v2504_v26 = vld [vmem:[%s3185_s0 + $0x60] sm:$0xff]  }
   0xa   :  { %2323 = vmatmul.mubr.msk.bf16.vlgmr.msra.gmra.mxu0 %vm173_vm0, %v2482_v4  ;;  %2363 = vmatmul.mubr.msk.bf16.vlgmr.msra.gmra.mxu1 %vm173_vm0, %v2483_v5  ;;  %v2505_v27 = vld [vmem:[%s3186_s1 + $0x60] sm:$0xff]   ;;  %v2506_v28 = vld [vmem:[%s3185_s0 + $0x68] sm:$0xff]   ;;  %v2508_v30 = vld [vmem:[%s3185_s0 + $0x70] sm:$0xff]  }
   0xb   :  { %2399 = vmatpush3.bf16.msra.mxu0 %v2478_v0  ;;  %2439 = vmatpush3.bf16.msra.mxu1 %v2478_v0  ;;  %v2507_v29 = vld [vmem:[%s3186_s1 + $0x68] sm:$0xff]   ;;  %v2509_v31 = vld [vmem:[%s3186_s1 + $0x70] sm:$0xff]   ;;  %v2510_v32 = vld [vmem:[%s3185_s0 + $0x78] sm:$0xff]  }
   0xc   :  { %2326 = vmatprep.mubr.msk.bf16.mxu0 %vm173_vm0, %v2484_v6  ;;  %2366 = vmatprep.mubr.msk.bf16.mxu1 %vm173_vm0, %v2485_v7  ;;  %v2511_v33 = vld [vmem:[%s3186_s1 + $0x78] sm:$0xff]   ;;  %v2512_v34 = vld [vmem:[%s3185_s0 + $0x80] sm:$0xff]   ;;  %v2514_v36 = vld [vmem:[%s3185_s0 + $0x88] sm:$0xff]  }
   0xd   :  { %2400 = vmatprep.subr.bf16.mxu0 %v2479_v1  ;;  %2440 = vmatprep.subr.bf16.mxu1 %v2479_v1  ;;  %v2513_v35 = vld [vmem:[%s3186_s1 + $0x80] sm:$0xff]   ;;  %v2515_v37 = vld [vmem:[%s3186_s1 + $0x88] sm:$0xff]   ;;  %v2520_v42 = vld [vmem:[%s3187_s2 + $0x10] sm:$0xff]  }
   0xe   :  { %v2516_v38 = vld [vmem:[%s3187_s2] sm:$0xff]   ;;  %v2518_v40 = vld [vmem:[%s3187_s2 + $0x8] sm:$0xff]   ;;  %v2521_v43 = vld [vmem:[%s3188_s3 + $0x10] sm:$0xff]  }
   0xf   :  { %2401 = vmatpush3.bf16.msra.mxu0 %v2479_v1  ;;  %2441 = vmatpush3.bf16.msra.mxu1 %v2479_v1  ;;  %v2517_v39 = vld [vmem:[%s3188_s3] sm:$0xff]   ;;  %v2519_v41 = vld [vmem:[%s3188_s3 + $0x8] sm:$0xff]   ;;  %v2522_v44 = vld [vmem:[%s3187_s2 + $0x18] sm:$0xff]  }
  0x10   :  { %v2523_v45 = vld [vmem:[%s3188_s3 + $0x18] sm:$0xff]   ;;  %v2524_v46 = vld [vmem:[%s3187_s2 + $0x20] sm:$0xff]   ;;  %v2526_v48 = vld [vmem:[%s3187_s2 + $0x28] sm:$0xff]  }
  0x11   :  { %v2525_v47 = vld [vmem:[%s3188_s3 + $0x20] sm:$0xff]   ;;  %v2527_v49 = vld [vmem:[%s3188_s3 + $0x28] sm:$0xff]   ;;  %v2528_v50 = vld [vmem:[%s3187_s2 + $0x30] sm:$0xff]  }
  0x12   :  { %2327 = vmatmul.mubr.msk.bf16.gmra.mxu0 %vm173_vm0, %v2486_v8  ;;  %2367 = vmatmul.mubr.msk.bf16.gmra.mxu1 %vm173_vm0, %v2487_v9  ;;  %v2529_v51 = vld [vmem:[%s3188_s3 + $0x30] sm:$0xff]   ;;  %v2530_v52 = vld [vmem:[%s3187_s2 + $0x38] sm:$0xff]   ;;  %v2532_v54 = vld [vmem:[%s3187_s2 + $0x40] sm:$0xff]  }
  0x13   :  { %2330 = vmatprep.mubr.msk.bf16.mxu0 %vm173_vm0, %v2488_v10  ;;  %2370 = vmatprep.mubr.msk.bf16.mxu1 %vm173_vm0, %v2489_v11  ;;  %v2531_v53 = vld [vmem:[%s3188_s3 + $0x38] sm:$0xff]   ;;  %v2533_v55 = vld [vmem:[%s3188_s3 + $0x40] sm:$0xff]   ;;  %v2534_v56 = vld [vmem:[%s3187_s2 + $0x48] sm:$0xff]  }
  0x14   :  { %v2535_v57 = vld [vmem:[%s3188_s3 + $0x48] sm:$0xff]   ;;  %v2536_v58 = vld [vmem:[%s3187_s2 + $0x50] sm:$0xff]   ;;  %v2538_v60 = vld [vmem:[%s3187_s2 + $0x58] sm:$0xff]  }
  0x15   :  { %v2537_v59 = vld [vmem:[%s3188_s3 + $0x50] sm:$0xff]   ;;  %v2539_v61 = vld [vmem:[%s3188_s3 + $0x58] sm:$0xff]   ;;  %v2540_v62 = vld [vmem:[%s3187_s2 + $0x60] sm:$0xff]  }
  0x16   :  { %v2541_v63 = vld [vmem:[%s3188_s3 + $0x60] sm:$0xff]   ;;  %v2542_v0 = vld [vmem:[%s3187_s2 + $0x68] sm:$0xff]   ;;  %v2544_v2 = vld [vmem:[%s3187_s2 + $0x70] sm:$0xff]  }
  0x17   :  { %v2543_v1 = vld [vmem:[%s3188_s3 + $0x68] sm:$0xff]   ;;  %v2545_v3 = vld [vmem:[%s3188_s3 + $0x70] sm:$0xff]   ;;  %v2546_v4 = vld [vmem:[%s3187_s2 + $0x78] sm:$0xff]  }
  0x18   :  { %v2547_v5 = vld [vmem:[%s3188_s3 + $0x78] sm:$0xff]   ;;  %v2548_v6 = vld [vmem:[%s3187_s2 + $0x80] sm:$0xff]   ;;  %v2550_v8 = vld [vmem:[%s3187_s2 + $0x88] sm:$0xff]  }
  0x19   :  { %v2549_v7 = vld [vmem:[%s3188_s3 + $0x80] sm:$0xff]   ;;  %v2551_v9 = vld [vmem:[%s3188_s3 + $0x88] sm:$0xff]  }
  0x1a   :  { %2331 = vmatmul.mubr.msk.bf16.gmra.mxu0 %vm173_vm0, %v2490_v12  ;;  %2371 = vmatmul.mubr.msk.bf16.gmra.mxu1 %vm173_vm0, %v2491_v13  ;;  %v2885_v10 = vld [vmem:[%s3189_s5] ss:$0 sm:$0xff] }
  0x1b   :  { %2334 = vmatprep.mubr.msk.bf16.mxu0 %vm173_vm0, %v2492_v14  ;;  %2374 = vmatprep.mubr.msk.bf16.mxu1 %vm173_vm0, %v2493_v15 }
  0x22   :  { %2335 = vmatmul.mubr.msk.bf16.gmra.mxu0 %vm173_vm0, %v2494_v16  ;;  %2375 = vmatmul.mubr.msk.bf16.gmra.mxu1 %vm173_vm0, %v2495_v17 }
  0x23   :  { %2338 = vmatprep.mubr.msk.bf16.mxu0 %vm173_vm0, %v2496_v18  ;;  %2378 = vmatprep.mubr.msk.bf16.mxu1 %vm173_vm0, %v2497_v19 }
  0x2a   :  { %2339 = vmatmul.mubr.msk.bf16.gmra.mxu0 %vm173_vm0, %v2498_v20  ;;  %2379 = vmatmul.mubr.msk.bf16.gmra.mxu1 %vm173_vm0, %v2499_v21 }
  0x2b   :  { %2342 = vmatprep.mubr.msk.bf16.mxu0 %vm173_vm0, %v2500_v22  ;;  %2382 = vmatprep.mubr.msk.bf16.mxu1 %vm173_vm0, %v2501_v23 }
  0x32   :  { %2343 = vmatmul.mubr.msk.bf16.gmra.mxu0 %vm173_vm0, %v2502_v24  ;;  %2383 = vmatmul.mubr.msk.bf16.gmra.mxu1 %vm173_vm0, %v2503_v25 }
  0x33   :  { %2346 = vmatprep.mubr.msk.bf16.mxu0 %vm173_vm0, %v2504_v26  ;;  %2386 = vmatprep.mubr.msk.bf16.mxu1 %vm173_vm0, %v2505_v27 }
  0x3a   :  { %2347 = vmatmul.mubr.msk.bf16.gmra.mxu0 %vm173_vm0, %v2506_v28  ;;  %2387 = vmatmul.mubr.msk.bf16.gmra.mxu1 %vm173_vm0, %v2507_v29 }
  0x3b   :  { %2350 = vmatprep.mubr.msk.bf16.mxu0 %vm173_vm0, %v2508_v30  ;;  %2390 = vmatprep.mubr.msk.bf16.mxu1 %vm173_vm0, %v2509_v31 }
  0x42   :  { %2351 = vmatmul.mubr.msk.bf16.gmra.mxu0 %vm173_vm0, %v2510_v32  ;;  %2391 = vmatmul.mubr.msk.bf16.gmra.mxu1 %vm173_vm0, %v2511_v33 }
  0x43   :  { %2354 = vmatprep.mubr.msk.bf16.mxu0 %vm173_vm0, %v2512_v34  ;;  %2394 = vmatprep.mubr.msk.bf16.mxu1 %vm173_vm0, %v2513_v35 }
  0x4a   :  { %2355 = vmatmul.mubr.msk.bf16.gmra.mxu0 %vm173_vm0, %v2514_v36  ;;  %2395 = vmatmul.mubr.msk.bf16.gmra.mxu1 %vm173_vm0, %v2515_v37 }
  0x4b   :  { %2402 = vmatprep.mubr.msk.bf16.mxu0 %vm173_vm0, %v2516_v38  ;;  %2442 = vmatprep.mubr.msk.bf16.mxu1 %vm173_vm0, %v2517_v39 }
  0x52   :  { %2403 = vmatmul.mubr.msk.bf16.vlgmr.msra.gmra.mxu0 %vm173_vm0, %v2518_v40  ;;  %2443 = vmatmul.mubr.msk.bf16.vlgmr.msra.gmra.mxu1 %vm173_vm0, %v2519_v41 }
  0x53   :  { %2406 = vmatprep.mubr.msk.bf16.mxu0 %vm173_vm0, %v2520_v42  ;;  %2446 = vmatprep.mubr.msk.bf16.mxu1 %vm173_vm0, %v2521_v43 }
  0x5a   :  { %2407 = vmatmul.mubr.msk.bf16.gmra.mxu0 %vm173_vm0, %v2522_v44  ;;  %2447 = vmatmul.mubr.msk.bf16.gmra.mxu1 %vm173_vm0, %v2523_v45 }
  0x5b   :  { %2410 = vmatprep.mubr.msk.bf16.mxu0 %vm173_vm0, %v2524_v46  ;;  %2450 = vmatprep.mubr.msk.bf16.mxu1 %vm173_vm0, %v2525_v47 }
  0x62   :  { %2411 = vmatmul.mubr.msk.bf16.gmra.mxu0 %vm173_vm0, %v2526_v48  ;;  %2451 = vmatmul.mubr.msk.bf16.gmra.mxu1 %vm173_vm0, %v2527_v49 }
  0x63   :  { %2414 = vmatprep.mubr.msk.bf16.mxu0 %vm173_vm0, %v2528_v50  ;;  %2454 = vmatprep.mubr.msk.bf16.mxu1 %vm173_vm0, %v2529_v51 }
  0x6a   :  { %2415 = vmatmul.mubr.msk.bf16.gmra.mxu0 %vm173_vm0, %v2530_v52  ;;  %2455 = vmatmul.mubr.msk.bf16.gmra.mxu1 %vm173_vm0, %v2531_v53 }
  0x6b   :  { %2418 = vmatprep.mubr.msk.bf16.mxu0 %vm173_vm0, %v2532_v54  ;;  %2458 = vmatprep.mubr.msk.bf16.mxu1 %vm173_vm0, %v2533_v55 }
  0x72   :  { %2419 = vmatmul.mubr.msk.bf16.gmra.mxu0 %vm173_vm0, %v2534_v56  ;;  %2459 = vmatmul.mubr.msk.bf16.gmra.mxu1 %vm173_vm0, %v2535_v57 }
  0x73   :  { %2422 = vmatprep.mubr.msk.bf16.mxu0 %vm173_vm0, %v2536_v58  ;;  %2462 = vmatprep.mubr.msk.bf16.mxu1 %vm173_vm0, %v2537_v59 }
  0x7a   :  { %2423 = vmatmul.mubr.msk.bf16.gmra.mxu0 %vm173_vm0, %v2538_v60  ;;  %2463 = vmatmul.mubr.msk.bf16.gmra.mxu1 %vm173_vm0, %v2539_v61 }
  0x7b   :  { %2426 = vmatprep.mubr.msk.bf16.mxu0 %vm173_vm0, %v2540_v62  ;;  %2466 = vmatprep.mubr.msk.bf16.mxu1 %vm173_vm0, %v2541_v63 }
  0x82   :  { %2427 = vmatmul.mubr.msk.bf16.gmra.mxu0 %vm173_vm0, %v2542_v0  ;;  %2467 = vmatmul.mubr.msk.bf16.gmra.mxu1 %vm173_vm0, %v2543_v1 }
  0x83   :  { %2430 = vmatprep.mubr.msk.bf16.mxu0 %vm173_vm0, %v2544_v2  ;;  %2470 = vmatprep.mubr.msk.bf16.mxu1 %vm173_vm0, %v2545_v3 }
  0x8a   :  { %2431 = vmatmul.mubr.msk.bf16.gmra.mxu0 %vm173_vm0, %v2546_v4  ;;  %2471 = vmatmul.mubr.msk.bf16.gmra.mxu1 %vm173_vm0, %v2547_v5 }
  0x8b   :  { %2434 = vmatprep.mubr.msk.bf16.mxu0 %vm173_vm0, %v2548_v6  ;;  %2474 = vmatprep.mubr.msk.bf16.mxu1 %vm173_vm0, %v2549_v7 }
  0x92   :  { %2435 = vmatmul.mubr.msk.bf16.gmra.mxu0 %vm173_vm0, %v2550_v8  ;;  %2475 = vmatmul.mubr.msk.bf16.gmra.mxu1 %vm173_vm0, %v2551_v9 }
  0xca   :  { %v2324_v11 = vpop.f32.mrf.mxu0  ;;  %v2364_v12 = vpop.f32.mrf.mxu1 }
  0xcb   :  { %v271_v13 = vadd.f32 %v2324_v11, %v2885_v10  ;;  %v664_v14 = vadd.f32 %v2364_v12, %v2885_v10 }
  0xcc   :  { %v262_v15 = vpop.f32.mrf.mxu0  ;;  %v655_v16 = vpop.f32.mrf.mxu1 }
  0xcd   :  { %v407_v17 = vmax.f32 %v271_v13, 0.0  ;;  %v800_v18 = vmax.f32 %v664_v14, 0.0  ;;  %v263_v19 = vadd.f32 %v2885_v10, %v262_v15  ;;  %v656_v20 = vadd.f32 %v2885_v10, %v655_v16 }
  0xce   :  { %v2325_v21 = vpop.f32.mrf.mxu0  ;;  %v2365_v22 = vpop.f32.mrf.mxu1 }
  0xcf   :  { %v2891_v23 = vmax.f32 %v407_v17, %v800_v18  ;;  %v405_v24 = vmax.f32 %v263_v19, 0.0  ;;  %v798_v25 = vmax.f32 %v656_v20, 0.0  ;;  %v274_v26 = vadd.f32 %v2325_v21, %v2885_v10 }
  0xd0   :  { %v667_v27 = vadd.f32 %v2365_v22, %v2885_v10  ;;  %v265_v28 = vpop.f32.mrf.mxu0  ;;  %v658_v29 = vpop.f32.mrf.mxu1 }
  0xd1   :  { %v2895_v30 = vmax.f32 %v405_v24, %v798_v25  ;;  %v408_v31 = vmax.f32 %v274_v26, 0.0  ;;  %v266_v32 = vadd.f32 %v2885_v10, %v265_v28  ;;  %v659_v33 = vadd.f32 %v2885_v10, %v658_v29 }
  0xd2   :  { %v801_v34 = vmax.f32 %v667_v27, 0.0  ;;  %v2328_v35 = vpop.f32.mrf.mxu0  ;;  %v2368_v36 = vpop.f32.mrf.mxu1 }
  0xd3   :  { %v406_v37 = vmax.f32 %v266_v32, 0.0  ;;  %v799_v38 = vmax.f32 %v659_v33, 0.0  ;;  %v287_v39 = vadd.f32 %v2328_v35, %v2885_v10  ;;  %v680_v40 = vadd.f32 %v2368_v36, %v2885_v10 }
  0xd4   :  { %v2901_v41 = vmax.f32 %v408_v31, %v801_v34  ;;  %v278_v42 = vpop.f32.mrf.mxu0  ;;  %v671_v43 = vpop.f32.mrf.mxu1 }
  0xd5   :  { %v2903_v44 = vmax.f32 %v406_v37, %v799_v38  ;;  %v411_v45 = vmax.f32 %v287_v39, 0.0  ;;  %v804_v46 = vmax.f32 %v680_v40, 0.0  ;;  %v279_v47 = vadd.f32 %v2885_v10, %v278_v42 }
  0xd6   :  { %v672_v48 = vadd.f32 %v2885_v10, %v671_v43  ;;  %v2329_v49 = vpop.f32.mrf.mxu0  ;;  %v2369_v50 = vpop.f32.mrf.mxu1 }
  0xd7   :  { %v2907_v51 = vmax.f32 %v411_v45, %v804_v46  ;;  %v409_v52 = vmax.f32 %v279_v47, 0.0  ;;  %v290_v53 = vadd.f32 %v2329_v49, %v2885_v10  ;;  %v683_v54 = vadd.f32 %v2369_v50, %v2885_v10 }
  0xd8   :  { %v802_v55 = vmax.f32 %v672_v48, 0.0  ;;  %v281_v56 = vpop.f32.mrf.mxu0  ;;  %v674_v57 = vpop.f32.mrf.mxu1 }
  0xd9   :  { %v412_v58 = vmax.f32 %v290_v53, 0.0  ;;  %v805_v59 = vmax.f32 %v683_v54, 0.0  ;;  %v282_v60 = vadd.f32 %v2885_v10, %v281_v56  ;;  %v675_v61 = vadd.f32 %v2885_v10, %v674_v57 }
  0xda   :  { %v2913_v62 = vmax.f32 %v409_v52, %v802_v55  ;;  %v2332_v63 = vpop.f32.mrf.mxu0  ;;  %v2372_v0 = vpop.f32.mrf.mxu1 }
  0xdb   :  { %v2915_v1 = vmax.f32 %v412_v58, %v805_v59  ;;  %v410_v2 = vmax.f32 %v282_v60, 0.0  ;;  %v803_v3 = vmax.f32 %v675_v61, 0.0  ;;  %v303_v4 = vadd.f32 %v2332_v63, %v2885_v10 }
  0xdc   :  { %v696_v5 = vadd.f32 %v2372_v0, %v2885_v10  ;;  %v294_v6 = vpop.f32.mrf.mxu0  ;;  %v687_v7 = vpop.f32.mrf.mxu1 }
  0xdd   :  { %v2919_v8 = vmax.f32 %v410_v2, %v803_v3  ;;  %v415_v9 = vmax.f32 %v303_v4, 0.0  ;;  %v295_v11 = vadd.f32 %v2885_v10, %v294_v6  ;;  %v688_v12 = vadd.f32 %v2885_v10, %v687_v7 }
  0xde   :  { %v808_v13 = vmax.f32 %v696_v5, 0.0  ;;  %v2333_v14 = vpop.f32.mrf.mxu0  ;;  %v2373_v15 = vpop.f32.mrf.mxu1 }
  0xdf   :  { %v413_v16 = vmax.f32 %v295_v11, 0.0  ;;  %v806_v17 = vmax.f32 %v688_v12, 0.0  ;;  %v306_v18 = vadd.f32 %v2333_v14, %v2885_v10  ;;  %v699_v19 = vadd.f32 %v2373_v15, %v2885_v10 }
  0xe0   :  { %v2925_v20 = vmax.f32 %v415_v9, %v808_v13  ;;  %v297_v21 = vpop.f32.mrf.mxu0  ;;  %v690_v22 = vpop.f32.mrf.mxu1 }
  0xe1   :  { %v2927_v24 = vmax.f32 %v413_v16, %v806_v17  ;;  %v416_v25 = vmax.f32 %v306_v18, 0.0  ;;  %v809_v26 = vmax.f32 %v699_v19, 0.0  ;;  %v298_v27 = vadd.f32 %v2885_v10, %v297_v21 }
  0xe2   :  { %v691_v28 = vadd.f32 %v2885_v10, %v690_v22  ;;  %v2336_v29 = vpop.f32.mrf.mxu0  ;;  %v2376_v31 = vpop.f32.mrf.mxu1 }
  0xe3   :  { %v2931_v32 = vmax.f32 %v416_v25, %v809_v26  ;;  %v414_v33 = vmax.f32 %v298_v27, 0.0  ;;  %v319_v34 = vadd.f32 %v2336_v29, %v2885_v10  ;;  %v712_v35 = vadd.f32 %v2376_v31, %v2885_v10 }
  0xe4   :  { %v807_v36 = vmax.f32 %v691_v28, 0.0  ;;  %v310_v37 = vpop.f32.mrf.mxu0  ;;  %v703_v38 = vpop.f32.mrf.mxu1 }
  0xe5   :  { %v419_v39 = vmax.f32 %v319_v34, 0.0  ;;  %v812_v40 = vmax.f32 %v712_v35, 0.0  ;;  %v311_v42 = vadd.f32 %v2885_v10, %v310_v37  ;;  %v704_v43 = vadd.f32 %v2885_v10, %v703_v38 }
  0xe6   :  { %v2937_v45 = vmax.f32 %v414_v33, %v807_v36  ;;  %v2337_v46 = vpop.f32.mrf.mxu0  ;;  %v2377_v47 = vpop.f32.mrf.mxu1 }
  0xe7   :  { %v2939_v48 = vmax.f32 %v419_v39, %v812_v40  ;;  %v417_v49 = vmax.f32 %v311_v42, 0.0  ;;  %v810_v50 = vmax.f32 %v704_v43, 0.0  ;;  %v322_v52 = vadd.f32 %v2337_v46, %v2885_v10 }
  0xe8   :  { %v715_v53 = vadd.f32 %v2377_v47, %v2885_v10  ;;  %v313_v54 = vpop.f32.mrf.mxu0  ;;  %v706_v55 = vpop.f32.mrf.mxu1 }
  0xe9   :  { %v2943_v56 = vmax.f32 %v417_v49, %v810_v50  ;;  %v420_v57 = vmax.f32 %v322_v52, 0.0  ;;  %v314_v58 = vadd.f32 %v2885_v10, %v313_v54  ;;  %v707_v59 = vadd.f32 %v2885_v10, %v706_v55 }
  0xea   :  { %v813_v60 = vmax.f32 %v715_v53, 0.0  ;;  %v2340_v61 = vpop.f32.mrf.mxu0  ;;  %v2380_v63 = vpop.f32.mrf.mxu1 }
  0xeb   :  { %v418_v0 = vmax.f32 %v314_v58, 0.0  ;;  %v811_v2 = vmax.f32 %v707_v59, 0.0  ;;  %v335_v3 = vadd.f32 %v2340_v61, %v2885_v10  ;;  %v728_v4 = vadd.f32 %v2380_v63, %v2885_v10 }
  0xec   :  { %v2949_v5 = vmax.f32 %v420_v57, %v813_v60  ;;  %v326_v6 = vpop.f32.mrf.mxu0  ;;  %v719_v7 = vpop.f32.mrf.mxu1 }
  0xed   :  { %v2951_v9 = vmax.f32 %v418_v0, %v811_v2  ;;  %v423_v11 = vmax.f32 %v335_v3, 0.0  ;;  %v816_v12 = vmax.f32 %v728_v4, 0.0  ;;  %v327_v13 = vadd.f32 %v2885_v10, %v326_v6 }
  0xee   :  { %v720_v14 = vadd.f32 %v2885_v10, %v719_v7  ;;  %v2341_v15 = vpop.f32.mrf.mxu0  ;;  %v2381_v16 = vpop.f32.mrf.mxu1 }
  0xef   :  { %v2955_v17 = vmax.f32 %v423_v11, %v816_v12  ;;  %v421_v18 = vmax.f32 %v327_v13, 0.0  ;;  %v338_v19 = vadd.f32 %v2341_v15, %v2885_v10  ;;  %v731_v21 = vadd.f32 %v2381_v16, %v2885_v10 }
  0xf0   :  { %v814_v22 = vmax.f32 %v720_v14, 0.0  ;;  %v329_v25 = vpop.f32.mrf.mxu0  ;;  %v722_v26 = vpop.f32.mrf.mxu1 }
  0xf1   :  { %v424_v27 = vmax.f32 %v338_v19, 0.0  ;;  %v817_v28 = vmax.f32 %v731_v21, 0.0  ;;  %v330_v29 = vadd.f32 %v2885_v10, %v329_v25  ;;  %v723_v31 = vadd.f32 %v2885_v10, %v722_v26 }
  0xf2   :  { %v2961_v33 = vmax.f32 %v421_v18, %v814_v22  ;;  %v2344_v34 = vpop.f32.mrf.mxu0  ;;  %v2384_v35 = vpop.f32.mrf.mxu1 }
  0xf3   :  { %v2963_v36 = vmax.f32 %v424_v27, %v817_v28  ;;  %v422_v37 = vmax.f32 %v330_v29, 0.0  ;;  %v815_v38 = vmax.f32 %v723_v31, 0.0  ;;  %v351_v39 = vadd.f32 %v2344_v34, %v2885_v10 }
  0xf4   :  { %v744_v40 = vadd.f32 %v2384_v35, %v2885_v10  ;;  %v342_v42 = vpop.f32.mrf.mxu0  ;;  %v735_v43 = vpop.f32.mrf.mxu1 }
  0xf5   :  { %v2967_v46 = vmax.f32 %v422_v37, %v815_v38  ;;  %v427_v47 = vmax.f32 %v351_v39, 0.0  ;;  %v343_v49 = vadd.f32 %v2885_v10, %v342_v42  ;;  %v736_v50 = vadd.f32 %v2885_v10, %v735_v43 }
  0xf6   :  { %v820_v52 = vmax.f32 %v744_v40, 0.0  ;;  %v2345_v53 = vpop.f32.mrf.mxu0  ;;  %v2385_v54 = vpop.f32.mrf.mxu1 }
  0xf7   :  { %v425_v55 = vmax.f32 %v343_v49, 0.0  ;;  %v818_v57 = vmax.f32 %v736_v50, 0.0  ;;  %v354_v58 = vadd.f32 %v2345_v53, %v2885_v10  ;;  %v747_v59 = vadd.f32 %v2385_v54, %v2885_v10 }
  0xf8   :  { %v2973_v60 = vmax.f32 %v427_v47, %v820_v52  ;;  %v345_v61 = vpop.f32.mrf.mxu0  ;;  %v738_v63 = vpop.f32.mrf.mxu1 }
  0xf9   :  { %v2975_v0 = vmax.f32 %v425_v55, %v818_v57  ;;  %v428_v2 = vmax.f32 %v354_v58, 0.0  ;;  %v821_v3 = vmax.f32 %v747_v59, 0.0  ;;  %v346_v4 = vadd.f32 %v2885_v10, %v345_v61 }
  0xfa   :  { %v739_v6 = vadd.f32 %v2885_v10, %v738_v63  ;;  %v2348_v7 = vpop.f32.mrf.mxu0  ;;  %v2388_v11 = vpop.f32.mrf.mxu1 }
  0xfb   :  { %v2979_v12 = vmax.f32 %v428_v2, %v821_v3  ;;  %v426_v13 = vmax.f32 %v346_v4, 0.0  ;;  %v367_v14 = vadd.f32 %v2348_v7, %v2885_v10  ;;  %v760_v15 = vadd.f32 %v2388_v11, %v2885_v10 }
  0xfc   :  { %v819_v16 = vmax.f32 %v739_v6, 0.0  ;;  %v358_v18 = vpop.f32.mrf.mxu0  ;;  %v751_v19 = vpop.f32.mrf.mxu1 }
  0xfd   :  { %v431_v21 = vmax.f32 %v367_v14, 0.0  ;;  %v824_v22 = vmax.f32 %v760_v15, 0.0  ;;  %v359_v25 = vadd.f32 %v2885_v10, %v358_v18  ;;  %v752_v26 = vadd.f32 %v2885_v10, %v751_v19 }
  0xfe   :  { %v2985_v27 = vmax.f32 %v426_v13, %v819_v16  ;;  %v2349_v28 = vpop.f32.mrf.mxu0  ;;  %v2389_v29 = vpop.f32.mrf.mxu1 }
  0xff   :  { %v2987_v31 = vmax.f32 %v431_v21, %v824_v22  ;;  %v429_v34 = vmax.f32 %v359_v25, 0.0  ;;  %v822_v35 = vmax.f32 %v752_v26, 0.0  ;;  %v370_v37 = vadd.f32 %v2349_v28, %v2885_v10 }
 0x100   :  { %v763_v38 = vadd.f32 %v2389_v29, %v2885_v10  ;;  %v361_v39 = vpop.f32.mrf.mxu0  ;;  %v754_v40 = vpop.f32.mrf.mxu1 }
 0x101   :  { %v2991_v42 = vmax.f32 %v429_v34, %v822_v35  ;;  %v432_v43 = vmax.f32 %v370_v37, 0.0  ;;  %v362_v47 = vadd.f32 %v2885_v10, %v361_v39  ;;  %v755_v49 = vadd.f32 %v2885_v10, %v754_v40 }
 0x102   :  { %v825_v50 = vmax.f32 %v763_v38, 0.0  ;;  %v2352_v52 = vpop.f32.mrf.mxu0  ;;  %v2392_v53 = vpop.f32.mrf.mxu1 }
 0x103   :  { %v430_v54 = vmax.f32 %v362_v47, 0.0  ;;  %v823_v55 = vmax.f32 %v755_v49, 0.0  ;;  %v383_v57 = vadd.f32 %v2352_v52, %v2885_v10  ;;  %v776_v58 = vadd.f32 %v2392_v53, %v2885_v10 }
 0x104   :  { %v2997_v59 = vmax.f32 %v432_v43, %v825_v50  ;;  %v374_v61 = vpop.f32.mrf.mxu0  ;;  %v767_v63 = vpop.f32.mrf.mxu1 }
 0x105   :  { %v2999_v2 = vmax.f32 %v430_v54, %v823_v55  ;;  %v435_v3 = vmax.f32 %v383_v57, 0.0  ;;  %v828_v4 = vmax.f32 %v776_v58, 0.0  ;;  %v375_v6 = vadd.f32 %v2885_v10, %v374_v61 }
 0x106   :  { %v768_v7 = vadd.f32 %v2885_v10, %v767_v63  ;;  %v2353_v11 = vpop.f32.mrf.mxu0  ;;  %v2393_v13 = vpop.f32.mrf.mxu1 }
 0x107   :  { %v3003_v14 = vmax.f32 %v435_v3, %v828_v4  ;;  %v433_v15 = vmax.f32 %v375_v6, 0.0  ;;  %v386_v16 = vadd.f32 %v2353_v11, %v2885_v10  ;;  %v779_v18 = vadd.f32 %v2393_v13, %v2885_v10 }
 0x108   :  { %v826_v19 = vmax.f32 %v768_v7, 0.0  ;;  %v377_v21 = vpop.f32.mrf.mxu0  ;;  %v770_v22 = vpop.f32.mrf.mxu1 }
 0x109   :  { %v436_v25 = vmax.f32 %v386_v16, 0.0  ;;  %v829_v26 = vmax.f32 %v779_v18, 0.0  ;;  %v378_v28 = vadd.f32 %v2885_v10, %v377_v21  ;;  %v771_v29 = vadd.f32 %v2885_v10, %v770_v22 }
 0x10a   :  { %v3009_v34 = vmax.f32 %v433_v15, %v826_v19  ;;  %v2356_v35 = vpop.f32.mrf.mxu0  ;;  %v2396_v37 = vpop.f32.mrf.mxu1 }
 0x10b   :  { %v3011_v38 = vmax.f32 %v436_v25, %v829_v26  ;;  %v434_v39 = vmax.f32 %v378_v28, 0.0  ;;  %v827_v40 = vmax.f32 %v771_v29, 0.0  ;;  %v399_v43 = vadd.f32 %v2356_v35, %v2885_v10 }
 0x10c   :  { %v792_v47 = vadd.f32 %v2396_v37, %v2885_v10  ;;  %v390_v49 = vpop.f32.mrf.mxu0  ;;  %v783_v50 = vpop.f32.mrf.mxu1 }
 0x10d   :  { %v3015_v52 = vmax.f32 %v434_v39, %v827_v40  ;;  %v439_v53 = vmax.f32 %v399_v43, 0.0  ;;  %v391_v54 = vadd.f32 %v2885_v10, %v390_v49  ;;  %v784_v55 = vadd.f32 %v2885_v10, %v783_v50 }
 0x10e   :  { %v832_v57 = vmax.f32 %v792_v47, 0.0  ;;  %v2357_v58 = vpop.f32.mrf.mxu0  ;;  %v2397_v61 = vpop.f32.mrf.mxu1 }
 0x10f   :  { %v437_v63 = vmax.f32 %v391_v54, 0.0  ;;  %v830_v3 = vmax.f32 %v784_v55, 0.0  ;;  %v402_v4 = vadd.f32 %v2357_v58, %v2885_v10  ;;  %v795_v6 = vadd.f32 %v2397_v61, %v2885_v10 }
 0x110   :  { %v3021_v7 = vmax.f32 %v439_v53, %v832_v57  ;;  %v393_v11 = vpop.f32.mrf.mxu0  ;;  %v786_v13 = vpop.f32.mrf.mxu1 }
 0x111   :  { %v3023_v15 = vmax.f32 %v437_v63, %v830_v3  ;;  %v440_v16 = vmax.f32 %v402_v4, 0.0  ;;  %v833_v18 = vmax.f32 %v795_v6, 0.0  ;;  %v394_v19 = vadd.f32 %v2885_v10, %v393_v11 }
 0x112   :  { %v787_v21 = vadd.f32 %v2885_v10, %v786_v13  ;;  %v2404_v22 = vpop.f32.mrf.mxu0  ;;  %v2444_v25 = vpop.f32.mrf.mxu1 }
 0x113   :  { %v3027_v26 = vmax.f32 %v440_v16, %v833_v18  ;;  %v438_v28 = vmax.f32 %v394_v19, 0.0  ;;  %v1093_v29 = vadd.f32 %v2404_v22, %v2885_v10  ;;  %v1486_v35 = vadd.f32 %v2444_v25, %v2885_v10 }
 0x114   :  { %v831_v37 = vmax.f32 %v787_v21, 0.0  ;;  %v1084_v39 = vpop.f32.mrf.mxu0  ;;  %v1477_v40 = vpop.f32.mrf.mxu1 }
 0x115   :  { %v1085_v43 = vadd.f32 %v2885_v10, %v1084_v39  ;;  %v1478_v47 = vadd.f32 %v2885_v10, %v1477_v40  ;;  %v1229_v50 = vmax.f32 %v1093_v29, 0.0  ;;  %v1622_v53 = vmax.f32 %v1486_v35, 0.0 }
 0x116   :  { %v3033_v49 = vmax.f32 %v438_v28, %v831_v37  ;;  %v2405_v54 = vpop.f32.mrf.mxu0  ;;  %v2445_v55 = vpop.f32.mrf.mxu1 }
 0x117   :  { %v1096_v57 = vadd.f32 %v2405_v54, %v2885_v10  ;;  %v1227_v58 = vmax.f32 %v1085_v43, 0.0  ;;  %v1620_v61 = vmax.f32 %v1478_v47, 0.0  ;;  %v1489_v63 = vadd.f32 %v2445_v55, %v2885_v10 }
 0x118   :  { %v1087_v3 = vpop.f32.mrf.mxu0  ;;  %v1480_v4 = vpop.f32.mrf.mxu1  ;;  %v1658_v13 = vmax.f32 %v1229_v50, %v1622_v53 }
 0x119   :  { %v1230_v6 = vmax.f32 %v1096_v57, 0.0  ;;  %v1088_v11 = vadd.f32 %v2885_v10, %v1087_v3  ;;  %v1623_v16 = vmax.f32 %v1489_v63, 0.0  ;;  %v1481_v18 = vadd.f32 %v2885_v10, %v1480_v4 }
 0x11a   :  { %v2408_v19 = vpop.f32.mrf.mxu0  ;;  %v2448_v21 = vpop.f32.mrf.mxu1  ;;  %v1656_v29 = vmax.f32 %v1227_v58, %v1620_v61  ;;  %v1694_v53 = vmax.f32 %v2891_v23, %v1658_v13 }
 0x11b   :  { %v1228_v22 = vmax.f32 %v1088_v11, 0.0  ;;  %v1109_v25 = vadd.f32 %v2408_v19, %v2885_v10  ;;  %v1502_v28 = vadd.f32 %v2448_v21, %v2885_v10  ;;  %v1659_v35 = vmax.f32 %v1230_v6, %v1623_v16 }
 0x11c   :  { %v1621_v37 = vmax.f32 %v1481_v18, 0.0  ;;  %v1100_v39 = vpop.f32.mrf.mxu0  ;;  %v1493_v40 = vpop.f32.mrf.mxu1  ;;  %v1692_v61 = vmax.f32 %v2895_v30, %v1656_v29 }
 0x11d   :  { %v1233_v43 = vmax.f32 %v1109_v25, 0.0  ;;  %v1626_v47 = vmax.f32 %v1502_v28, 0.0  ;;  %v1101_v54 = vadd.f32 %v2885_v10, %v1100_v39  ;;  %v1494_v50 = vadd.f32 %v2885_v10, %v1493_v40 }
 0x11e   :  { %v1695_v55 = vmax.f32 %v2901_v41, %v1659_v35  ;;  %v1657_v57 = vmax.f32 %v1228_v22, %v1621_v37  ;;  %v2409_v63 = vpop.f32.mrf.mxu0  ;;  %v2449_v3 = vpop.f32.mrf.mxu1 }
 0x11f   :  { %v1231_v4 = vmax.f32 %v1101_v54, 0.0  ;;  %v1624_v11 = vmax.f32 %v1494_v50, 0.0  ;;  %v1112_v58 = vadd.f32 %v2409_v63, %v2885_v10  ;;  %v1505_v18 = vadd.f32 %v2449_v3, %v2885_v10 }
 0x120   :  { %v2139_v6 = vpack.c.bf16 %v1695_v55, %v1694_v53  ;;  %v1693_v16 = vmax.f32 %v2903_v44, %v1657_v57  ;;  %v1103_v19 = vpop.f32.mrf.mxu0  ;;  %v1496_v21 = vpop.f32.mrf.mxu1  ;;  %v1662_v25 = vmax.f32 %v1233_v43, %v1626_v47 }
 0x121   :  { %v1234_v23 = vmax.f32 %v1112_v58, 0.0  ;;  %v1104_v41 = vadd.f32 %v2885_v10, %v1103_v19  ;;  %v1627_v22 = vmax.f32 %v1505_v18, 0.0  ;;  %v1497_v28 = vadd.f32 %v2885_v10, %v1496_v21 }
 0x122   :  { %2221 = vst [vmem:[%s3190_s6 + $0x8] sm:$0xff] %v2139_v6   ;;  %v2134_v13 = vpack.c.bf16 %v1693_v16, %v1692_v61  ;;  %v2412_v30 = vpop.f32.mrf.mxu0  ;;  %v2452_v29 = vpop.f32.mrf.mxu1  ;;  %v1660_v35 = vmax.f32 %v1231_v4, %v1624_v11  ;;  %v1698_v50 = vmax.f32 %v2907_v51, %v1662_v25 }
 0x123   :  { %v1232_v44 = vmax.f32 %v1104_v41, 0.0  ;;  %v1125_v37 = vadd.f32 %v2412_v30, %v2885_v10  ;;  %v1518_v39 = vadd.f32 %v2452_v29, %v2885_v10  ;;  %v1663_v40 = vmax.f32 %v1234_v23, %v1627_v22 }
 0x124   :  { %2135 = vst [vmem:[%s3190_s6] sm:$0xff] %v2134_v13   ;;  %v1625_v43 = vmax.f32 %v1497_v28, 0.0  ;;  %v1116_v47 = vpop.f32.mrf.mxu0  ;;  %v1509_v54 = vpop.f32.mrf.mxu1  ;;  %v1696_v61 = vmax.f32 %v2913_v62, %v1660_v35 }
 0x125   :  { %v1117_v53 = vadd.f32 %v2885_v10, %v1116_v47  ;;  %v1510_v55 = vadd.f32 %v2885_v10, %v1509_v54  ;;  %v1699_v57 = vmax.f32 %v2915_v1, %v1663_v40  ;;  %v1237_v3 = vmax.f32 %v1125_v37, 0.0 }
 0x126   :  { %v1661_v63 = vmax.f32 %v1232_v44, %v1625_v43  ;;  %v1630_v4 = vmax.f32 %v1518_v39, 0.0  ;;  %v2413_v11 = vpop.f32.mrf.mxu0  ;;  %v2453_v58 = vpop.f32.mrf.mxu1 }
 0x127   :  { %v1235_v6 = vmax.f32 %v1117_v53, 0.0  ;;  %v1128_v16 = vadd.f32 %v2413_v11, %v2885_v10  ;;  %v2149_v18 = vpack.c.bf16 %v1699_v57, %v1698_v50  ;;  %v1628_v51 = vmax.f32 %v1510_v55, 0.0 }
 0x128   :  { %v1697_v19 = vmax.f32 %v2919_v8, %v1661_v63  ;;  %v1521_v21 = vadd.f32 %v2453_v58, %v2885_v10  ;;  %v1119_v25 = vpop.f32.mrf.mxu0  ;;  %v1512_v23 = vpop.f32.mrf.mxu1  ;;  %v1666_v62 = vmax.f32 %v1237_v3, %v1630_v4 }
 0x129   :  { %v1238_v41 = vmax.f32 %v1128_v16, 0.0  ;;  %v1120_v1 = vadd.f32 %v2885_v10, %v1119_v25  ;;  %2223 = vst [vmem:[%s3190_s6 + $0x18] sm:$0xff] %v2149_v18   ;;  %v1513_v28 = vadd.f32 %v2885_v10, %v1512_v23  ;;  %v1664_v37 = vmax.f32 %v1235_v6, %v1628_v51 }
 0x12a   :  { %v2144_v13 = vpack.c.bf16 %v1697_v19, %v1696_v61  ;;  %v1631_v22 = vmax.f32 %v1521_v21, 0.0  ;;  %v2416_v30 = vpop.f32.mrf.mxu0  ;;  %v2456_v29 = vpop.f32.mrf.mxu1  ;;  %v1702_v57 = vmax.f32 %v2925_v20, %v1666_v62 }
 0x12b   :  { %v1236_v8 = vmax.f32 %v1120_v1, 0.0  ;;  %v1141_v35 = vadd.f32 %v2416_v30, %v2885_v10  ;;  %v1534_v44 = vadd.f32 %v2456_v29, %v2885_v10  ;;  %v1629_v40 = vmax.f32 %v1513_v28, 0.0 }
 0x12c   :  { %2222 = vst [vmem:[%s3190_s6 + $0x10] sm:$0xff] %v2144_v13   ;;  %v1667_v39 = vmax.f32 %v1238_v41, %v1631_v22  ;;  %v1132_v43 = vpop.f32.mrf.mxu0  ;;  %v1525_v47 = vpop.f32.mrf.mxu1  ;;  %v1700_v16 = vmax.f32 %v2927_v24, %v1664_v37 }
 0x12d   :  { %v1241_v54 = vmax.f32 %v1141_v35, 0.0  ;;  %v1634_v50 = vmax.f32 %v1534_v44, 0.0  ;;  %v1133_v53 = vadd.f32 %v2885_v10, %v1132_v43  ;;  %v1526_v55 = vadd.f32 %v2885_v10, %v1525_v47 }
 0x12e   :  { %v1703_v63 = vmax.f32 %v2931_v32, %v1667_v39  ;;  %v1665_v3 = vmax.f32 %v1236_v8, %v1629_v40  ;;  %v2417_v4 = vpop.f32.mrf.mxu0  ;;  %v2457_v11 = vpop.f32.mrf.mxu1 }
 0x12f   :  { %v1239_v58 = vmax.f32 %v1133_v53, 0.0  ;;  %v1632_v61 = vmax.f32 %v1526_v55, 0.0  ;;  %v1144_v6 = vadd.f32 %v2417_v4, %v2885_v10  ;;  %v1537_v51 = vadd.f32 %v2457_v11, %v2885_v10 }
 0x130   :  { %v2159_v18 = vpack.c.bf16 %v1703_v63, %v1702_v57  ;;  %v1701_v19 = vmax.f32 %v2937_v45, %v1665_v3  ;;  %v1135_v21 = vpop.f32.mrf.mxu0  ;;  %v1528_v25 = vpop.f32.mrf.mxu1  ;;  %v1670_v23 = vmax.f32 %v1241_v54, %v1634_v50 }
 0x131   :  { %v1242_v20 = vmax.f32 %v1144_v6, 0.0  ;;  %v1136_v32 = vadd.f32 %v2885_v10, %v1135_v21  ;;  %v1635_v1 = vmax.f32 %v1537_v51, 0.0  ;;  %v1529_v13 = vadd.f32 %v2885_v10, %v1528_v25 }
 0x132   :  { %2225 = vst [vmem:[%s3190_s6 + $0x28] sm:$0xff] %v2159_v18   ;;  %v2154_v41 = vpack.c.bf16 %v1701_v19, %v1700_v16  ;;  %v2420_v24 = vpop.f32.mrf.mxu0  ;;  %v2460_v62 = vpop.f32.mrf.mxu1  ;;  %v1668_v22 = vmax.f32 %v1239_v58, %v1632_v61  ;;  %v1706_v37 = vmax.f32 %v2939_v48, %v1670_v23 }
 0x133   :  { %v1240_v45 = vmax.f32 %v1136_v32, 0.0  ;;  %v1157_v28 = vadd.f32 %v2420_v24, %v2885_v10  ;;  %v1550_v30 = vadd.f32 %v2460_v62, %v2885_v10  ;;  %v1671_v29 = vmax.f32 %v1242_v20, %v1635_v1 }
 0x134   :  { %2224 = vst [vmem:[%s3190_s6 + $0x20] sm:$0xff] %v2154_v41   ;;  %v1633_v8 = vmax.f32 %v1529_v13, 0.0  ;;  %v1148_v35 = vpop.f32.mrf.mxu0  ;;  %v1541_v44 = vpop.f32.mrf.mxu1  ;;  %v1704_v57 = vmax.f32 %v2943_v56, %v1668_v22 }
 0x135   :  { %v1149_v39 = vadd.f32 %v2885_v10, %v1148_v35  ;;  %v1542_v40 = vadd.f32 %v2885_v10, %v1541_v44  ;;  %v1707_v43 = vmax.f32 %v2949_v5, %v1671_v29  ;;  %v1245_v54 = vmax.f32 %v1157_v28, 0.0 }
 0x136   :  { %v1669_v47 = vmax.f32 %v1240_v45, %v1633_v8  ;;  %v1638_v50 = vmax.f32 %v1550_v30, 0.0  ;;  %v2421_v53 = vpop.f32.mrf.mxu0  ;;  %v2461_v55 = vpop.f32.mrf.mxu1 }
 0x137   :  { %v1243_v63 = vmax.f32 %v1149_v39, 0.0  ;;  %v1160_v3 = vadd.f32 %v2421_v53, %v2885_v10  ;;  %v2169_v4 = vpack.c.bf16 %v1707_v43, %v1706_v37  ;;  %v1636_v48 = vmax.f32 %v1542_v40, 0.0 }
 0x138   :  { %v1705_v11 = vmax.f32 %v2951_v9, %v1669_v47  ;;  %v1553_v58 = vadd.f32 %v2461_v55, %v2885_v10  ;;  %v1151_v61 = vpop.f32.mrf.mxu0  ;;  %v1544_v6 = vpop.f32.mrf.mxu1  ;;  %v1674_v56 = vmax.f32 %v1245_v54, %v1638_v50 }
 0x139   :  { %v1246_v16 = vmax.f32 %v1160_v3, 0.0  ;;  %v1152_v5 = vadd.f32 %v2885_v10, %v1151_v61  ;;  %2227 = vst [vmem:[%s3190_s6 + $0x38] sm:$0xff] %v2169_v4   ;;  %v1545_v51 = vadd.f32 %v2885_v10, %v1544_v6  ;;  %v1672_v32 = vmax.f32 %v1243_v63, %v1636_v48 }
 0x13a   :  { %v2164_v18 = vpack.c.bf16 %v1705_v11, %v1704_v57  ;;  %v1639_v19 = vmax.f32 %v1553_v58, 0.0  ;;  %v2424_v21 = vpop.f32.mrf.mxu0  ;;  %v2464_v25 = vpop.f32.mrf.mxu1  ;;  %v1710_v30 = vmax.f32 %v2955_v17, %v1674_v56 }
 0x13b   :  { %v1244_v9 = vmax.f32 %v1152_v5, 0.0  ;;  %v1173_v23 = vadd.f32 %v2424_v21, %v2885_v10  ;;  %v1566_v20 = vadd.f32 %v2464_v25, %v2885_v10  ;;  %v1637_v1 = vmax.f32 %v1545_v51, 0.0 }
 0x13c   :  { %2226 = vst [vmem:[%s3190_s6 + $0x30] sm:$0xff] %v2164_v18   ;;  %v1675_v41 = vmax.f32 %v1246_v16, %v1639_v19  ;;  %v1164_v13 = vpop.f32.mrf.mxu0  ;;  %v1557_v24 = vpop.f32.mrf.mxu1  ;;  %v1708_v43 = vmax.f32 %v2961_v33, %v1672_v32 }
 0x13d   :  { %v1249_v62 = vmax.f32 %v1173_v23, 0.0  ;;  %v1642_v22 = vmax.f32 %v1566_v20, 0.0  ;;  %v1165_v45 = vadd.f32 %v2885_v10, %v1164_v13  ;;  %v1558_v28 = vadd.f32 %v2885_v10, %v1557_v24 }
 0x13e   :  { %v1711_v29 = vmax.f32 %v2963_v36, %v1675_v41  ;;  %v1673_v8 = vmax.f32 %v1244_v9, %v1637_v1  ;;  %v2425_v35 = vpop.f32.mrf.mxu0  ;;  %v2465_v44 = vpop.f32.mrf.mxu1 }
 0x13f   :  { %v1247_v37 = vmax.f32 %v1165_v45, 0.0  ;;  %v1640_v39 = vmax.f32 %v1558_v28, 0.0  ;;  %v1176_v40 = vadd.f32 %v2425_v35, %v2885_v10  ;;  %v1569_v50 = vadd.f32 %v2465_v44, %v2885_v10 }
 0x140   :  { %v2179_v47 = vpack.c.bf16 %v1711_v29, %v1710_v30  ;;  %v1709_v54 = vmax.f32 %v2967_v46, %v1673_v8  ;;  %v1167_v53 = vpop.f32.mrf.mxu0  ;;  %v1560_v55 = vpop.f32.mrf.mxu1  ;;  %v1678_v57 = vmax.f32 %v1249_v62, %v1642_v22 }
 0x141   :  { %v1250_v17 = vmax.f32 %v1176_v40, 0.0  ;;  %v1168_v36 = vadd.f32 %v2885_v10, %v1167_v53  ;;  %v1643_v3 = vmax.f32 %v1569_v50, 0.0  ;;  %v1561_v4 = vadd.f32 %v2885_v10, %v1560_v55 }
 0x142   :  { %2229 = vst [vmem:[%s3190_s6 + $0x48] sm:$0xff] %v2179_v47   ;;  %v2174_v63 = vpack.c.bf16 %v1709_v54, %v1708_v43  ;;  %v2428_v33 = vpop.f32.mrf.mxu0  ;;  %v2468_v11 = vpop.f32.mrf.mxu1  ;;  %v1676_v48 = vmax.f32 %v1247_v37, %v1640_v39  ;;  %v1714_v56 = vmax.f32 %v2973_v60, %v1678_v57 }
 0x143   :  { %v1248_v46 = vmax.f32 %v1168_v36, 0.0  ;;  %v1189_v58 = vadd.f32 %v2428_v33, %v2885_v10  ;;  %v1582_v61 = vadd.f32 %v2468_v11, %v2885_v10  ;;  %v1679_v6 = vmax.f32 %v1250_v17, %v1643_v3 }
 0x144   :  { %2228 = vst [vmem:[%s3190_s6 + $0x40] sm:$0xff] %v2174_v63   ;;  %v1641_v16 = vmax.f32 %v1561_v4, 0.0  ;;  %v1180_v5 = vpop.f32.mrf.mxu0  ;;  %v1573_v18 = vpop.f32.mrf.mxu1  ;;  %v1712_v41 = vmax.f32 %v2975_v0, %v1676_v48 }
 0x145   :  { %v1181_v19 = vadd.f32 %v2885_v10, %v1180_v5  ;;  %v1574_v51 = vadd.f32 %v2885_v10, %v1573_v18  ;;  %v1715_v21 = vmax.f32 %v2979_v12, %v1679_v6  ;;  %v1253_v9 = vmax.f32 %v1189_v58, 0.0  ;;  %v2552_v58 = vld [vmem:[%s3189_s5] ss:$0 sm:$0xff] }
 0x146   :  { %v1677_v25 = vmax.f32 %v1248_v46, %v1641_v16  ;;  %v1646_v23 = vmax.f32 %v1582_v61, 0.0  ;;  %v2429_v20 = vpop.f32.mrf.mxu0  ;;  %v2469_v32 = vpop.f32.mrf.mxu1 }
 0x147   :  { %v1251_v1 = vmax.f32 %v1181_v19, 0.0  ;;  %v1192_v13 = vadd.f32 %v2429_v20, %v2885_v10  ;;  %v2189_v24 = vpack.c.bf16 %v1715_v21, %v1714_v56  ;;  %v1644_v60 = vmax.f32 %v1574_v51, 0.0 }
 0x148   :  { %v1713_v62 = vmax.f32 %v2985_v27, %v1677_v25  ;;  %v1585_v22 = vadd.f32 %v2469_v32, %v2885_v10  ;;  %v1183_v45 = vpop.f32.mrf.mxu0  ;;  %v1576_v28 = vpop.f32.mrf.mxu1  ;;  %v1682_v0 = vmax.f32 %v1253_v9, %v1646_v23 }
 0x149   :  { %v1254_v30 = vmax.f32 %v1192_v13, 0.0  ;;  %v1184_v12 = vadd.f32 %v2885_v10, %v1183_v45  ;;  %2231 = vst [vmem:[%s3190_s6 + $0x58] sm:$0xff] %v2189_v24   ;;  %v1577_v35 = vadd.f32 %v2885_v10, %v1576_v28  ;;  %v1680_v43 = vmax.f32 %v1251_v1, %v1644_v60 }
 0x14a   :  { %v2184_v29 = vpack.c.bf16 %v1713_v62, %v1712_v41  ;;  %v1647_v8 = vmax.f32 %v1585_v22, 0.0  ;;  %v2432_v44 = vpop.f32.mrf.mxu0  ;;  %v2472_v37 = vpop.f32.mrf.mxu1  ;;  %v1718_v63 = vmax.f32 %v2987_v31, %v1682_v0 }
 0x14b   :  { %v1252_v27 = vmax.f32 %v1184_v12, 0.0  ;;  %v1205_v39 = vadd.f32 %v2432_v44, %v2885_v10  ;;  %v1598_v40 = vadd.f32 %v2472_v37, %v2885_v10  ;;  %v1645_v54 = vmax.f32 %v1577_v35, 0.0 }
 0x14c   :  { %2230 = vst [vmem:[%s3190_s6 + $0x50] sm:$0xff] %v2184_v29   ;;  %v1683_v47 = vmax.f32 %v1254_v30, %v1647_v8  ;;  %v1196_v50 = vpop.f32.mrf.mxu0  ;;  %v1589_v53 = vpop.f32.mrf.mxu1  ;;  %v1716_v6 = vmax.f32 %v2991_v42, %v1680_v43 }
 0x14d   :  { %v1257_v55 = vmax.f32 %v1205_v39, 0.0  ;;  %v1650_v57 = vmax.f32 %v1598_v40, 0.0  ;;  %v1197_v17 = vadd.f32 %v2885_v10, %v1196_v50  ;;  %v1590_v36 = vadd.f32 %v2885_v10, %v1589_v53 }
 0x14e   :  { %v1719_v3 = vmax.f32 %v2997_v59, %v1683_v47  ;;  %v1681_v4 = vmax.f32 %v1252_v27, %v1645_v54  ;;  %v2433_v33 = vpop.f32.mrf.mxu0  ;;  %v2473_v11 = vpop.f32.mrf.mxu1 }
 0x14f   :  { %v1255_v48 = vmax.f32 %v1197_v17, 0.0  ;;  %v1648_v46 = vmax.f32 %v1590_v36, 0.0  ;;  %v1208_v61 = vadd.f32 %v2552_v58, %v2433_v33  ;;  %v1601_v10 = vadd.f32 %v2552_v58, %v2473_v11 }
 0x150   :  { %v2199_v16 = vpack.c.bf16 %v1719_v3, %v1718_v63  ;;  %v1717_v5 = vmax.f32 %v2999_v2, %v1681_v4  ;;  %v1199_v18 = vpop.f32.mrf.mxu0  ;;  %v1592_v31 = vpop.f32.mrf.mxu1  ;;  %v1686_v56 = vmax.f32 %v1257_v55, %v1650_v57 }
 0x151   :  { %v1258_v59 = vmax.f32 %v1208_v61, 0.0  ;;  %v1200_v19 = vadd.f32 %v2552_v58, %v1199_v18  ;;  %v1651_v21 = vmax.f32 %v1601_v10, 0.0  ;;  %v1593_v25 = vadd.f32 %v2552_v58, %v1592_v31 }
 0x152   :  { %2233 = vst [vmem:[%s3190_s6 + $0x68] sm:$0xff] %v2199_v16   ;;  %v2194_v51 = vpack.c.bf16 %v1717_v5, %v1716_v6  ;;  %v2436_v9 = vpop.f32.mrf.mxu0  ;;  %v2476_v23 = vpop.f32.mrf.mxu1  ;;  %v1684_v20 = vmax.f32 %v1255_v48, %v1648_v46  ;;  %v1722_v62 = vmax.f32 %v3003_v14, %v1686_v56 }
 0x153   :  { %v1256_v42 = vmax.f32 %v1200_v19, 0.0  ;;  %v1221_v32 = vadd.f32 %v2552_v58, %v2436_v9  ;;  %v1614_v41 = vadd.f32 %v2552_v58, %v2476_v23  ;;  %v1687_v2 = vmax.f32 %v1258_v59, %v1651_v21 }
 0x154   :  { %2232 = vst [vmem:[%s3190_s6 + $0x60] sm:$0xff] %v2194_v51   ;;  %v1649_v1 = vmax.f32 %v1593_v25, 0.0  ;;  %v1212_v13 = vpop.f32.mrf.mxu0  ;;  %v1605_v24 = vpop.f32.mrf.mxu1  ;;  %v1720_v8 = vmax.f32 %v3009_v34, %v1684_v20 }
 0x155   :  { %v1213_v60 = vadd.f32 %v2552_v58, %v1212_v13  ;;  %v1606_v22 = vadd.f32 %v2552_v58, %v1605_v24  ;;  %v1723_v45 = vmax.f32 %v3011_v38, %v1687_v2  ;;  %v1261_v30 = vmax.f32 %v1221_v32, 0.0 }
 0x156   :  { %v1685_v28 = vmax.f32 %v1256_v42, %v1649_v1  ;;  %v1654_v12 = vmax.f32 %v1614_v41, 0.0  ;;  %v2437_v29 = vpop.f32.mrf.mxu0  ;;  %v2477_v0 = vpop.f32.mrf.mxu1 }
 0x157   :  { %v1259_v35 = vmax.f32 %v1213_v60, 0.0  ;;  %v1224_v44 = vadd.f32 %v2552_v58, %v2437_v29  ;;  %v2209_v37 = vpack.c.bf16 %v1723_v45, %v1722_v62  ;;  %v1652_v39 = vmax.f32 %v1606_v22, 0.0 }
 0x158   :  { %v1721_v27 = vmax.f32 %v3015_v52, %v1685_v28  ;;  %v1617_v40 = vadd.f32 %v2552_v58, %v2477_v0  ;;  %v1215_v43 = vpop.f32.mrf.mxu0  ;;  %v1608_v14 = vpop.f32.mrf.mxu1  ;;  %v1690_v50 = vmax.f32 %v1261_v30, %v1654_v12 }
 0x159   :  { %v1262_v47 = vmax.f32 %v1224_v44, 0.0  ;;  %v1216_v54 = vadd.f32 %v2552_v58, %v1215_v43  ;;  %2235 = vst [vmem:[%s3190_s6 + $0x78] sm:$0xff] %v2209_v37   ;;  %v1609_v55 = vadd.f32 %v2552_v58, %v1608_v14  ;;  %v1688_v52 = vmax.f32 %v1259_v35, %v1652_v39 }
 0x15a   :  { %v2204_v38 = vpack.c.bf16 %v1721_v27, %v1720_v8  ;;  %v1655_v53 = vmax.f32 %v1617_v40, 0.0  ;;  %v1726_v36 = vmax.f32 %v3021_v7, %v1690_v50 }
 0x15b   :  { %v1260_v34 = vmax.f32 %v1216_v54, 0.0  ;;  %v1653_v17 = vmax.f32 %v1609_v55, 0.0  ;;  %v1724_v4 = vmax.f32 %v3023_v15, %v1688_v52 }
 0x15c   :  { %2234 = vst [vmem:[%s3190_s6 + $0x70] sm:$0xff] %v2204_v38   ;;  %v1691_v57 = vmax.f32 %v1262_v47, %v1655_v53 }
 0x15d   :  { %v1689_v3 = vmax.f32 %v1260_v34, %v1653_v17 }
 0x15e   :  { %v1727_v63 = vmax.f32 %v3027_v26, %v1691_v57 }
 0x15f   :  { %v1725_v11 = vmax.f32 %v3033_v49, %v1689_v3 }
 0x160   :  { %v2219_v33 = vpack.c.bf16 %v1727_v63, %v1726_v36 }
 0x161   :  { %v2214_v48 = vpack.c.bf16 %v1725_v11, %v1724_v4 }
 0x162   :  { %2237 = vst [vmem:[%s3190_s6 + $0x88] sm:$0xff] %v2219_v33  }
 0x163   :  { %2236 = vst [vmem:[%s3190_s6 + $0x80] sm:$0xff] %v2214_v48  }

// kernel: net_forward.4
= control target key start
LH: loop header
LB: loop body
LE: loop exit
PB: predicated region body
PF: predicated region fallthrough
CT: control target
= control target key end

     0   :  { %s1805_s4 = inlined_call_operand.vmem [shape: bf16[512,128], index: 4, kind: input, shape index: {}]   ;;  %s1806_s0 = inlined_call_operand.vmem [shape: bf16[32,512], index: 0, kind: input, shape index: {}]   ;;  %s1807_s1 = inlined_call_operand.vmem [shape: bf16[32,512], index: 1, kind: input, shape index: {}]   ;;  %s1808_s2 = inlined_call_operand.vmem [shape: bf16[32,512], index: 2, kind: input, shape index: {}]   ;;  %s1809_s3 = inlined_call_operand.vmem [shape: bf16[32,512], index: 3, kind: input, shape index: {}]   ;;  %s1810_s5 = inlined_call_operand.vmem [shape: f32[1,128], index: 5, kind: input, shape index: {}]   ;;  %s1811_s6 = inlined_call_operand.vmem [shape: bf16[32,128], index: 6, kind: output, shape index: {}]  }
   0x1   :  { %v1349_v0 = vld [vmem:[%s1805_s4 + $0x78] sm:$0xff]   ;;  %v1372_v4 = vld [vmem:[%s1805_s4 + $0x70] sm:$0xff]   ;;  %v1396_v8 = vld [vmem:[%s1805_s4 + $0x68] sm:$0xff]  }
   0x2   :  { %v1354_v1 = vld [vmem:[%s1805_s4 + $0xf8] sm:$0xff]   ;;  %1007 = vmatprep.subr.bf16.mxu0 %v1349_v0  ;;  %v1378_v5 = vld [vmem:[%s1805_s4 + $0xf0] sm:$0xff]   ;;  %v1402_v9 = vld [vmem:[%s1805_s4 + $0xe8] sm:$0xff]  }
   0x3   :  { %v1360_v2 = vld [vmem:[%s1805_s4 + $0x38] sm:$0xff]   ;;  %1035 = vmatprep.subr.bf16.mxu1 %v1354_v1  ;;  %v1384_v6 = vld [vmem:[%s1805_s4 + $0x30] sm:$0xff]   ;;  %v1408_v10 = vld [vmem:[%s1805_s4 + $0x28] sm:$0xff]  }
   0x4   :  { %v1366_v3 = vld [vmem:[%s1805_s4 + $0xb8] sm:$0xff]   ;;  %1008 = vmatpush3.bf16.msra.mxu0 %v1360_v2  ;;  %v1390_v7 = vld [vmem:[%s1805_s4 + $0xb0] sm:$0xff]   ;;  %v1414_v11 = vld [vmem:[%s1805_s4 + $0xa8] sm:$0xff]  }
   0x5   :  { %1036 = vmatpush3.bf16.msra.mxu1 %v1366_v3  ;;  %1009 = vmatprep.subr.bf16.mxu0 %v1372_v4  ;;  %v1420_v12 = vld [vmem:[%s1805_s4 + $0x60] sm:$0xff]   ;;  %v1444_v16 = vld [vmem:[%s1805_s4 + $0x58] sm:$0xff]   ;;  %v1468_v20 = vld [vmem:[%s1805_s4 + $0x50] sm:$0xff]  }
   0x6   :  { %1037 = vmatprep.subr.bf16.mxu1 %v1378_v5  ;;  %v1426_v13 = vld [vmem:[%s1805_s4 + $0xe0] sm:$0xff]   ;;  %v1450_v17 = vld [vmem:[%s1805_s4 + $0xd8] sm:$0xff]   ;;  %v1474_v21 = vld [vmem:[%s1805_s4 + $0xd0] sm:$0xff]  }
   0x7   :  { %v1432_v14 = vld [vmem:[%s1805_s4 + $0x20] sm:$0xff]   ;;  %v1456_v18 = vld [vmem:[%s1805_s4 + $0x18] sm:$0xff]   ;;  %v1480_v22 = vld [vmem:[%s1805_s4 + $0x10] sm:$0xff]  }
   0x8   :  { %1010 = vmatpush3.bf16.msra.mxu0 %v1384_v6  ;;  %v1438_v15 = vld [vmem:[%s1805_s4 + $0xa0] sm:$0xff]   ;;  %v1462_v19 = vld [vmem:[%s1805_s4 + $0x98] sm:$0xff]   ;;  %v1486_v23 = vld [vmem:[%s1805_s4 + $0x90] sm:$0xff]  }
   0x9   :  { %1038 = vmatpush3.bf16.msra.mxu1 %v1390_v7  ;;  %1011 = vmatprep.subr.bf16.mxu0 %v1396_v8  ;;  %v1492_v24 = vld [vmem:[%s1805_s4 + $0x48] sm:$0xff]   ;;  %v1516_v28 = vld [vmem:[%s1805_s4 + $0x40] sm:$0xff]  }
   0xa   :  { %1039 = vmatprep.subr.bf16.mxu1 %v1402_v9  ;;  %v1498_v25 = vld [vmem:[%s1805_s4 + $0xc8] sm:$0xff]   ;;  %v1522_v29 = vld [vmem:[%s1805_s4 + $0xc0] sm:$0xff]  }
   0xb   :  { %v1504_v26 = vld [vmem:[%s1805_s4 + $0x8] sm:$0xff]   ;;  %v1528_v30 = vld [vmem:[%s1805_s4] sm:$0xff]  }
   0xc   :  { %1012 = vmatpush3.bf16.msra.mxu0 %v1408_v10  ;;  %v1510_v27 = vld [vmem:[%s1805_s4 + $0x88] sm:$0xff]   ;;  %v1534_v31 = vld [vmem:[%s1805_s4 + $0x80] sm:$0xff]  }
   0xd   :  { %1040 = vmatpush3.bf16.msra.mxu1 %v1414_v11  ;;  %1013 = vmatprep.subr.bf16.mxu0 %v1420_v12  ;;  %v1263_v32 = vld [vmem:[%s1806_s0] ss:$16 sps:$4 sm:$0xff]   ;;  %v1265_v33 = vld [vmem:[%s1806_s0 + $0x4] ss:$16 sps:$4 sm:$0xff]   ;;  %v1266_v34 = vld [vmem:[%s1806_s0 + $0x8] ss:$16 sps:$4 sm:$0xff]  }
   0xe   :  { %1041 = vmatprep.subr.bf16.mxu1 %v1426_v13  ;;  %v1268_v35 = vld [vmem:[%s1806_s0 + $0xc] ss:$16 sps:$4 sm:$0xff]   ;;  %367 = vmatprep.mubr.bf16.mxu0 %v1265_v33  ;;  %v1269_v36 = vld [vmem:[%s1806_s0 + $0x24] ss:$16 sps:$4 sm:$0xff]   ;;  %v1271_v38 = vld [vmem:[%s1806_s0 + $0x20] ss:$16 sps:$4 sm:$0xff]  }
   0xf   :  { %416 = vmatprep.mubr.bf16.mxu1 %v1268_v35  ;;  %v1272_v37 = vld [vmem:[%s1806_s0 + $0x2c] ss:$16 sps:$4 sm:$0xff]   ;;  %v1274_v39 = vld [vmem:[%s1806_s0 + $0x28] ss:$16 sps:$4 sm:$0xff]   ;;  %v1277_v40 = vld [vmem:[%s1807_s1 + $0x4] ss:$16 sps:$4 sm:$0xff]  }
  0x10   :  { %1014 = vmatpush3.bf16.msra.mxu0 %v1432_v14  ;;  %v1280_v41 = vld [vmem:[%s1807_s1 + $0xc] ss:$16 sps:$4 sm:$0xff]   ;;  %v1275_v42 = vld [vmem:[%s1807_s1] ss:$16 sps:$4 sm:$0xff]   ;;  %v1278_v43 = vld [vmem:[%s1807_s1 + $0x8] ss:$16 sps:$4 sm:$0xff]  }
  0x11   :  { %1042 = vmatpush3.bf16.msra.mxu1 %v1438_v15  ;;  %1015 = vmatprep.subr.bf16.mxu0 %v1444_v16  ;;  %v1281_v44 = vld [vmem:[%s1807_s1 + $0x24] ss:$16 sps:$4 sm:$0xff]   ;;  %v1284_v45 = vld [vmem:[%s1807_s1 + $0x2c] ss:$16 sps:$4 sm:$0xff]   ;;  %v1283_v46 = vld [vmem:[%s1807_s1 + $0x20] ss:$16 sps:$4 sm:$0xff]  }
  0x12   :  { %1043 = vmatprep.subr.bf16.mxu1 %v1450_v17  ;;  %v1286_v47 = vld [vmem:[%s1807_s1 + $0x28] ss:$16 sps:$4 sm:$0xff]   ;;  %v1289_v48 = vld [vmem:[%s1808_s2 + $0x4] ss:$16 sps:$4 sm:$0xff]   ;;  %v1292_v49 = vld [vmem:[%s1808_s2 + $0xc] ss:$16 sps:$4 sm:$0xff]  }
  0x13   :  { %v1287_v50 = vld [vmem:[%s1808_s2] ss:$16 sps:$4 sm:$0xff]   ;;  %v1290_v51 = vld [vmem:[%s1808_s2 + $0x8] ss:$16 sps:$4 sm:$0xff]   ;;  %v1293_v52 = vld [vmem:[%s1808_s2 + $0x24] ss:$16 sps:$4 sm:$0xff]  }
  0x14   :  { %1016 = vmatpush3.bf16.msra.mxu0 %v1456_v18  ;;  %v1296_v53 = vld [vmem:[%s1808_s2 + $0x2c] ss:$16 sps:$4 sm:$0xff]   ;;  %v1295_v54 = vld [vmem:[%s1808_s2 + $0x20] ss:$16 sps:$4 sm:$0xff]   ;;  %v1298_v55 = vld [vmem:[%s1808_s2 + $0x28] ss:$16 sps:$4 sm:$0xff]  }
  0x15   :  { %1044 = vmatpush3.bf16.msra.mxu1 %v1462_v19  ;;  %1017 = vmatprep.subr.bf16.mxu0 %v1468_v20  ;;  %v1301_v56 = vld [vmem:[%s1809_s3 + $0x4] ss:$16 sps:$4 sm:$0xff]   ;;  %v1304_v57 = vld [vmem:[%s1809_s3 + $0xc] ss:$16 sps:$4 sm:$0xff]   ;;  %v1299_v58 = vld [vmem:[%s1809_s3] ss:$16 sps:$4 sm:$0xff]  }
  0x16   :  { %1045 = vmatprep.subr.bf16.mxu1 %v1474_v21  ;;  %v1302_v59 = vld [vmem:[%s1809_s3 + $0x8] ss:$16 sps:$4 sm:$0xff]   ;;  %v1305_v60 = vld [vmem:[%s1809_s3 + $0x24] ss:$16 sps:$4 sm:$0xff]   ;;  %v1307_v61 = vld [vmem:[%s1809_s3 + $0x2c] ss:$16 sps:$4 sm:$0xff]  }
  0x17   :  { %v1309_v62 = vld [vmem:[%s1809_s3 + $0x20] ss:$16 sps:$4 sm:$0xff]   ;;  %v1310_v63 = vld [vmem:[%s1809_s3 + $0x28] ss:$16 sps:$4 sm:$0xff]  }
  0x18   :  { %1018 = vmatpush3.bf16.msra.mxu0 %v1480_v22 }
  0x19   :  { %1046 = vmatpush3.bf16.msra.mxu1 %v1486_v23  ;;  %1019 = vmatprep.subr.bf16.mxu0 %v1492_v24 }
  0x1a   :  { %1047 = vmatprep.subr.bf16.mxu1 %v1498_v25 }
  0x1c   :  { %1020 = vmatpush3.bf16.msra.mxu0 %v1504_v26 }
  0x1d   :  { %1048 = vmatpush3.bf16.msra.mxu1 %v1510_v27  ;;  %1021 = vmatprep.subr.bf16.mxu0 %v1516_v28 }
  0x1e   :  { %1049 = vmatprep.subr.bf16.mxu1 %v1522_v29 }
  0x20   :  { %1022 = vmatpush3.bf16.msra.mxu0 %v1528_v30 }
  0x21   :  { %1050 = vmatpush3.bf16.msra.mxu1 %v1534_v31  ;;  %1063 = vmatprep.subr.bf16.mxu0 %v1349_v0 }
  0x22   :  { %1091 = vmatprep.subr.bf16.mxu1 %v1354_v1 }
  0x23   :  { %368 = vmatmul.mubr.bf16.vlgmr.msra.gmra.mxu0 %v1263_v32 }
  0x24   :  { %417 = vmatmul.mubr.bf16.vlgmr.msra.gmra.mxu1 %v1266_v34  ;;  %1064 = vmatpush3.bf16.msra.mxu0 %v1360_v2 }
  0x25   :  { %1092 = vmatpush3.bf16.msra.mxu1 %v1366_v3  ;;  %1065 = vmatprep.subr.bf16.mxu0 %v1372_v4 }
  0x26   :  { %1093 = vmatprep.subr.bf16.mxu1 %v1378_v5  ;;  %375 = vmatprep.mubr.bf16.mxu0 %v1269_v36 }
  0x27   :  { %424 = vmatprep.mubr.bf16.mxu1 %v1272_v37 }
  0x28   :  { %1066 = vmatpush3.bf16.msra.mxu0 %v1384_v6 }
  0x29   :  { %1094 = vmatpush3.bf16.msra.mxu1 %v1390_v7  ;;  %1067 = vmatprep.subr.bf16.mxu0 %v1396_v8 }
  0x2a   :  { %1095 = vmatprep.subr.bf16.mxu1 %v1402_v9 }
  0x2b   :  { %376 = vmatmul.mubr.bf16.gmra.mxu0 %v1271_v38 }
  0x2c   :  { %1068 = vmatpush3.bf16.msra.mxu0 %v1408_v10  ;;  %425 = vmatmul.mubr.bf16.gmra.mxu1 %v1274_v39 }
  0x2d   :  { %1096 = vmatpush3.bf16.msra.mxu1 %v1414_v11  ;;  %1069 = vmatprep.subr.bf16.mxu0 %v1420_v12 }
  0x2e   :  { %1097 = vmatprep.subr.bf16.mxu1 %v1426_v13  ;;  %517 = vmatprep.mubr.bf16.mxu0 %v1277_v40 }
  0x2f   :  { %566 = vmatprep.mubr.bf16.mxu1 %v1280_v41 }
  0x30   :  { %1070 = vmatpush3.bf16.msra.mxu0 %v1432_v14 }
  0x31   :  { %1098 = vmatpush3.bf16.msra.mxu1 %v1438_v15  ;;  %1071 = vmatprep.subr.bf16.mxu0 %v1444_v16 }
  0x32   :  { %1099 = vmatprep.subr.bf16.mxu1 %v1450_v17 }
  0x34   :  { %1072 = vmatpush3.bf16.msra.mxu0 %v1456_v18 }
  0x35   :  { %1100 = vmatpush3.bf16.msra.mxu1 %v1462_v19  ;;  %1073 = vmatprep.subr.bf16.mxu0 %v1468_v20 }
  0x36   :  { %1101 = vmatprep.subr.bf16.mxu1 %v1474_v21 }
  0x38   :  { %1074 = vmatpush3.bf16.msra.mxu0 %v1480_v22 }
  0x39   :  { %1102 = vmatpush3.bf16.msra.mxu1 %v1486_v23  ;;  %1075 = vmatprep.subr.bf16.mxu0 %v1492_v24 }
  0x3a   :  { %1103 = vmatprep.subr.bf16.mxu1 %v1498_v25 }
  0x3c   :  { %1076 = vmatpush3.bf16.msra.mxu0 %v1504_v26 }
  0x3d   :  { %1104 = vmatpush3.bf16.msra.mxu1 %v1510_v27  ;;  %1077 = vmatprep.subr.bf16.mxu0 %v1516_v28 }
  0x3e   :  { %1105 = vmatprep.subr.bf16.mxu1 %v1522_v29 }
  0x40   :  { %1078 = vmatpush3.bf16.msra.mxu0 %v1528_v30 }
  0x41   :  { %1106 = vmatpush3.bf16.msra.mxu1 %v1534_v31  ;;  %1119 = vmatprep.subr.bf16.mxu0 %v1349_v0 }
  0x42   :  { %1147 = vmatprep.subr.bf16.mxu1 %v1354_v1 }
  0x43   :  { %518 = vmatmul.mubr.bf16.vlgmr.msra.gmra.mxu0 %v1275_v42 }
  0x44   :  { %567 = vmatmul.mubr.bf16.vlgmr.msra.gmra.mxu1 %v1278_v43  ;;  %1120 = vmatpush3.bf16.msra.mxu0 %v1360_v2 }
  0x45   :  { %1148 = vmatpush3.bf16.msra.mxu1 %v1366_v3  ;;  %1121 = vmatprep.subr.bf16.mxu0 %v1372_v4 }
  0x46   :  { %1149 = vmatprep.subr.bf16.mxu1 %v1378_v5  ;;  %525 = vmatprep.mubr.bf16.mxu0 %v1281_v44 }
  0x47   :  { %574 = vmatprep.mubr.bf16.mxu1 %v1284_v45 }
  0x48   :  { %1122 = vmatpush3.bf16.msra.mxu0 %v1384_v6 }
  0x49   :  { %1150 = vmatpush3.bf16.msra.mxu1 %v1390_v7  ;;  %1123 = vmatprep.subr.bf16.mxu0 %v1396_v8 }
  0x4a   :  { %1151 = vmatprep.subr.bf16.mxu1 %v1402_v9 }
  0x4b   :  { %526 = vmatmul.mubr.bf16.gmra.mxu0 %v1283_v46  ;;  %v1757_v46 = vld [vmem:[%s1810_s5] ss:$0 sm:$0xff] }
  0x4c   :  { %1124 = vmatpush3.bf16.msra.mxu0 %v1408_v10  ;;  %575 = vmatmul.mubr.bf16.gmra.mxu1 %v1286_v47 }
  0x4d   :  { %1152 = vmatpush3.bf16.msra.mxu1 %v1414_v11  ;;  %1125 = vmatprep.subr.bf16.mxu0 %v1420_v12 }
  0x4e   :  { %1153 = vmatprep.subr.bf16.mxu1 %v1426_v13  ;;  %671 = vmatprep.mubr.bf16.mxu0 %v1289_v48 }
  0x4f   :  { %720 = vmatprep.mubr.bf16.mxu1 %v1292_v49 }
  0x50   :  { %1126 = vmatpush3.bf16.msra.mxu0 %v1432_v14 }
  0x51   :  { %1154 = vmatpush3.bf16.msra.mxu1 %v1438_v15  ;;  %1127 = vmatprep.subr.bf16.mxu0 %v1444_v16 }
  0x52   :  { %1155 = vmatprep.subr.bf16.mxu1 %v1450_v17 }
  0x54   :  { %1128 = vmatpush3.bf16.msra.mxu0 %v1456_v18 }
  0x55   :  { %1156 = vmatpush3.bf16.msra.mxu1 %v1462_v19  ;;  %1129 = vmatprep.subr.bf16.mxu0 %v1468_v20 }
  0x56   :  { %1157 = vmatprep.subr.bf16.mxu1 %v1474_v21 }
  0x58   :  { %1130 = vmatpush3.bf16.msra.mxu0 %v1480_v22 }
  0x59   :  { %1158 = vmatpush3.bf16.msra.mxu1 %v1486_v23  ;;  %1131 = vmatprep.subr.bf16.mxu0 %v1492_v24 }
  0x5a   :  { %1159 = vmatprep.subr.bf16.mxu1 %v1498_v25 }
  0x5c   :  { %1132 = vmatpush3.bf16.msra.mxu0 %v1504_v26 }
  0x5d   :  { %1160 = vmatpush3.bf16.msra.mxu1 %v1510_v27  ;;  %1133 = vmatprep.subr.bf16.mxu0 %v1516_v28 }
  0x5e   :  { %1161 = vmatprep.subr.bf16.mxu1 %v1522_v29 }
  0x60   :  { %1134 = vmatpush3.bf16.msra.mxu0 %v1528_v30 }
  0x61   :  { %1162 = vmatpush3.bf16.msra.mxu1 %v1534_v31  ;;  %1175 = vmatprep.subr.bf16.mxu0 %v1349_v0 }
  0x62   :  { %1203 = vmatprep.subr.bf16.mxu1 %v1354_v1 }
  0x63   :  { %672 = vmatmul.mubr.bf16.vlgmr.msra.gmra.mxu0 %v1287_v50 }
  0x64   :  { %721 = vmatmul.mubr.bf16.vlgmr.msra.gmra.mxu1 %v1290_v51  ;;  %1176 = vmatpush3.bf16.msra.mxu0 %v1360_v2 }
  0x65   :  { %1204 = vmatpush3.bf16.msra.mxu1 %v1366_v3  ;;  %1177 = vmatprep.subr.bf16.mxu0 %v1372_v4 }
  0x66   :  { %1205 = vmatprep.subr.bf16.mxu1 %v1378_v5  ;;  %679 = vmatprep.mubr.bf16.mxu0 %v1293_v52 }
  0x67   :  { %728 = vmatprep.mubr.bf16.mxu1 %v1296_v53 }
  0x68   :  { %1178 = vmatpush3.bf16.msra.mxu0 %v1384_v6 }
  0x69   :  { %1206 = vmatpush3.bf16.msra.mxu1 %v1390_v7  ;;  %1179 = vmatprep.subr.bf16.mxu0 %v1396_v8 }
  0x6a   :  { %1207 = vmatprep.subr.bf16.mxu1 %v1402_v9 }
  0x6b   :  { %680 = vmatmul.mubr.bf16.gmra.mxu0 %v1295_v54 }
  0x6c   :  { %1180 = vmatpush3.bf16.msra.mxu0 %v1408_v10  ;;  %729 = vmatmul.mubr.bf16.gmra.mxu1 %v1298_v55 }
  0x6d   :  { %1208 = vmatpush3.bf16.msra.mxu1 %v1414_v11  ;;  %1181 = vmatprep.subr.bf16.mxu0 %v1420_v12 }
  0x6e   :  { %1209 = vmatprep.subr.bf16.mxu1 %v1426_v13  ;;  %821 = vmatprep.mubr.bf16.mxu0 %v1301_v56 }
  0x6f   :  { %870 = vmatprep.mubr.bf16.mxu1 %v1304_v57 }
  0x70   :  { %1182 = vmatpush3.bf16.msra.mxu0 %v1432_v14 }
  0x71   :  { %1210 = vmatpush3.bf16.msra.mxu1 %v1438_v15  ;;  %1183 = vmatprep.subr.bf16.mxu0 %v1444_v16 }
  0x72   :  { %1211 = vmatprep.subr.bf16.mxu1 %v1450_v17 }
  0x74   :  { %1184 = vmatpush3.bf16.msra.mxu0 %v1456_v18 }
  0x75   :  { %1212 = vmatpush3.bf16.msra.mxu1 %v1462_v19  ;;  %1185 = vmatprep.subr.bf16.mxu0 %v1468_v20 }
  0x76   :  { %1213 = vmatprep.subr.bf16.mxu1 %v1474_v21 }
  0x78   :  { %1186 = vmatpush3.bf16.msra.mxu0 %v1480_v22 }
  0x79   :  { %1214 = vmatpush3.bf16.msra.mxu1 %v1486_v23  ;;  %1187 = vmatprep.subr.bf16.mxu0 %v1492_v24 }
  0x7a   :  { %1215 = vmatprep.subr.bf16.mxu1 %v1498_v25 }
  0x7c   :  { %1188 = vmatpush3.bf16.msra.mxu0 %v1504_v26 }
  0x7d   :  { %1216 = vmatpush3.bf16.msra.mxu1 %v1510_v27  ;;  %1189 = vmatprep.subr.bf16.mxu0 %v1516_v28 }
  0x7e   :  { %1217 = vmatprep.subr.bf16.mxu1 %v1522_v29 }
  0x80   :  { %1190 = vmatpush3.bf16.msra.mxu0 %v1528_v30 }
  0x81   :  { %1218 = vmatpush3.bf16.msra.mxu1 %v1534_v31 }
  0x83   :  { %822 = vmatmul.mubr.bf16.vlgmr.msra.gmra.mxu0 %v1299_v58 }
  0x84   :  { %871 = vmatmul.mubr.bf16.vlgmr.msra.gmra.mxu1 %v1302_v59  ;;  %829 = vmatprep.mubr.bf16.mxu0 %v1305_v60 }
  0x85   :  { %878 = vmatprep.mubr.bf16.mxu1 %v1307_v61 }
  0x8b   :  { %830 = vmatmul.mubr.bf16.gmra.mxu0 %v1309_v62 }
  0x8c   :  { %879 = vmatmul.mubr.bf16.gmra.mxu1 %v1310_v63 }
  0xe3   :  { %v1023_v0 = vpop.f32.mrf.mxu0 }
  0xe4   :  { %v1051_v1 = vpop.f32.mrf.mxu1 }
  0xe5   :  { %v1024_v2 = vpop.f32.mrf.mxu0 }
  0xe6   :  { %v1052_v3 = vpop.f32.mrf.mxu1  ;;  %v1025_v43 = vadd.f32 %v1024_v2, %v1023_v0 }
  0xe7   :  { %v1026_v4 = vpop.f32.mrf.mxu0  ;;  %v1053_v49 = vadd.f32 %v1052_v3, %v1051_v1 }
  0xe8   :  { %v1054_v5 = vpop.f32.mrf.mxu1  ;;  %v370_v48 = vadd.f32 %v1025_v43, %v1757_v46 }
  0xe9   :  { %v1027_v6 = vpop.f32.mrf.mxu0 }
  0xea   :  { %v1055_v8 = vpop.f32.mrf.mxu1  ;;  %v1028_v44 = vadd.f32 %v1027_v6, %v1026_v4  ;;  %v1763_v57 = vadd.f32 %v1053_v49, %v370_v48 }
  0xeb   :  { %v1029_v7 = vpop.f32.mrf.mxu0  ;;  %v1056_v54 = vadd.f32 %v1055_v8, %v1054_v5 }
  0xec   :  { %v1730_v9 = vpop.f32.mrf.mxu1  ;;  %v373_v50 = vadd.f32 %v1028_v44, %v1757_v46  ;;  %v433_v8 = vmax.f32 %v1763_v57, 0.0 }
  0xed   :  { %v1030_v10 = vpop.f32.mrf.mxu0 }
  0xee   :  { %v1058_v11 = vpop.f32.mrf.mxu1  ;;  %v1765_v58 = vadd.f32 %v1056_v54, %v373_v50  ;;  %v1031_v60 = vadd.f32 %v1030_v10, %v1029_v7 }
  0xef   :  { %v1732_v12 = vpop.f32.mrf.mxu0 }
  0xf0   :  { %v1734_v13 = vpop.f32.mrf.mxu1  ;;  %v434_v10 = vmax.f32 %v1765_v58, 0.0 }
  0xf1   :  { %v1736_v14 = vpop.f32.mrf.mxu0 }
  0xf2   :  { %v1738_v16 = vpop.f32.mrf.mxu1 }
 0x103   :  { %v1079_v15 = vpop.f32.mrf.mxu0 }
 0x104   :  { %v1107_v17 = vpop.f32.mrf.mxu1 }
 0x105   :  { %v1080_v18 = vpop.f32.mrf.mxu0 }
 0x106   :  { %v1108_v19 = vpop.f32.mrf.mxu1  ;;  %v1081_v52 = vadd.f32 %v1080_v18, %v1079_v15  ;;  %v1772_v15 = vadd.f32 %v1058_v11, %v1730_v9  ;;  %v1062_v9 = vadd.f32 %v1738_v16, %v1734_v13 }
 0x107   :  { %v1082_v20 = vpop.f32.mrf.mxu0  ;;  %v1109_v62 = vadd.f32 %v1108_v19, %v1107_v17  ;;  %v378_v17 = vadd.f32 %v1031_v60, %v1757_v46 }
 0x108   :  { %v1110_v21 = vpop.f32.mrf.mxu1  ;;  %v520_v61 = vadd.f32 %v1081_v52, %v1757_v46 }
 0x109   :  { %v1083_v22 = vpop.f32.mrf.mxu0 }
 0x10a   :  { %v1111_v23 = vpop.f32.mrf.mxu1  ;;  %v1084_v53 = vadd.f32 %v1083_v22, %v1082_v20  ;;  %v569_v19 = vadd.f32 %v1109_v62, %v520_v61 }
 0x10b   :  { %v1740_v24 = vpop.f32.mrf.mxu0  ;;  %v1112_v3 = vadd.f32 %v1111_v23, %v1110_v21  ;;  %v1034_v21 = vadd.f32 %v1736_v14, %v1732_v12 }
 0x10c   :  { %v1742_v25 = vpop.f32.mrf.mxu1  ;;  %v523_v63 = vadd.f32 %v1084_v53, %v1757_v46  ;;  %v583_v12 = vmax.f32 %v569_v19, 0.0 }
 0x10d   :  { %v1086_v26 = vpop.f32.mrf.mxu0 }
 0x10e   :  { %v1744_v27 = vpop.f32.mrf.mxu1  ;;  %v572_v20 = vadd.f32 %v1112_v3, %v523_v63  ;;  %v1087_v11 = vadd.f32 %v1086_v26, %v1740_v24 }
 0x10f   :  { %v1088_v28 = vpop.f32.mrf.mxu0  ;;  %v1115_v52 = vadd.f32 %v1744_v27, %v1742_v25 }
 0x110   :  { %v1746_v29 = vpop.f32.mrf.mxu1  ;;  %v584_v14 = vmax.f32 %v572_v20, 0.0  ;;  %v528_v26 = vadd.f32 %v1087_v11, %v1757_v46 }
 0x111   :  { %v1089_v30 = vpop.f32.mrf.mxu0 }
 0x112   :  { %v1748_v31 = vpop.f32.mrf.mxu1  ;;  %v588_v3 = vmax.f32 %v434_v10, %v584_v14 }
 0x123   :  { %v1135_v32 = vpop.f32.mrf.mxu0 }
 0x124   :  { %v1163_v33 = vpop.f32.mrf.mxu1 }
 0x125   :  { %v1136_v34 = vpop.f32.mrf.mxu0 }
 0x126   :  { %v1164_v35 = vpop.f32.mrf.mxu1  ;;  %v1137_v55 = vadd.f32 %v1136_v34, %v1135_v32 }
 0x127   :  { %v1138_v36 = vpop.f32.mrf.mxu0  ;;  %v1165_v5 = vadd.f32 %v1164_v35, %v1163_v33  ;;  %v1090_v35 = vadd.f32 %v1089_v30, %v1088_v28  ;;  %v1118_v30 = vadd.f32 %v1748_v31, %v1746_v29 }
 0x128   :  { %v1166_v37 = vpop.f32.mrf.mxu1  ;;  %v674_v4 = vadd.f32 %v1137_v55, %v1757_v46 }
 0x129   :  { %v1139_v38 = vpop.f32.mrf.mxu0  ;;  %v531_v28 = vadd.f32 %v1090_v35, %v1757_v46 }
 0x12a   :  { %v1167_v39 = vpop.f32.mrf.mxu1  ;;  %v1140_v1 = vadd.f32 %v1139_v38, %v1138_v36  ;;  %v723_v36 = vadd.f32 %v1165_v5, %v674_v4 }
 0x12b   :  { %v1141_v40 = vpop.f32.mrf.mxu0  ;;  %v1168_v43 = vadd.f32 %v1167_v39, %v1166_v37 }
 0x12c   :  { %v1750_v41 = vpop.f32.mrf.mxu1  ;;  %v677_v23 = vadd.f32 %v1140_v1, %v1757_v46  ;;  %v737_v37 = vmax.f32 %v723_v36, 0.0 }
 0x12d   :  { %v1142_v42 = vpop.f32.mrf.mxu0 }
 0x12e   :  { %v1752_v45 = vpop.f32.mrf.mxu1  ;;  %v1143_v44 = vadd.f32 %v1142_v42, %v1141_v40  ;;  %v726_v55 = vadd.f32 %v1168_v43, %v677_v23 }
 0x12f   :  { %v1144_v47 = vpop.f32.mrf.mxu0  ;;  %v1171_v25 = vadd.f32 %v1752_v45, %v1750_v41  ;;  %v577_v41 = vadd.f32 %v1115_v52, %v528_v26  ;;  %v580_v45 = vadd.f32 %v1118_v30, %v531_v28 }
 0x130   :  { %v1761_v51 = vpop.f32.mrf.mxu1  ;;  %v682_v40 = vadd.f32 %v1143_v44, %v1757_v46  ;;  %v738_v63 = vmax.f32 %v726_v55, 0.0 }
 0x131   :  { %v1145_v56 = vpop.f32.mrf.mxu0  ;;  %v586_v10 = vmax.f32 %v580_v45, 0.0 }
 0x132   :  { %v1173_v59 = vpop.f32.mrf.mxu1  ;;  %v1146_v53 = vadd.f32 %v1145_v56, %v1144_v47  ;;  %v381_v56 = vadd.f32 %v1034_v21, %v1757_v46  ;;  %v731_v5 = vadd.f32 %v1171_v25, %v682_v40 }
 0x133   :  { %v1174_v60 = vadd.f32 %v1173_v59, %v1761_v51  ;;  %v427_v51 = vadd.f32 %v1772_v15, %v378_v17 }
 0x134   :  { %v685_v58 = vadd.f32 %v1146_v53, %v1757_v46  ;;  %v430_v59 = vadd.f32 %v1062_v9, %v381_v56 }
 0x135   :  { %v435_v36 = vmax.f32 %v427_v51, 0.0 }
 0x136   :  { %v734_v20 = vadd.f32 %v1174_v60, %v685_v58 }
 0x138   :  { %v740_v43 = vmax.f32 %v734_v20, 0.0 }
 0x143   :  { %v1191_v0 = vpop.f32.mrf.mxu0 }
 0x144   :  { %v1219_v2 = vpop.f32.mrf.mxu1 }
 0x145   :  { %v1192_v6 = vpop.f32.mrf.mxu0 }
 0x146   :  { %v1193_v18 = vadd.f32 %v1192_v6, %v1191_v0  ;;  %v1220_v7 = vpop.f32.mrf.mxu1 }
 0x147   :  { %v1194_v22 = vpop.f32.mrf.mxu0  ;;  %v1221_v33 = vadd.f32 %v1220_v7, %v1219_v2  ;;  %v587_v2 = vmax.f32 %v433_v8, %v583_v12  ;;  %v585_v8 = vmax.f32 %v577_v41, 0.0 }
 0x148   :  { %v824_v32 = vadd.f32 %v1193_v18, %v1757_v46  ;;  %v1222_v34 = vpop.f32.mrf.mxu1 }
 0x149   :  { %v1195_v38 = vpop.f32.mrf.mxu0  ;;  %v589_v9 = vmax.f32 %v435_v36, %v585_v8 }
 0x14a   :  { %v873_v48 = vadd.f32 %v1221_v33, %v824_v32  ;;  %v1196_v49 = vadd.f32 %v1195_v38, %v1194_v22  ;;  %v1223_v50 = vpop.f32.mrf.mxu1  ;;  %v436_v38 = vmax.f32 %v430_v59, 0.0 }
 0x14b   :  { %v1197_v54 = vpop.f32.mrf.mxu0  ;;  %v1224_v16 = vadd.f32 %v1223_v50, %v1222_v34  ;;  %v739_v34 = vmax.f32 %v731_v5, 0.0 }
 0x14c   :  { %v887_v57 = vmax.f32 %v873_v48, 0.0  ;;  %v827_v13 = vadd.f32 %v1196_v49, %v1757_v46  ;;  %v1225_v24 = vpop.f32.mrf.mxu1  ;;  %v590_v44 = vmax.f32 %v436_v38, %v586_v10 }
 0x14d   :  { %v1198_v39 = vpop.f32.mrf.mxu0 }
 0x14e   :  { %v876_v27 = vadd.f32 %v1224_v16, %v827_v13  ;;  %v1199_v42 = vadd.f32 %v1198_v39, %v1197_v54  ;;  %v1226_v47 = vpop.f32.mrf.mxu1  ;;  %v891_v61 = vmax.f32 %v737_v37, %v887_v57 }
 0x14f   :  { %v1200_v62 = vpop.f32.mrf.mxu0  ;;  %v1227_v0 = vadd.f32 %v1226_v47, %v1225_v24 }
 0x150   :  { %v888_v29 = vmax.f32 %v876_v27, 0.0  ;;  %v832_v31 = vadd.f32 %v1199_v42, %v1757_v46  ;;  %v1228_v1 = vpop.f32.mrf.mxu1  ;;  %v895_v22 = vmax.f32 %v587_v2, %v891_v61 }
 0x151   :  { %v1201_v4 = vpop.f32.mrf.mxu0 }
 0x152   :  { %v892_v6 = vmax.f32 %v738_v63, %v888_v29  ;;  %v881_v18 = vadd.f32 %v1227_v0, %v832_v31  ;;  %v1202_v7 = vadd.f32 %v1201_v4, %v1200_v62  ;;  %v1229_v19 = vpop.f32.mrf.mxu1 }
 0x153   :  { %v1230_v33 = vadd.f32 %v1229_v19, %v1228_v1 }
 0x154   :  { %v896_v21 = vmax.f32 %v588_v3, %v892_v6  ;;  %v889_v23 = vmax.f32 %v881_v18, 0.0  ;;  %v835_v32 = vadd.f32 %v1202_v7, %v1757_v46 }
 0x156   :  { %v999_v11 = vpack.c.bf16 %v896_v21, %v895_v22  ;;  %v884_v35 = vadd.f32 %v1230_v33, %v835_v32  ;;  %v893_v15 = vmax.f32 %v739_v34, %v889_v23 }
 0x158   :  { %1000 = vst [vmem:[%s1811_s6] sm:$0xff] %v999_v11   ;;  %v890_v17 = vmax.f32 %v884_v35, 0.0  ;;  %v897_v49 = vmax.f32 %v589_v9, %v893_v15 }
 0x15a   :  { %v894_v48 = vmax.f32 %v740_v43, %v890_v17 }
 0x15c   :  { %v898_v46 = vmax.f32 %v590_v44, %v894_v48 }
 0x15e   :  { %v1004_v50 = vpack.c.bf16 %v898_v46, %v897_v49 }
 0x160   :  { %1006 = vst [vmem:[%s1811_s6 + $0x8] sm:$0xff] %v1004_v50  }

// kernel: net_forward.5
= control target key start
LH: loop header
LB: loop body
LE: loop exit
PB: predicated region body
PF: predicated region fallthrough
CT: control target
= control target key end

     0   :  { %v225_v36 = vlaneseq  ;;  %v2635_v37 = vmov 1966171168   ;;  %vm1300_vm0 = vcmask 261120   ;;  %s3429_s0 = inlined_call_operand.vmem [shape: bf16[2,800], index: 0, kind: input, shape index: {}]   ;;  %s3430_s1 = inlined_call_operand.vmem [shape: bf16[800,512], index: 1, kind: input, shape index: {}]   ;;  %s3431_s2 = inlined_call_operand.vmem [shape: f32[1,512], index: 2, kind: input, shape index: {}]   ;;  %s3432_s3 = inlined_call_operand.vmem [shape: bf16[512,128], index: 3, kind: input, shape index: {}]   ;;  %s3433_s4 = inlined_call_operand.vmem [shape: f32[1,128], index: 4, kind: input, shape index: {}]   ;;  %s3434_s5 = inlined_call_operand.hbm [shape: f32[2,128], index: 5, kind: output, shape index: {}]  }
   0x1   :  { %v2280_v0 = vld [vmem:[%s3430_s1 + $0xe4] ss:$16 sps:$4 sm:$0xff]   ;;  %v2284_v2 = vld [vmem:[%s3430_s1 + $0xe0] ss:$16 sps:$4 sm:$0xff]   ;;  %v248_v38 = vunpack.c.l.s4 %v2635_v37  ;;  %v2406_v37 = vld [vmem:[%s3430_s1 + $0xac] ss:$16 sps:$4 sm:$0xff]  }
   0x2   :  { %v2282_v1 = vld [vmem:[%s3430_s1 + $0x2e4] ss:$16 sps:$4 sm:$0xff]   ;;  %1304 = vmatprep.subr.bf16.mxu0 %v2280_v0  ;;  %v2285_v3 = vld [vmem:[%s3430_s1 + $0x2e0] ss:$16 sps:$4 sm:$0xff]   ;;  %v2785_v42 = vshrl.u32 %v225_v36, 7 }
   0x3   :  { %1345 = vmatprep.subr.bf16.mxu1 %v2282_v1  ;;  %v2286_v4 = vld [vmem:[%s3430_s1 + $0xc4] ss:$16 sps:$4 sm:$0xff]   ;;  %1305 = vmatpush1.bf16.msra.mxu0 %v2284_v2  ;;  %v2290_v6 = vld [vmem:[%s3430_s1 + $0xc0] ss:$16 sps:$4 sm:$0xff]   ;;  %v249_v43 = vunpack.c.0.s8 %v248_v38 }
   0x4   :  { %1346 = vmatpush1.bf16.msra.mxu1 %v2285_v3  ;;  %v2288_v5 = vld [vmem:[%s3430_s1 + $0x2c4] ss:$16 sps:$4 sm:$0xff]   ;;  %1306 = vmatprep.subr.bf16.mxu0 %v2286_v4  ;;  %v2291_v7 = vld [vmem:[%s3430_s1 + $0x2c0] ss:$16 sps:$4 sm:$0xff]  }
   0x5   :  { %1347 = vmatprep.subr.bf16.mxu1 %v2288_v5  ;;  %v2292_v8 = vld [vmem:[%s3430_s1 + $0xa4] ss:$16 sps:$4 sm:$0xff]   ;;  %v2296_v10 = vld [vmem:[%s3430_s1 + $0xa0] ss:$16 sps:$4 sm:$0xff]   ;;  %v2803_v49 = vsub.s32 %v249_v43, %v2785_v42 }
   0x6   :  { %v2294_v9 = vld [vmem:[%s3430_s1 + $0x2a4] ss:$16 sps:$4 sm:$0xff]   ;;  %v2297_v11 = vld [vmem:[%s3430_s1 + $0x2a0] ss:$16 sps:$4 sm:$0xff]  }
   0x7   :  { %1307 = vmatpush1.bf16.msra.mxu0 %v2290_v6  ;;  %v2298_v12 = vld [vmem:[%s3430_s1 + $0x84] ss:$16 sps:$4 sm:$0xff]   ;;  %v2302_v14 = vld [vmem:[%s3430_s1 + $0x80] ss:$16 sps:$4 sm:$0xff]  }
   0x8   :  { %1348 = vmatpush1.bf16.msra.mxu1 %v2291_v7  ;;  %1308 = vmatprep.subr.bf16.mxu0 %v2292_v8  ;;  %v2300_v13 = vld [vmem:[%s3430_s1 + $0x284] ss:$16 sps:$4 sm:$0xff]   ;;  %v2303_v15 = vld [vmem:[%s3430_s1 + $0x280] ss:$16 sps:$4 sm:$0xff]  }
   0x9   :  { %1349 = vmatprep.subr.bf16.mxu1 %v2294_v9  ;;  %v2304_v16 = vld [vmem:[%s3430_s1 + $0x64] ss:$16 sps:$4 sm:$0xff]   ;;  %v2308_v18 = vld [vmem:[%s3430_s1 + $0x60] ss:$16 sps:$4 sm:$0xff]  }
   0xa   :  { %v2306_v17 = vld [vmem:[%s3430_s1 + $0x264] ss:$16 sps:$4 sm:$0xff]   ;;  %v2309_v19 = vld [vmem:[%s3430_s1 + $0x260] ss:$16 sps:$4 sm:$0xff]  }
   0xb   :  { %1309 = vmatpush1.bf16.msra.mxu0 %v2296_v10  ;;  %v2310_v20 = vld [vmem:[%s3430_s1 + $0x44] ss:$16 sps:$4 sm:$0xff]   ;;  %v2314_v22 = vld [vmem:[%s3430_s1 + $0x40] ss:$16 sps:$4 sm:$0xff]  }
   0xc   :  { %1350 = vmatpush1.bf16.msra.mxu1 %v2297_v11  ;;  %1310 = vmatprep.subr.bf16.mxu0 %v2298_v12  ;;  %v2312_v21 = vld [vmem:[%s3430_s1 + $0x244] ss:$16 sps:$4 sm:$0xff]   ;;  %v2315_v23 = vld [vmem:[%s3430_s1 + $0x240] ss:$16 sps:$4 sm:$0xff]  }
   0xd   :  { %1351 = vmatprep.subr.bf16.mxu1 %v2300_v13  ;;  %v2316_v24 = vld [vmem:[%s3430_s1 + $0x24] ss:$16 sps:$4 sm:$0xff]   ;;  %v2320_v26 = vld [vmem:[%s3430_s1 + $0x20] ss:$16 sps:$4 sm:$0xff]  }
   0xe   :  { %v2318_v25 = vld [vmem:[%s3430_s1 + $0x224] ss:$16 sps:$4 sm:$0xff]   ;;  %v2321_v27 = vld [vmem:[%s3430_s1 + $0x220] ss:$16 sps:$4 sm:$0xff]  }
   0xf   :  { %1311 = vmatpush1.bf16.msra.mxu0 %v2302_v14  ;;  %v2322_v28 = vld [vmem:[%s3430_s1 + $0x4] ss:$16 sps:$4 sm:$0xff]   ;;  %v2326_v30 = vld [vmem:[%s3430_s1] ss:$16 sps:$4 sm:$0xff]  }
  0x10   :  { %1352 = vmatpush1.bf16.msra.mxu1 %v2303_v15  ;;  %1312 = vmatprep.subr.bf16.mxu0 %v2304_v16  ;;  %v2324_v29 = vld [vmem:[%s3430_s1 + $0x204] ss:$16 sps:$4 sm:$0xff]   ;;  %v2327_v31 = vld [vmem:[%s3430_s1 + $0x200] ss:$16 sps:$4 sm:$0xff]  }
  0x11   :  { %1353 = vmatprep.subr.bf16.mxu1 %v2306_v17  ;;  %v2328_v32 = vld [vmem:[%s3430_s1 + $0x1e4] ss:$16 sps:$4 sm:$0xff]   ;;  %v2332_v34 = vld [vmem:[%s3430_s1 + $0x1e0] ss:$16 sps:$4 sm:$0xff]  }
  0x12   :  { %v2330_v33 = vld [vmem:[%s3430_s1 + $0x3e4] ss:$16 sps:$4 sm:$0xff]   ;;  %v2333_v35 = vld [vmem:[%s3430_s1 + $0x3e0] ss:$16 sps:$4 sm:$0xff]  }
  0x13   :  { %1313 = vmatpush1.bf16.msra.mxu0 %v2308_v18  ;;  %v2334_v39 = vld [vmem:[%s3430_s1 + $0x1c4] ss:$16 sps:$4 sm:$0xff]   ;;  %v2338_v41 = vld [vmem:[%s3430_s1 + $0x1c0] ss:$16 sps:$4 sm:$0xff]  }
  0x14   :  { %1354 = vmatpush1.bf16.msra.mxu1 %v2309_v19  ;;  %1314 = vmatprep.subr.bf16.mxu0 %v2310_v20  ;;  %v2336_v40 = vld [vmem:[%s3430_s1 + $0x3c4] ss:$16 sps:$4 sm:$0xff]   ;;  %v2339_v44 = vld [vmem:[%s3430_s1 + $0x3c0] ss:$16 sps:$4 sm:$0xff]  }
  0x15   :  { %1355 = vmatprep.subr.bf16.mxu1 %v2312_v21  ;;  %v2340_v45 = vld [vmem:[%s3430_s1 + $0x1a4] ss:$16 sps:$4 sm:$0xff]   ;;  %v2344_v47 = vld [vmem:[%s3430_s1 + $0x1a0] ss:$16 sps:$4 sm:$0xff]  }
  0x16   :  { %v2342_v46 = vld [vmem:[%s3430_s1 + $0x3a4] ss:$16 sps:$4 sm:$0xff]   ;;  %v2345_v48 = vld [vmem:[%s3430_s1 + $0x3a0] ss:$16 sps:$4 sm:$0xff]  }
  0x17   :  { %1315 = vmatpush1.bf16.msra.mxu0 %v2314_v22  ;;  %v2346_v50 = vld [vmem:[%s3430_s1 + $0x184] ss:$16 sps:$4 sm:$0xff]   ;;  %v2350_v53 = vld [vmem:[%s3430_s1 + $0x180] ss:$16 sps:$4 sm:$0xff]  }
  0x18   :  { %1356 = vmatpush1.bf16.msra.mxu1 %v2315_v23  ;;  %1316 = vmatprep.subr.bf16.mxu0 %v2316_v24  ;;  %v2348_v51 = vld [vmem:[%s3430_s1 + $0x384] ss:$16 sps:$4 sm:$0xff]   ;;  %v2351_v55 = vld [vmem:[%s3430_s1 + $0x380] ss:$16 sps:$4 sm:$0xff]  }
  0x19   :  { %1357 = vmatprep.subr.bf16.mxu1 %v2318_v25  ;;  %v22_v52 = vld [vmem:[%s3429_s0] sm:$0x7f] }
  0x1a   :  { %v253_v54 = vrot.slane %v22_v52, %v2803_v49  ;;  %v2352_v56 = vld [vmem:[%s3430_s1 + $0x164] ss:$16 sps:$4 sm:$0xff]   ;;  %v2356_v59 = vld [vmem:[%s3430_s1 + $0x160] ss:$16 sps:$4 sm:$0xff]   ;;  %v246_v7 = vcombine.high %v22_v52, %v22_v52  ;;  %v2422_v52 = vld [vmem:[%s3430_s1 + $0x48] ss:$16 sps:$4 sm:$0xff]  }
  0x1b   :  { %1317 = vmatpush1.bf16.msra.mxu0 %v2320_v26  ;;  %v2354_v57 = vld [vmem:[%s3430_s1 + $0x364] ss:$16 sps:$4 sm:$0xff]   ;;  %v2357_v61 = vld [vmem:[%s3430_s1 + $0x360] ss:$16 sps:$4 sm:$0xff]  }
  0x1c   :  { %1358 = vmatpush1.bf16.msra.mxu1 %v2321_v27  ;;  %1318 = vmatprep.subr.bf16.mxu0 %v2322_v28  ;;  %v261_v58 = vcombine.high %v253_v54, %v253_v54  ;;  %v2358_v62 = vld [vmem:[%s3430_s1 + $0x144] ss:$16 sps:$4 sm:$0xff]   ;;  %v2362_v1 = vld [vmem:[%s3430_s1 + $0x140] ss:$16 sps:$4 sm:$0xff]   ;;  %v2876_v11 = vrot.slane %v253_v54, %v2803_v49  ;;  %v260_v13 = vrot.slane %v246_v7, %v2803_v49  ;;  %v2394_v27 = vld [vmem:[%s3430_s1 + $0xec] ss:$16 sps:$4 sm:$0xff]  }
  0x1d   :  { %1359 = vmatprep.subr.bf16.mxu1 %v2324_v29  ;;  %v2360_v63 = vld [vmem:[%s3430_s1 + $0x344] ss:$16 sps:$4 sm:$0xff]   ;;  %v2363_v2 = vld [vmem:[%s3430_s1 + $0x340] ss:$16 sps:$4 sm:$0xff]   ;;  %v2636_v28 = vmov 0  }
  0x1e   :  { %v2831_v60 = vrot.slane %v261_v58, %v2803_v49  ;;  %v2364_v3 = vld [vmem:[%s3430_s1 + $0x124] ss:$16 sps:$4 sm:$0xff]   ;;  %v2368_v5 = vld [vmem:[%s3430_s1 + $0x120] ss:$16 sps:$4 sm:$0xff]   ;;  %v262_v16 = vcombine.high %v260_v13, %v260_v13  ;;  %v2890_v17 = vcombine.high %v2876_v11, %v2876_v11  ;;  %v2908_v23 = vrot.slane %v260_v13, %v2803_v49  ;;  %v2430_v54 = vld [vmem:[%s3430_s1 + $0x2c] ss:$16 sps:$4 sm:$0xff]  }
  0x1f   :  { %1319 = vmatpush1.bf16.msra.mxu0 %v2326_v30  ;;  %v2366_v4 = vld [vmem:[%s3430_s1 + $0x324] ss:$16 sps:$4 sm:$0xff]   ;;  %v2369_v6 = vld [vmem:[%s3430_s1 + $0x320] ss:$16 sps:$4 sm:$0xff]   ;;  %v2436_v58 = vld [vmem:[%s3430_s1 + $0xc] ss:$16 sps:$4 sm:$0xff]  }
  0x20   :  { %1360 = vmatpush1.bf16.msra.mxu1 %v2327_v31  ;;  %1320 = vmatprep.subr.bf16.mxu0 %v2328_v32  ;;  %v2844_v0 = vcombine.high %v2831_v60, %v2831_v60  ;;  %v2370_v8 = vld [vmem:[%s3430_s1 + $0x104] ss:$16 sps:$4 sm:$0xff]   ;;  %v2374_v10 = vld [vmem:[%s3430_s1 + $0x100] ss:$16 sps:$4 sm:$0xff]   ;;  %v2905_v22 = vrot.slane %v262_v16, %v2803_v49  ;;  %v2931_v30 = vcombine.high %v2908_v23, %v2908_v23  ;;  %v2392_v31 = vld [vmem:[%s3430_s1 + $0xe8] ss:$16 sps:$4 sm:$0xff]  }
  0x21   :  { %1361 = vmatprep.subr.bf16.mxu1 %v2330_v33  ;;  %1336 = vmatprep.mubr.bf16.mxu0 %v2831_v60  ;;  %v2372_v9 = vld [vmem:[%s3430_s1 + $0x304] ss:$16 sps:$4 sm:$0xff]   ;;  %v2375_v12 = vld [vmem:[%s3430_s1 + $0x300] ss:$16 sps:$4 sm:$0xff]   ;;  %v2400_v33 = vld [vmem:[%s3430_s1 + $0xcc] ss:$16 sps:$4 sm:$0xff]  }
  0x22   :  { %1377 = vmatprep.mubr.bf16.mxu1 %v2844_v0  ;;  %v2379_v14 = vld [vmem:[%s3430_s1 + $0x4e4] ss:$16 sps:$4 sm:$0xff]   ;;  %v2377_v18 = vld [vmem:[%s3430_s1 + $0x4e0] ss:$16 sps:$4 sm:$0xff]   ;;  %v2454_v7 = vld [vmem:[%s3430_s1 + $0x1ac] ss:$16 sps:$4 sm:$0xff]  }
  0x23   :  { %1321 = vmatpush2.bf16.msra.mxu0 %v2332_v34  ;;  %v2382_v15 = vld [vmem:[%s3430_s1 + $0x624] ss:$16 sps:$4 sm:$0xff]   ;;  %v2380_v19 = vld [vmem:[%s3430_s1 + $0x620] ss:$16 sps:$4 sm:$0xff]   ;;  %v2466_v16 = vld [vmem:[%s3430_s1 + $0x16c] ss:$16 sps:$4 sm:$0xff]  }
  0x24   :  { %1362 = vmatpush2.bf16.msra.mxu1 %v2333_v35  ;;  %1322 = vmatprep.subr.bf16.mxu0 %v2334_v39  ;;  %v2385_v20 = vld [vmem:[%s3430_s1 + $0x4c4] ss:$16 sps:$4 sm:$0xff]   ;;  %v2383_v24 = vld [vmem:[%s3430_s1 + $0x4c0] ss:$16 sps:$4 sm:$0xff]   ;;  %v2398_v35 = vld [vmem:[%s3430_s1 + $0xc8] ss:$16 sps:$4 sm:$0xff]  }
  0x25   :  { %1363 = vmatprep.subr.bf16.mxu1 %v2336_v40  ;;  %v2388_v21 = vld [vmem:[%s3430_s1 + $0x604] ss:$16 sps:$4 sm:$0xff]   ;;  %v2386_v25 = vld [vmem:[%s3430_s1 + $0x600] ss:$16 sps:$4 sm:$0xff]   ;;  %v2404_v39 = vld [vmem:[%s3430_s1 + $0xa8] ss:$16 sps:$4 sm:$0xff]  }
  0x26   :  { %v2391_v26 = vld [vmem:[%s3430_s1 + $0x4a4] ss:$16 sps:$4 sm:$0xff]   ;;  %v2389_v29 = vld [vmem:[%s3430_s1 + $0x4a0] ss:$16 sps:$4 sm:$0xff]  }
  0x27   :  { %1323 = vmatpush2.bf16.msra.mxu0 %v2338_v41  ;;  %v2397_v32 = vld [vmem:[%s3430_s1 + $0x484] ss:$16 sps:$4 sm:$0xff]   ;;  %v2395_v34 = vld [vmem:[%s3430_s1 + $0x480] ss:$16 sps:$4 sm:$0xff]   ;;  %v2412_v41 = vld [vmem:[%s3430_s1 + $0x8c] ss:$16 sps:$4 sm:$0xff]  }
  0x28   :  { %1364 = vmatpush2.bf16.msra.mxu1 %v2339_v44  ;;  %1324 = vmatprep.subr.bf16.mxu0 %v2340_v45  ;;  %v2403_v36 = vld [vmem:[%s3430_s1 + $0x464] ss:$16 sps:$4 sm:$0xff]   ;;  %v2401_v38 = vld [vmem:[%s3430_s1 + $0x460] ss:$16 sps:$4 sm:$0xff]   ;;  %v2410_v44 = vld [vmem:[%s3430_s1 + $0x88] ss:$16 sps:$4 sm:$0xff]  }
  0x29   :  { %1365 = vmatprep.subr.bf16.mxu1 %v2342_v46  ;;  %v2409_v40 = vld [vmem:[%s3430_s1 + $0x444] ss:$16 sps:$4 sm:$0xff]   ;;  %v2407_v43 = vld [vmem:[%s3430_s1 + $0x440] ss:$16 sps:$4 sm:$0xff]   ;;  %v2418_v46 = vld [vmem:[%s3430_s1 + $0x6c] ss:$16 sps:$4 sm:$0xff]  }
  0x2a   :  { %v2415_v45 = vld [vmem:[%s3430_s1 + $0x424] ss:$16 sps:$4 sm:$0xff]   ;;  %v2455_v13 = vld [vmem:[%s3430_s1 + $0x540] ss:$16 sps:$4 sm:$0xff]  }
  0x2b   :  { %1325 = vmatpush2.bf16.msra.mxu0 %v2344_v47  ;;  %v2413_v47 = vld [vmem:[%s3430_s1 + $0x420] ss:$16 sps:$4 sm:$0xff]   ;;  %v2421_v49 = vld [vmem:[%s3430_s1 + $0x404] ss:$16 sps:$4 sm:$0xff]  }
  0x2c   :  { %1366 = vmatpush2.bf16.msra.mxu1 %v2345_v48  ;;  %1326 = vmatprep.subr.bf16.mxu0 %v2346_v50  ;;  %v2416_v48 = vld [vmem:[%s3430_s1 + $0x68] ss:$16 sps:$4 sm:$0xff]   ;;  %v2424_v50 = vld [vmem:[%s3430_s1 + $0x4c] ss:$16 sps:$4 sm:$0xff]  }
  0x2d   :  { %1367 = vmatprep.subr.bf16.mxu1 %v2348_v51  ;;  %v2419_v51 = vld [vmem:[%s3430_s1 + $0x400] ss:$16 sps:$4 sm:$0xff]  }
  0x2f   :  { %1327 = vmatpush2.bf16.msra.mxu0 %v2350_v53  ;;  %v2427_v53 = vld [vmem:[%s3430_s1 + $0x5e4] ss:$16 sps:$4 sm:$0xff]  }
  0x30   :  { %1368 = vmatpush2.bf16.msra.mxu1 %v2351_v55  ;;  %1328 = vmatprep.subr.bf16.mxu0 %v2352_v56  ;;  %v2425_v55 = vld [vmem:[%s3430_s1 + $0x5e0] ss:$16 sps:$4 sm:$0xff]   ;;  %v2428_v56 = vld [vmem:[%s3430_s1 + $0x28] ss:$16 sps:$4 sm:$0xff]  }
  0x31   :  { %1369 = vmatprep.subr.bf16.mxu1 %v2354_v57  ;;  %v2433_v57 = vld [vmem:[%s3430_s1 + $0x5c4] ss:$16 sps:$4 sm:$0xff]  }
  0x33   :  { %1329 = vmatpush2.bf16.msra.mxu0 %v2356_v59  ;;  %v2431_v59 = vld [vmem:[%s3430_s1 + $0x5c0] ss:$16 sps:$4 sm:$0xff]  }
  0x34   :  { %1370 = vmatpush2.bf16.msra.mxu1 %v2357_v61  ;;  %1330 = vmatprep.subr.bf16.mxu0 %v2358_v62  ;;  %v2439_v61 = vld [vmem:[%s3430_s1 + $0x5a4] ss:$16 sps:$4 sm:$0xff]   ;;  %v2442_v62 = vld [vmem:[%s3430_s1 + $0x1ec] ss:$16 sps:$4 sm:$0xff]  }
  0x35   :  { %1371 = vmatprep.subr.bf16.mxu1 %v2360_v63  ;;  %v2437_v63 = vld [vmem:[%s3430_s1 + $0x5a0] ss:$16 sps:$4 sm:$0xff]  }
  0x37   :  { %1331 = vmatpush2.bf16.msra.mxu0 %v2362_v1  ;;  %v2440_v1 = vld [vmem:[%s3430_s1 + $0x1e8] ss:$16 sps:$4 sm:$0xff]  }
  0x38   :  { %1372 = vmatpush2.bf16.msra.mxu1 %v2363_v2  ;;  %1332 = vmatprep.subr.bf16.mxu0 %v2364_v3  ;;  %v2445_v2 = vld [vmem:[%s3430_s1 + $0x584] ss:$16 sps:$4 sm:$0xff]   ;;  %v2448_v3 = vld [vmem:[%s3430_s1 + $0x1cc] ss:$16 sps:$4 sm:$0xff]  }
  0x39   :  { %1373 = vmatprep.subr.bf16.mxu1 %v2366_v4  ;;  %v2443_v4 = vld [vmem:[%s3430_s1 + $0x580] ss:$16 sps:$4 sm:$0xff]  }
  0x3b   :  { %1333 = vmatpush2.bf16.msra.mxu0 %v2368_v5  ;;  %v2446_v5 = vld [vmem:[%s3430_s1 + $0x1c8] ss:$16 sps:$4 sm:$0xff]  }
  0x3c   :  { %1374 = vmatpush2.bf16.msra.mxu1 %v2369_v6  ;;  %1334 = vmatprep.subr.bf16.mxu0 %v2370_v8  ;;  %v2451_v6 = vld [vmem:[%s3430_s1 + $0x564] ss:$16 sps:$4 sm:$0xff]   ;;  %v2449_v8 = vld [vmem:[%s3430_s1 + $0x560] ss:$16 sps:$4 sm:$0xff]  }
  0x3d   :  { %1375 = vmatprep.subr.bf16.mxu1 %v2372_v9  ;;  %v2452_v9 = vld [vmem:[%s3430_s1 + $0x1a8] ss:$16 sps:$4 sm:$0xff]  }
  0x3f   :  { %1335 = vmatpush2.bf16.msra.mxu0 %v2374_v10  ;;  %v2457_v10 = vld [vmem:[%s3430_s1 + $0x544] ss:$16 sps:$4 sm:$0xff]  }
  0x40   :  { %1376 = vmatpush2.bf16.msra.mxu1 %v2375_v12  ;;  %1386 = vmatprep.subr.bf16.mxu0 %v2379_v14  ;;  %v2460_v12 = vld [vmem:[%s3430_s1 + $0x18c] ss:$16 sps:$4 sm:$0xff]   ;;  %v2458_v14 = vld [vmem:[%s3430_s1 + $0x188] ss:$16 sps:$4 sm:$0xff]  }
  0x41   :  { %1439 = vmatprep.subr.bf16.mxu1 %v2382_v15  ;;  %v2463_v15 = vld [vmem:[%s3430_s1 + $0x524] ss:$16 sps:$4 sm:$0xff]  }
  0x42   :  { %1337 = vmatmul.mubr.bf16.vlgmr.msra.gmra.mxu0 %v2876_v11 }
  0x43   :  { %1378 = vmatmul.mubr.bf16.vlgmr.msra.gmra.mxu1 %v2890_v17  ;;  %1387 = vmatpush1.bf16.msra.mxu0 %v2377_v18  ;;  %v2461_v18 = vld [vmem:[%s3430_s1 + $0x520] ss:$16 sps:$4 sm:$0xff]  }
  0x44   :  { %1440 = vmatpush1.bf16.msra.mxu1 %v2380_v19  ;;  %1388 = vmatprep.subr.bf16.mxu0 %v2385_v20  ;;  %v2464_v19 = vld [vmem:[%s3430_s1 + $0x168] ss:$16 sps:$4 sm:$0xff]   ;;  %v2469_v20 = vld [vmem:[%s3430_s1 + $0x504] ss:$16 sps:$4 sm:$0xff]  }
  0x45   :  { %1441 = vmatprep.subr.bf16.mxu1 %v2388_v21  ;;  %1459 = vmatprep.mubr.bf16.mxu1 %v2636_v28  ;;  %v2472_v21 = vld [vmem:[%s3430_s1 + $0x14c] ss:$16 sps:$4 sm:$0xff]  }
  0x46   :  { %1418 = vmatprep.mubr.bf16.mxu0 %v2905_v22 }
  0x47   :  { %1389 = vmatpush1.bf16.msra.mxu0 %v2383_v24  ;;  %v2467_v24 = vld [vmem:[%s3430_s1 + $0x500] ss:$16 sps:$4 sm:$0xff]  }
  0x48   :  { %1442 = vmatpush1.bf16.msra.mxu1 %v2386_v25  ;;  %1390 = vmatprep.subr.bf16.mxu0 %v2391_v26  ;;  %v2470_v25 = vld [vmem:[%s3430_s1 + $0x148] ss:$16 sps:$4 sm:$0xff]   ;;  %v2475_v26 = vld [vmem:[%s3430_s1 + $0x12c] ss:$16 sps:$4 sm:$0xff]  }
  0x49   :  { %1468 = vmatprep.subr.bf16.mxu1 %v2394_v27  ;;  %v2478_v27 = vld [vmem:[%s3430_s1 + $0x2ec] ss:$16 sps:$4 sm:$0xff]  }
  0x4b   :  { %2198 = vmatmul.mubr.msk.bf16.vlgmr.msra.gmra.mxu1 %vm1300_vm0, %v2931_v30  ;;  %1391 = vmatpush1.bf16.msra.mxu0 %v2389_v29  ;;  %v2473_v29 = vld [vmem:[%s3430_s1 + $0x128] ss:$16 sps:$4 sm:$0xff]  }
  0x4c   :  { %1469 = vmatpush1.bf16.msra.mxu1 %v2392_v31  ;;  %1392 = vmatprep.subr.bf16.mxu0 %v2397_v32  ;;  %v2476_v31 = vld [vmem:[%s3430_s1 + $0x2e8] ss:$16 sps:$4 sm:$0xff]   ;;  %v2481_v32 = vld [vmem:[%s3430_s1 + $0x10c] ss:$16 sps:$4 sm:$0xff]  }
  0x4d   :  { %1470 = vmatprep.subr.bf16.mxu1 %v2400_v33  ;;  %1500 = vmatprep.mubr.bf16.mxu1 %v2831_v60  ;;  %v2434_v60 = vld [vmem:[%s3430_s1 + $0x8] ss:$16 sps:$4 sm:$0xff]   ;;  %v2484_v33 = vld [vmem:[%s3430_s1 + $0x2cc] ss:$16 sps:$4 sm:$0xff]  }
  0x4f   :  { %1393 = vmatpush1.bf16.msra.mxu0 %v2395_v34  ;;  %v2479_v34 = vld [vmem:[%s3430_s1 + $0x108] ss:$16 sps:$4 sm:$0xff]  }
  0x50   :  { %1471 = vmatpush1.bf16.msra.mxu1 %v2398_v35  ;;  %1394 = vmatprep.subr.bf16.mxu0 %v2403_v36  ;;  %v2482_v35 = vld [vmem:[%s3430_s1 + $0x2c8] ss:$16 sps:$4 sm:$0xff]   ;;  %v2487_v36 = vld [vmem:[%s3430_s1 + $0x2ac] ss:$16 sps:$4 sm:$0xff]  }
  0x51   :  { %1472 = vmatprep.subr.bf16.mxu1 %v2406_v37  ;;  %v2490_v37 = vld [vmem:[%s3430_s1 + $0x4ec] ss:$16 sps:$4 sm:$0xff]  }
  0x53   :  { %1395 = vmatpush1.bf16.msra.mxu0 %v2401_v38  ;;  %v2485_v38 = vld [vmem:[%s3430_s1 + $0x2a8] ss:$16 sps:$4 sm:$0xff]  }
  0x54   :  { %1473 = vmatpush1.bf16.msra.mxu1 %v2404_v39  ;;  %1396 = vmatprep.subr.bf16.mxu0 %v2409_v40  ;;  %v2488_v39 = vld [vmem:[%s3430_s1 + $0x4e8] ss:$16 sps:$4 sm:$0xff]   ;;  %v2493_v40 = vld [vmem:[%s3430_s1 + $0x28c] ss:$16 sps:$4 sm:$0xff]  }
  0x55   :  { %1474 = vmatprep.subr.bf16.mxu1 %v2412_v41  ;;  %v2496_v41 = vld [vmem:[%s3430_s1 + $0x4cc] ss:$16 sps:$4 sm:$0xff]  }
  0x57   :  { %1397 = vmatpush1.bf16.msra.mxu0 %v2407_v43  ;;  %v2491_v43 = vld [vmem:[%s3430_s1 + $0x288] ss:$16 sps:$4 sm:$0xff]  }
  0x58   :  { %1475 = vmatpush1.bf16.msra.mxu1 %v2410_v44  ;;  %1398 = vmatprep.subr.bf16.mxu0 %v2415_v45  ;;  %v2499_v44 = vld [vmem:[%s3430_s1 + $0x26c] ss:$16 sps:$4 sm:$0xff]  }
  0x59   :  { %1476 = vmatprep.subr.bf16.mxu1 %v2418_v46  ;;  %v2502_v45 = vld [vmem:[%s3430_s1 + $0x4ac] ss:$16 sps:$4 sm:$0xff]   ;;  %v2497_v46 = vld [vmem:[%s3430_s1 + $0x268] ss:$16 sps:$4 sm:$0xff]  }
  0x5b   :  { %1399 = vmatpush1.bf16.msra.mxu0 %v2413_v47  ;;  %v2505_v47 = vld [vmem:[%s3430_s1 + $0x24c] ss:$16 sps:$4 sm:$0xff]  }
  0x5c   :  { %1477 = vmatpush1.bf16.msra.mxu1 %v2416_v48  ;;  %1400 = vmatprep.subr.bf16.mxu0 %v2421_v49  ;;  %v2508_v48 = vld [vmem:[%s3430_s1 + $0x48c] ss:$16 sps:$4 sm:$0xff]   ;;  %v2503_v49 = vld [vmem:[%s3430_s1 + $0x248] ss:$16 sps:$4 sm:$0xff]  }
  0x5d   :  { %1478 = vmatprep.subr.bf16.mxu1 %v2424_v50  ;;  %v2511_v50 = vld [vmem:[%s3430_s1 + $0x22c] ss:$16 sps:$4 sm:$0xff]  }
  0x5f   :  { %1401 = vmatpush1.bf16.msra.mxu0 %v2419_v51  ;;  %v2514_v51 = vld [vmem:[%s3430_s1 + $0x46c] ss:$16 sps:$4 sm:$0xff]  }
  0x60   :  { %1479 = vmatpush1.bf16.msra.mxu1 %v2422_v52  ;;  %1402 = vmatprep.subr.bf16.mxu0 %v2427_v53  ;;  %v2509_v52 = vld [vmem:[%s3430_s1 + $0x228] ss:$16 sps:$4 sm:$0xff]  }
  0x61   :  { %1480 = vmatprep.subr.bf16.mxu1 %v2430_v54  ;;  %v2512_v53 = vld [vmem:[%s3430_s1 + $0x468] ss:$16 sps:$4 sm:$0xff]   ;;  %v2517_v54 = vld [vmem:[%s3430_s1 + $0x20c] ss:$16 sps:$4 sm:$0xff]  }
  0x63   :  { %1403 = vmatpush2.bf16.msra.mxu0 %v2425_v55  ;;  %v2520_v55 = vld [vmem:[%s3430_s1 + $0x44c] ss:$16 sps:$4 sm:$0xff]  }
  0x64   :  { %1481 = vmatpush1.bf16.msra.mxu1 %v2428_v56  ;;  %1404 = vmatprep.subr.bf16.mxu0 %v2433_v57  ;;  %v2515_v56 = vld [vmem:[%s3430_s1 + $0x208] ss:$16 sps:$4 sm:$0xff]  }
  0x65   :  { %1482 = vmatprep.subr.bf16.mxu1 %v2436_v58  ;;  %v2518_v57 = vld [vmem:[%s3430_s1 + $0x448] ss:$16 sps:$4 sm:$0xff]   ;;  %v2523_v58 = vld [vmem:[%s3430_s1 + $0x3ec] ss:$16 sps:$4 sm:$0xff]  }
  0x67   :  { %1405 = vmatpush2.bf16.msra.mxu0 %v2431_v59  ;;  %v2526_v59 = vld [vmem:[%s3430_s1 + $0x42c] ss:$16 sps:$4 sm:$0xff]  }
  0x68   :  { %1483 = vmatpush1.bf16.msra.mxu1 %v2434_v60  ;;  %1406 = vmatprep.subr.bf16.mxu0 %v2439_v61 }
  0x69   :  { %1484 = vmatprep.subr.bf16.mxu1 %v2442_v62 }
  0x6b   :  { %1407 = vmatpush2.bf16.msra.mxu0 %v2437_v63 }
  0x6c   :  { %1485 = vmatpush2.bf16.msra.mxu1 %v2440_v1  ;;  %1408 = vmatprep.subr.bf16.mxu0 %v2445_v2 }
  0x6d   :  { %1486 = vmatprep.subr.bf16.mxu1 %v2448_v3 }
  0x6f   :  { %1409 = vmatpush2.bf16.msra.mxu0 %v2443_v4 }
  0x70   :  { %1487 = vmatpush2.bf16.msra.mxu1 %v2446_v5  ;;  %1410 = vmatprep.subr.bf16.mxu0 %v2451_v6 }
  0x71   :  { %1488 = vmatprep.subr.bf16.mxu1 %v2454_v7 }
  0x73   :  { %1411 = vmatpush2.bf16.msra.mxu0 %v2449_v8 }
  0x74   :  { %1489 = vmatpush2.bf16.msra.mxu1 %v2452_v9  ;;  %1412 = vmatprep.subr.bf16.mxu0 %v2457_v10 }
  0x75   :  { %1490 = vmatprep.subr.bf16.mxu1 %v2460_v12 }
  0x77   :  { %1413 = vmatpush2.bf16.msra.mxu0 %v2455_v13 }
  0x78   :  { %1491 = vmatpush2.bf16.msra.mxu1 %v2458_v14  ;;  %1414 = vmatprep.subr.bf16.mxu0 %v2463_v15 }
  0x79   :  { %1492 = vmatprep.subr.bf16.mxu1 %v2466_v16 }
  0x7b   :  { %1415 = vmatpush2.bf16.msra.mxu0 %v2461_v18 }
  0x7c   :  { %1493 = vmatpush2.bf16.msra.mxu1 %v2464_v19  ;;  %1416 = vmatprep.subr.bf16.mxu0 %v2469_v20 }
  0x7d   :  { %1494 = vmatprep.subr.bf16.mxu1 %v2472_v21 }
  0x7f   :  { %1417 = vmatpush2.bf16.msra.mxu0 %v2467_v24 }
  0x80   :  { %1495 = vmatpush2.bf16.msra.mxu1 %v2470_v25  ;;  %1509 = vmatprep.subr.bf16.mxu0 %v2478_v27 }
  0x81   :  { %1496 = vmatprep.subr.bf16.mxu1 %v2475_v26 }
  0x82   :  { %1419 = vmatmul.mubr.bf16.vlgmr.msra.gmra.mxu0 %v2908_v23 }
  0x83   :  { %1510 = vmatpush1.bf16.msra.mxu0 %v2476_v31  ;;  %1541 = vmatprep.mubr.bf16.mxu0 %v2844_v0  ;;  %v2494_v0 = vld [vmem:[%s3430_s1 + $0x4c8] ss:$16 sps:$4 sm:$0xff]  }
  0x84   :  { %1497 = vmatpush2.bf16.msra.mxu1 %v2473_v29  ;;  %1511 = vmatprep.subr.bf16.mxu0 %v2484_v33 }
  0x85   :  { %1498 = vmatprep.subr.bf16.mxu1 %v2481_v32 }
  0x87   :  { %1512 = vmatpush1.bf16.msra.mxu0 %v2482_v35 }
  0x88   :  { %1499 = vmatpush2.bf16.msra.mxu1 %v2479_v34  ;;  %1513 = vmatprep.subr.bf16.mxu0 %v2487_v36 }
  0x89   :  { %1550 = vmatprep.subr.bf16.mxu1 %v2490_v37 }
  0x8b   :  { %1501 = vmatmul.mubr.bf16.vlgmr.msra.gmra.mxu1 %v2876_v11  ;;  %1514 = vmatpush1.bf16.msra.mxu0 %v2485_v38  ;;  %v2500_v11 = vld [vmem:[%s3430_s1 + $0x4a8] ss:$16 sps:$4 sm:$0xff]  }
  0x8c   :  { %1551 = vmatpush1.bf16.msra.mxu1 %v2488_v39  ;;  %1515 = vmatprep.subr.bf16.mxu0 %v2493_v40 }
  0x8d   :  { %1552 = vmatprep.subr.bf16.mxu1 %v2496_v41  ;;  %1582 = vmatprep.mubr.bf16.mxu1 %v2905_v22  ;;  %v2506_v22 = vld [vmem:[%s3430_s1 + $0x488] ss:$16 sps:$4 sm:$0xff]  }
  0x8f   :  { %1516 = vmatpush1.bf16.msra.mxu0 %v2491_v43 }
  0x90   :  { %1553 = vmatpush1.bf16.msra.mxu1 %v2494_v0  ;;  %1517 = vmatprep.subr.bf16.mxu0 %v2499_v44 }
  0x91   :  { %1554 = vmatprep.subr.bf16.mxu1 %v2502_v45 }
  0x93   :  { %1518 = vmatpush1.bf16.msra.mxu0 %v2497_v46 }
  0x94   :  { %1555 = vmatpush1.bf16.msra.mxu1 %v2500_v11  ;;  %1519 = vmatprep.subr.bf16.mxu0 %v2505_v47 }
  0x95   :  { %1556 = vmatprep.subr.bf16.mxu1 %v2508_v48 }
  0x97   :  { %1520 = vmatpush1.bf16.msra.mxu0 %v2503_v49 }
  0x98   :  { %1557 = vmatpush1.bf16.msra.mxu1 %v2506_v22  ;;  %1521 = vmatprep.subr.bf16.mxu0 %v2511_v50 }
  0x99   :  { %1558 = vmatprep.subr.bf16.mxu1 %v2514_v51 }
  0x9b   :  { %1522 = vmatpush1.bf16.msra.mxu0 %v2509_v52 }
  0x9c   :  { %1559 = vmatpush1.bf16.msra.mxu1 %v2512_v53  ;;  %1523 = vmatprep.subr.bf16.mxu0 %v2517_v54 }
  0x9d   :  { %1560 = vmatprep.subr.bf16.mxu1 %v2520_v55 }
  0x9e   :  { %10 = vsyncpa [#allocation3], 0  ;;  %v2521_v60 = vld [vmem:[%s3430_s1 + $0x3e8] ss:$16 sps:$4 sm:$0xff]   ;;  %v2529_v62 = vld [vmem:[%s3430_s1 + $0x3cc] ss:$16 sps:$4 sm:$0xff]  }
  0x9f   :  { %1524 = vmatpush1.bf16.msra.mxu0 %v2515_v56  ;;  %v2524_v61 = vld [vmem:[%s3430_s1 + $0x428] ss:$16 sps:$4 sm:$0xff]   ;;  %v2532_v63 = vld [vmem:[%s3430_s1 + $0x40c] ss:$16 sps:$4 sm:$0xff]   ;;  %v2583_v43 = vld [vmem:[%s3432_s3 + $0x70] sm:$0xff]   ;;  %s2637_s0 = smov [#allocation2]  }
  0xa0   :  { %1561 = vmatpush1.bf16.msra.mxu1 %v2518_v57  ;;  %1525 = vmatprep.subr.bf16.mxu0 %v2523_v58  ;;  %v2527_v1 = vld [vmem:[%s3430_s1 + $0x3c8] ss:$16 sps:$4 sm:$0xff]   ;;  %v2535_v3 = vld [vmem:[%s3430_s1 + $0x3ac] ss:$16 sps:$4 sm:$0xff]   ;;  %v2599_v46 = vld [vmem:[%s3432_s3 + $0xf0] sm:$0xff]   ;;  %s1990_s19 = sshll.u32 %s2637_s0, 4  ;;  %s1991_s19 = int_to_ptr.vmem [resolvable:$true] %s1990_s19 }
  0xa1   :  { %1562 = vmatprep.subr.bf16.mxu1 %v2526_v59  ;;  %v2530_v2 = vld [vmem:[%s3430_s1 + $0x408] ss:$16 sps:$4 sm:$0xff]   ;;  %v2538_v4 = vld [vmem:[%s3430_s1 + $0x5ec] ss:$16 sps:$4 sm:$0xff]   ;;  %v2588_v11 = vld [vmem:[%s3432_s3 + $0x20] sm:$0xff]   ;;  %s2613_s20 = scalar_lea.vmem %s1991_s19, 32  ;;  %p2618_p1 = scmp.lt.s32.totalorder %s1991_s19, %s1991_s19 }
  0xa2   :  { %v2533_v5 = vld [vmem:[%s3430_s1 + $0x3a8] ss:$16 sps:$4 sm:$0xff]   ;;  %v2541_v7 = vld [vmem:[%s3430_s1 + $0x38c] ss:$16 sps:$4 sm:$0xff]   ;;  %v2600_v47 = vld [vmem:[%s3432_s3 + $0xb0] sm:$0xff]   ;;  %p2614_p0 = scmp.ne.s32.totalorder %s1991_s19, %s2613_s20  ;;  %p2619_p2 = scmp.lt.s32.totalorder %s2613_s20, %s2613_s20 }
  0xa3   :  { %1526 = vmatpush2.bf16.msra.mxu0 %v2521_v60  ;;  %v2536_v6 = vld [vmem:[%s3430_s1 + $0x5e8] ss:$16 sps:$4 sm:$0xff]   ;;  %v2544_v8 = vld [vmem:[%s3430_s1 + $0x5cc] ss:$16 sps:$4 sm:$0xff]   ;;  %v2591_v51 = vld [vmem:[%s3432_s3 + $0x50] sm:$0xff]  }
  0xa4   :  { %1563 = vmatpush1.bf16.msra.mxu1 %v2524_v61  ;;  %1527 = vmatprep.subr.bf16.mxu0 %v2529_v62  ;;  %v2539_v9 = vld [vmem:[%s3430_s1 + $0x388] ss:$16 sps:$4 sm:$0xff]   ;;  %v2547_v12 = vld [vmem:[%s3430_s1 + $0x36c] ss:$16 sps:$4 sm:$0xff]   ;;  %v2592_v52 = vld [vmem:[%s3432_s3 + $0x10] sm:$0xff]   ;;  %p2620_p3 = por %p2619_p2, %p2618_p1 }
  0xa5   :  { %1564 = vmatprep.subr.bf16.mxu1 %v2532_v63  ;;  %v2542_v10 = vld [vmem:[%s3430_s1 + $0x5c8] ss:$16 sps:$4 sm:$0xff]   ;;  %v2550_v13 = vld [vmem:[%s3430_s1 + $0x5ac] ss:$16 sps:$4 sm:$0xff]   ;;  %v2595_v55 = vld [vmem:[%s3432_s3 + $0x40] sm:$0xff]  }
  0xa6   :  { %v2545_v14 = vld [vmem:[%s3430_s1 + $0x368] ss:$16 sps:$4 sm:$0xff]   ;;  %v2553_v16 = vld [vmem:[%s3430_s1 + $0x34c] ss:$16 sps:$4 sm:$0xff]   ;;  %v2596_v56 = vld [vmem:[%s3432_s3] sm:$0xff]   ;;  %p2621_p4 = pnand %p2620_p3, %p2614_p0 }
  0xa7   :  { %1528 = vmatpush2.bf16.msra.mxu0 %v2527_v1  ;;  %v2548_v15 = vld [vmem:[%s3430_s1 + $0x5a8] ss:$16 sps:$4 sm:$0xff]   ;;  %v2556_v18 = vld [vmem:[%s3430_s1 + $0x58c] ss:$16 sps:$4 sm:$0xff]   ;;  %v2603_v57 = vld [vmem:[%s3432_s3 + $0xe0] sm:$0xff]  }
  0xa8   :  { %1565 = vmatpush1.bf16.msra.mxu1 %v2530_v2  ;;  %1529 = vmatprep.subr.bf16.mxu0 %v2535_v3  ;;  %v2551_v19 = vld [vmem:[%s3430_s1 + $0x348] ss:$16 sps:$4 sm:$0xff]   ;;  %v2559_v21 = vld [vmem:[%s3430_s1 + $0x32c] ss:$16 sps:$4 sm:$0xff]   ;;  %v2604_v58 = vld [vmem:[%s3432_s3 + $0xa0] sm:$0xff]  }
  0xa9   :  { %1566 = vmatprep.subr.bf16.mxu1 %v2538_v4  ;;  %v2554_v20 = vld [vmem:[%s3430_s1 + $0x588] ss:$16 sps:$4 sm:$0xff]   ;;  %v2562_v24 = vld [vmem:[%s3430_s1 + $0x56c] ss:$16 sps:$4 sm:$0xff]  }
  0xaa   :  { %v2557_v25 = vld [vmem:[%s3430_s1 + $0x328] ss:$16 sps:$4 sm:$0xff]   ;;  %v2565_v27 = vld [vmem:[%s3430_s1 + $0x30c] ss:$16 sps:$4 sm:$0xff]  }
  0xab   :  { %1530 = vmatpush2.bf16.msra.mxu0 %v2533_v5  ;;  %v2560_v26 = vld [vmem:[%s3430_s1 + $0x568] ss:$16 sps:$4 sm:$0xff]   ;;  %v2568_v29 = vld [vmem:[%s3430_s1 + $0x54c] ss:$16 sps:$4 sm:$0xff]  }
  0xac   :  { %1567 = vmatpush2.bf16.msra.mxu1 %v2536_v6  ;;  %1531 = vmatprep.subr.bf16.mxu0 %v2541_v7  ;;  %v2563_v31 = vld [vmem:[%s3430_s1 + $0x308] ss:$16 sps:$4 sm:$0xff]   ;;  %v2571_v33 = vld [vmem:[%s3430_s1 + $0x52c] ss:$16 sps:$4 sm:$0xff]   ;;  %v2607_v6 = vld [vmem:[%s3432_s3 + $0xd0] sm:$0xff]  }
  0xad   :  { %1568 = vmatprep.subr.bf16.mxu1 %v2544_v8  ;;  %v2566_v32 = vld [vmem:[%s3430_s1 + $0x548] ss:$16 sps:$4 sm:$0xff]   ;;  %v2574_v34 = vld [vmem:[%s3430_s1 + $0x62c] ss:$16 sps:$4 sm:$0xff]   ;;  %v2608_v7 = vld [vmem:[%s3432_s3 + $0x90] sm:$0xff]  }
  0xae   :  { %v2569_v35 = vld [vmem:[%s3430_s1 + $0x528] ss:$16 sps:$4 sm:$0xff]   ;;  %v2577_v37 = vld [vmem:[%s3430_s1 + $0x50c] ss:$16 sps:$4 sm:$0xff]  }
  0xaf   :  { %1532 = vmatpush2.bf16.msra.mxu0 %v2539_v9  ;;  %v2572_v36 = vld [vmem:[%s3430_s1 + $0x628] ss:$16 sps:$4 sm:$0xff]   ;;  %v2580_v38 = vld [vmem:[%s3430_s1 + $0x60c] ss:$16 sps:$4 sm:$0xff]  }
  0xb0   :  { %1569 = vmatpush2.bf16.msra.mxu1 %v2542_v10  ;;  %1533 = vmatprep.subr.bf16.mxu0 %v2547_v12  ;;  %v2575_v39 = vld [vmem:[%s3430_s1 + $0x508] ss:$16 sps:$4 sm:$0xff]  }
  0xb1   :  { %1570 = vmatprep.subr.bf16.mxu1 %v2550_v13  ;;  %v2578_v40 = vld [vmem:[%s3430_s1 + $0x608] ss:$16 sps:$4 sm:$0xff]  }
  0xb2   :  { %v2581_v41 = vld [vmem:[%s3432_s3 + $0x78] sm:$0xff]   ;;  %v2585_v0 = vld [vmem:[%s3432_s3 + $0x68] sm:$0xff]  }
  0xb3   :  { %1534 = vmatpush2.bf16.msra.mxu0 %v2545_v14  ;;  %v2586_v44 = vld [vmem:[%s3432_s3 + $0x28] sm:$0xff]   ;;  %v2598_v45 = vld [vmem:[%s3432_s3 + $0xb8] sm:$0xff]  }
  0xb4   :  { %1571 = vmatpush2.bf16.msra.mxu1 %v2548_v15  ;;  %1535 = vmatprep.subr.bf16.mxu0 %v2553_v16  ;;  %v2589_v48 = vld [vmem:[%s3432_s3 + $0x58] sm:$0xff]   ;;  %v2601_v49 = vld [vmem:[%s3432_s3 + $0xe8] sm:$0xff]   ;;  %v2611_v15 = vld [vmem:[%s3432_s3 + $0xc0] sm:$0xff]  }
  0xb5   :  { %1572 = vmatprep.subr.bf16.mxu1 %v2556_v18  ;;  %v2590_v22 = vld [vmem:[%s3432_s3 + $0x18] sm:$0xff]   ;;  %v2602_v50 = vld [vmem:[%s3432_s3 + $0xa8] sm:$0xff]   ;;  %v2612_v16 = vld [vmem:[%s3432_s3 + $0x80] sm:$0xff]   ;;  %v227_v18 = vsub.s32 0, %v2785_v42 }
  0xb6   :  { %v2593_v53 = vld [vmem:[%s3432_s3 + $0x48] sm:$0xff]   ;;  %v2605_v63 = vld [vmem:[%s3432_s3 + $0xd8] sm:$0xff]  }
  0xb7   :  { %1536 = vmatpush2.bf16.msra.mxu0 %v2551_v19  ;;  %v2594_v54 = vld [vmem:[%s3432_s3 + $0x8] sm:$0xff]   ;;  %v2606_v1 = vld [vmem:[%s3432_s3 + $0x98] sm:$0xff]   ;;  %v223_v19 = vld [vmem:[%s3431_s2] sm:$0xf] }
  0xb8   :  { %1573 = vmatpush2.bf16.msra.mxu1 %v2554_v20  ;;  %1537 = vmatprep.subr.bf16.mxu0 %v2559_v21  ;;  %v2609_v10 = vld [vmem:[%s3432_s3 + $0xc8] sm:$0xff]   ;;  %v231_v20 = vsub.s32 1, %v2785_v42  ;;  %v228_v21 = vrot.slane %v223_v19, %v227_v18 }
  0xb9   :  { %1574 = vmatprep.subr.bf16.mxu1 %v2562_v24  ;;  %v2610_v12 = vld [vmem:[%s3432_s3 + $0x88] sm:$0xff]  }
  0xba   :  { %v232_v24 = vrot.slane %v223_v19, %v231_v20 }
  0xbb   :  { %1538 = vmatpush2.bf16.msra.mxu0 %v2557_v25 }
  0xbc   :  { %1575 = vmatpush2.bf16.msra.mxu1 %v2560_v26  ;;  %1539 = vmatprep.subr.bf16.mxu0 %v2565_v27 }
  0xbd   :  { %1576 = vmatprep.subr.bf16.mxu1 %v2568_v29 }
  0xbf   :  { %1540 = vmatpush2.bf16.msra.mxu0 %v2563_v31 }
  0xc0   :  { %1577 = vmatpush2.bf16.msra.mxu1 %v2566_v32  ;;  %1603 = vmatprep.subr.bf16.mxu0 %v2574_v34 }
  0xc1   :  { %1578 = vmatprep.subr.bf16.mxu1 %v2571_v33 }
  0xc2   :  { %1542 = vmatmul.mubr.bf16.vlgmr.msra.gmra.mxu0 %v2890_v17  ;;  %v2582_v17 = vld [vmem:[%s3432_s3 + $0x38] sm:$0xff]  }
  0xc3   :  { %1604 = vmatpush1.bf16.msra.mxu0 %v2572_v36  ;;  %1623 = vmatprep.mubr.bf16.mxu0 %v2636_v28  ;;  %v2584_v28 = vld [vmem:[%s3432_s3 + $0x30] sm:$0xff]  }
  0xc4   :  { %1579 = vmatpush2.bf16.msra.mxu1 %v2569_v35  ;;  %1605 = vmatprep.subr.bf16.mxu0 %v2580_v38 }
  0xc5   :  { %1580 = vmatprep.subr.bf16.mxu1 %v2577_v37 }
  0xc7   :  { %1606 = vmatpush1.bf16.msra.mxu0 %v2578_v40 }
  0xc8   :  { %1581 = vmatpush2.bf16.msra.mxu1 %v2575_v39  ;;  %2233 = vmatprep.subr.bf16.mxu0 %v2581_v41 }
  0xca   :  { %2199 = vmatmul.mubr.msk.bf16.vlgmr.msra.gmra.mxu0 %vm1300_vm0, %v2931_v30  ;;  %v2597_v30 = vld [vmem:[%s3432_s3 + $0xf8] sm:$0xff]  }
  0xcb   :  { %1583 = vmatmul.mubr.bf16.vlgmr.msra.gmra.mxu1 %v2908_v23  ;;  %2234 = vmatpush3.bf16.msra.mxu0 %v2582_v17  ;;  %v2587_v23 = vld [vmem:[%s3432_s3 + $0x60] sm:$0xff]  }
  0xcc   :  { %2235 = vmatprep.subr.bf16.mxu0 %v2583_v43  ;;  %2255 = vmatprep.subr.bf16.mxu1 %v2597_v30  ;;  %v239_v30 = vsub.s32 3, %v2785_v42 }
  0xcd   :  { %2256 = vmatpush3.bf16.msra.mxu1 %v2598_v45 }
  0xce   :  { %2257 = vmatprep.subr.bf16.mxu1 %v2599_v46 }
  0xcf   :  { %2236 = vmatpush3.bf16.msra.mxu0 %v2584_v28 }
  0xd0   :  { %2237 = vmatprep.subr.bf16.mxu0 %v2585_v0 }
  0xd1   :  { %2258 = vmatpush3.bf16.msra.mxu1 %v2600_v47  ;;  %v240_v47 = vrot.slane %v223_v19, %v239_v30 }
  0xd2   :  { %2259 = vmatprep.subr.bf16.mxu1 %v2601_v49 }
  0xd3   :  { %2238 = vmatpush3.bf16.msra.mxu0 %v2586_v44 }
  0xd4   :  { %2239 = vmatprep.subr.bf16.mxu0 %v2587_v23  ;;  %v235_v23 = vsub.s32 2, %v2785_v42 }
  0xd5   :  { %2260 = vmatpush3.bf16.msra.mxu1 %v2602_v50 }
  0xd6   :  { %2261 = vmatprep.subr.bf16.mxu1 %v2603_v57  ;;  %v236_v46 = vrot.slane %v223_v19, %v235_v23 }
  0xd7   :  { %2240 = vmatpush3.bf16.msra.mxu0 %v2588_v11 }
  0xd8   :  { %2241 = vmatprep.subr.bf16.mxu0 %v2589_v48 }
  0xd9   :  { %2262 = vmatpush3.bf16.msra.mxu1 %v2604_v58 }
  0xda   :  { %2263 = vmatprep.subr.bf16.mxu1 %v2605_v63 }
  0xdb   :  { %2242 = vmatpush3.bf16.msra.mxu0 %v2590_v22 }
  0xdc   :  { %2243 = vmatprep.subr.bf16.mxu0 %v2591_v51 }
  0xdd   :  { %2264 = vmatpush3.bf16.msra.mxu1 %v2606_v1 }
  0xde   :  { %2265 = vmatprep.subr.bf16.mxu1 %v2607_v6 }
  0xdf   :  { %2244 = vmatpush3.bf16.msra.mxu0 %v2592_v52 }
  0xe0   :  { %2245 = vmatprep.subr.bf16.mxu0 %v2593_v53 }
  0xe1   :  { %2266 = vmatpush3.bf16.msra.mxu1 %v2608_v7 }
  0xe2   :  { %2267 = vmatprep.subr.bf16.mxu1 %v2609_v10  ;;  %v2200_v10 = vld [vmem:[%s3433_s4] ss:$0 sm:$0xff] }
  0xe3   :  { %2246 = vmatpush3.bf16.msra.mxu0 %v2594_v54 }
  0xe4   :  { %2247 = vmatprep.subr.bf16.mxu0 %v2595_v55 }
  0xe5   :  { %2268 = vmatpush3.bf16.msra.mxu1 %v2610_v12 }
  0xe6   :  { %2269 = vmatprep.subr.bf16.mxu1 %v2611_v15 }
  0xe7   :  { %2248 = vmatpush3.bf16.msra.mxu0 %v2596_v56 }
  0xe9   :  { %2270 = vmatpush3.bf16.msra.mxu1 %v2612_v16 }
 0x102   :  { %v1338_v59 = vpop.f32.mrf.mxu0 }
 0x103   :  { %v1379_v60 = vpop.f32.mrf.mxu1  ;;  %v1339_v25 = vadd.f32 %v1338_v59, %v228_v21 }
 0x104   :  { %v1340_v61 = vpop.f32.mrf.mxu0 }
 0x105   :  { %v1381_v62 = vpop.f32.mrf.mxu1  ;;  %v1341_v26 = vadd.f32 %v1340_v61, %v232_v24  ;;  %v1380_v27 = vadd.f32 %v1379_v60, %v1339_v25 }
 0x106   :  { %v1342_v2 = vpop.f32.mrf.mxu0 }
 0x107   :  { %v1383_v3 = vpop.f32.mrf.mxu1  ;;  %v1382_v31 = vadd.f32 %v1381_v62, %v1341_v26 }
 0x108   :  { %v1343_v4 = vpop.f32.mrf.mxu0 }
 0x109   :  { %v1384_v5 = vpop.f32.mrf.mxu1 }
 0x10b   :  { %v1461_v8 = vpop.f32.mrf.mxu1 }
 0x10d   :  { %v1463_v9 = vpop.f32.mrf.mxu1 }
 0x10f   :  { %v1465_v13 = vpop.f32.mrf.mxu1 }
 0x111   :  { %v1466_v14 = vpop.f32.mrf.mxu1 }
 0x142   :  { %v1420_v29 = vpop.f32.mrf.mxu0 }
 0x143   :  { %v1421_v32 = vadd.f32 %v1420_v29, %v1380_v27 }
 0x144   :  { %v1422_v33 = vpop.f32.mrf.mxu0 }
 0x145   :  { %v1462_v34 = vadd.f32 %v1461_v8, %v1421_v32  ;;  %v1423_v35 = vadd.f32 %v1422_v33, %v1382_v31 }
 0x146   :  { %v1424_v36 = vpop.f32.mrf.mxu0 }
 0x147   :  { %v1464_v37 = vadd.f32 %v1463_v9, %v1423_v35  ;;  %v1632_v38 = vmax.f32 %v1462_v34, 0.0 }
 0x148   :  { %v1425_v39 = vpop.f32.mrf.mxu0 }
 0x149   :  { %v1633_v40 = vmax.f32 %v1464_v37, 0.0  ;;  %v1636_v43 = vpack.c.bf16 %v1632_v38, %v1632_v38 }
 0x14b   :  { %v1502_v41 = vpop.f32.mrf.mxu1  ;;  %v1637_v17 = vpack.c.bf16 %v1633_v40, %v1633_v40 }
 0x14c   :  { %v1503_v49 = vadd.f32 %v1502_v41, %v236_v46 }
 0x14d   :  { %v1504_v28 = vpop.f32.mrf.mxu1  ;;  %1935 = vmatprep.mubr.bf16.mxu0 %v1637_v17 }
 0x14e   :  { %1936 = vmatmul.mubr.bf16.vlgmr.msra.gmra.mxu0 %v1636_v43  ;;  %v1505_v50 = vadd.f32 %v1504_v28, %v240_v47 }
 0x14f   :  { %v1506_v0 = vpop.f32.mrf.mxu1 }
 0x151   :  { %v1507_v44 = vpop.f32.mrf.mxu1 }
 0x182   :  { %v1543_v45 = vpop.f32.mrf.mxu0 }
 0x183   :  { %v1544_v51 = vadd.f32 %v1543_v45, %v1503_v49 }
 0x184   :  { %v1545_v11 = vpop.f32.mrf.mxu0 }
 0x185   :  { %v1546_v54 = vadd.f32 %v1545_v11, %v1505_v50 }
 0x186   :  { %v1547_v48 = vpop.f32.mrf.mxu0 }
 0x188   :  { %v1548_v22 = vpop.f32.mrf.mxu0 }
 0x18a   :  { %v1625_v53 = vpop.f32.mrf.mxu0 }
 0x18b   :  { %v1584_v52 = vpop.f32.mrf.mxu1 }
 0x18c   :  { %v1585_v55 = vadd.f32 %v1584_v52, %v1544_v51  ;;  %v1627_v57 = vpop.f32.mrf.mxu0 }
 0x18d   :  { %v1586_v56 = vpop.f32.mrf.mxu1 }
 0x18e   :  { %v1626_v58 = vadd.f32 %v1625_v53, %v1585_v55  ;;  %v1587_v59 = vadd.f32 %v1586_v56, %v1546_v54  ;;  %v1629_v61 = vpop.f32.mrf.mxu0 }
 0x18f   :  { %v1588_v60 = vpop.f32.mrf.mxu1 }
 0x190   :  { %v1628_v42 = vadd.f32 %v1627_v57, %v1587_v59  ;;  %v1634_v62 = vmax.f32 %v1626_v58, 0.0  ;;  %v1630_v1 = vpop.f32.mrf.mxu0 }
 0x191   :  { %v1589_v63 = vpop.f32.mrf.mxu1 }
 0x192   :  { %v1635_v2 = vmax.f32 %v1628_v42, 0.0  ;;  %v1638_v4 = vpack.c.bf16 %v1634_v62, %v1634_v62 }
 0x194   :  { %v1639_v3 = vpack.c.bf16 %v1635_v2, %v1635_v2 }
 0x196   :  { %1975 = vmatprep.mubr.bf16.mxu1 %v1639_v3 }
 0x197   :  { %1976 = vmatmul.mubr.bf16.vlgmr.msra.gmra.mxu1 %v1638_v4 }
 0x20e   :  { %v2249_v5 = vpop.f32.mrf.mxu0 }
 0x210   :  { %v2250_v6 = vpop.f32.mrf.mxu0 }
 0x211   :  { %v2251_v7 = vadd.f32 %v2250_v6, %v2249_v5 }
 0x212   :  { %v2252_v8 = vpop.f32.mrf.mxu0 }
 0x213   :  { %v1938_v14 = vadd.f32 %v2251_v7, %v2200_v10 }
 0x214   :  { %v2253_v9 = vpop.f32.mrf.mxu0 }
 0x257   :  { %v2271_v12 = vpop.f32.mrf.mxu1 }
 0x259   :  { %v2272_v13 = vpop.f32.mrf.mxu1 }
 0x25a   :  { %v2273_v15 = vadd.f32 %v2272_v13, %v2271_v12 }
 0x25b   :  { %v2274_v16 = vpop.f32.mrf.mxu1 }
 0x25c   :  { %v1978_v18 = vadd.f32 %v2273_v15, %v1938_v14 }
 0x25d   :  { %v2275_v19 = vpop.f32.mrf.mxu1 }
 0x25e   :  { %1983 = vst [vmem:[#allocation2] sm:$0x3] %v1978_v18 }
 0x25f   :  { %2624 = shalt.err (!%p2621_p4)
}
 0x260   :  { %1993 = dma.vmem_to_hbm [thread:$0]  %s1991_s19, 32, %s3434_s5, [#allocation3]  }
 0x261   :  { %2633 = dma.done.wait [#allocation3], 32  }
 0x262   :  { %2634 = vsyncadd [#allocation3], 4294967264 }
 0x263   :  { %1997 = vsyncpa [#allocation3], 1 }

</bundles_post_ra>
